<compile_context>
chip_gen: v7x
topology: tpu7x:2x2x1
jax: 0.10.0
libtpu: 0.0.40
codegen_flags: <defaults>
</compile_context>

<pallas_src>
import functools
import jax
import jax.numpy as jnp
from jax.experimental import pallas as pl
from jax.experimental.pallas import tpu as pltpu


# ----------------------------- fused Pallas kernel -----------------------------

def _decoder_kernel(x_ref, enc_ref,
                    ln_w_ref, ln_b_ref,
                    sqkv_w_ref, sqkv_b_ref, so_w_ref, so_b_ref,
                    cq_w_ref, cq_b_ref, ckv_w_ref, ckv_b_ref, co_w_ref, co_b_ref,
                    fc_w_ref, fc_b_ref, pj_w_ref, pj_b_ref,
                    nw_ref, nb_ref,
                    o_ref, *, n_layer, n_head):
    T, C = x_ref.shape
    D = C // n_head
    scale = 1.0 / (D ** 0.5)

    x = x_ref[...].astype(jnp.float32)       # (T, C) — one batch element per grid step
    enc = enc_ref[...].astype(jnp.float32)   # (T, C)

    # Causal mask built once, reused across all layers / heads.
    row = jax.lax.broadcasted_iota(jnp.int32, (T, T), 0)
    col = jax.lax.broadcasted_iota(jnp.int32, (T, T), 1)
    causal_mask = col <= row

    def layernorm(h, w, b):
        mean = jnp.mean(h, axis=-1, keepdims=True)
        var = jnp.mean(jnp.square(h - mean), axis=-1, keepdims=True)
        return (h - mean) * jax.lax.rsqrt(var + 1e-5) * w + b

    def mha(q, k, v, causal):
        q = q * scale                        # fold 1/sqrt(D) into q once
        outs = []
        for h in range(n_head):
            sl = slice(h * D, (h + 1) * D)
            qh, kh, vh = q[:, sl], k[:, sl], v[:, sl]
            s = jnp.dot(qh, kh.T, preferred_element_type=jnp.float32)  # (T, T)
            if causal:
                s = jnp.where(causal_mask, s, -1e30)
            m = jnp.max(s, axis=-1, keepdims=True)
            p = jnp.exp(s - m)
            p = p * pl.reciprocal(jnp.sum(p, axis=-1, keepdims=True))
            outs.append(jnp.dot(p, vh, preferred_element_type=jnp.float32))
        return jnp.concatenate(outs, axis=-1)                          # (T, C)

    for l in range(n_layer):
        # --- causal self-attention block ---
        x = layernorm(x, ln_w_ref[l, 0], ln_b_ref[l, 0])
        qkv = jnp.dot(x, sqkv_w_ref[l], preferred_element_type=jnp.float32) + sqkv_b_ref[l]
        a = mha(qkv[:, :C], qkv[:, C:2 * C], qkv[:, 2 * C:], causal=True)
        x = x + jnp.dot(a, so_w_ref[l], preferred_element_type=jnp.float32) + so_b_ref[l]

        # --- cross-attention block (K/V from encoder output) ---
        x = layernorm(x, ln_w_ref[l, 1], ln_b_ref[l, 1])
        qc = jnp.dot(x, cq_w_ref[l], preferred_element_type=jnp.float32) + cq_b_ref[l]
        kv = jnp.dot(enc, ckv_w_ref[l], preferred_element_type=jnp.float32) + ckv_b_ref[l]
        a = mha(qc, kv[:, :C], kv[:, C:], causal=False)
        x = x + jnp.dot(a, co_w_ref[l], preferred_element_type=jnp.float32) + co_b_ref[l]

        # --- MLP block ---
        x = layernorm(x, ln_w_ref[l, 2], ln_b_ref[l, 2])
        h_fc = jnp.maximum(
            jnp.dot(x, fc_w_ref[l], preferred_element_type=jnp.float32) + fc_b_ref[l], 0.0)
        x = x + jnp.dot(h_fc, pj_w_ref[l], preferred_element_type=jnp.float32) + pj_b_ref[l]

    x = layernorm(x, nw_ref[...], nb_ref[...])
    o_ref[...] = x.astype(o_ref.dtype)


# ----------------------------- model wrapper -----------------------------

def _stack_layers(layers, fn):
    return jnp.stack([fn(lp) for lp in layers])


@functools.partial(jax.jit, static_argnames=("n_head",))
def decoder_forward(params, x, enc_out, n_head):
    # TODO(synk): dropout is a no-op (eval mode / dropout=0.0), so it is omitted.
    B, T, C = x.shape
    layers = params["layers"]
    L = len(layers)
    M = B * T

    # Stack per-layer weights; fuse QKV (self) and KV (cross) projections.
    ln_w = _stack_layers(layers, lambda lp: jnp.stack(
        [lp["ln1_w"], lp["ln2_w"], lp["ln3_w"]])[:, None, :])            # (L, 3, 1, C)
    ln_b = _stack_layers(layers, lambda lp: jnp.stack(
        [lp["ln1_b"], lp["ln2_b"], lp["ln3_b"]])[:, None, :])            # (L, 3, 1, C)
    sqkv_w = _stack_layers(layers, lambda lp: jnp.concatenate(
        [lp["self_q"]["w"], lp["self_k"]["w"], lp["self_v"]["w"]], axis=1))   # (L, C, 3C)
    sqkv_b = _stack_layers(layers, lambda lp: jnp.concatenate(
        [lp["self_q"]["b"], lp["self_k"]["b"], lp["self_v"]["b"]])[None, :])  # (L, 1, 3C)
    so_w = _stack_layers(layers, lambda lp: lp["self_o"]["w"])                # (L, C, C)
    so_b = _stack_layers(layers, lambda lp: lp["self_o"]["b"][None, :])       # (L, 1, C)
    cq_w = _stack_layers(layers, lambda lp: lp["cross_q"]["w"])               # (L, C, C)
    cq_b = _stack_layers(layers, lambda lp: lp["cross_q"]["b"][None, :])      # (L, 1, C)
    ckv_w = _stack_layers(layers, lambda lp: jnp.concatenate(
        [lp["cross_k"]["w"], lp["cross_v"]["w"]], axis=1))                    # (L, C, 2C)
    ckv_b = _stack_layers(layers, lambda lp: jnp.concatenate(
        [lp["cross_k"]["b"], lp["cross_v"]["b"]])[None, :])                   # (L, 1, 2C)
    co_w = _stack_layers(layers, lambda lp: lp["cross_o"]["w"])               # (L, C, C)
    co_b = _stack_layers(layers, lambda lp: lp["cross_o"]["b"][None, :])      # (L, 1, C)
    fc_w = _stack_layers(layers, lambda lp: lp["fc"]["w"])                    # (L, C, 4C)
    fc_b = _stack_layers(layers, lambda lp: lp["fc"]["b"][None, :])           # (L, 1, 4C)
    pj_w = _stack_layers(layers, lambda lp: lp["proj"]["w"])                  # (L, 4C, C)
    pj_b = _stack_layers(layers, lambda lp: lp["proj"]["b"][None, :])         # (L, 1, C)
    nw = params["norm_w"][None, :]                                            # (1, C)
    nb = params["norm_b"][None, :]                                            # (1, C)

    x2 = x.reshape(M, C)
    enc2 = enc_out.reshape(M, C)

    def full(shape):
        return pl.BlockSpec(shape, lambda b, _n=len(shape): (0,) * _n)

    row_spec = pl.BlockSpec((T, C), lambda b: (b, 0))

    out = pl.pallas_call(
        functools.partial(_decoder_kernel, n_layer=L, n_head=n_head),
        out_shape=jax.ShapeDtypeStruct((M, C), x.dtype),
        grid=(B,),
        in_specs=[
            row_spec, row_spec,
            full(ln_w.shape), full(ln_b.shape),
            full(sqkv_w.shape), full(sqkv_b.shape),
            full(so_w.shape), full(so_b.shape),
            full(cq_w.shape), full(cq_b.shape),
            full(ckv_w.shape), full(ckv_b.shape),
            full(co_w.shape), full(co_b.shape),
            full(fc_w.shape), full(fc_b.shape),
            full(pj_w.shape), full(pj_b.shape),
            full(nw.shape), full(nb.shape),
        ],
        out_specs=row_spec,
        compiler_params=pltpu.CompilerParams(
            dimension_semantics=("parallel",)),
    )(x2, enc2, ln_w, ln_b, sqkv_w, sqkv_b, so_w, so_b,
      cq_w, cq_b, ckv_w, ckv_b, co_w, co_b,
      fc_w, fc_b, pj_w, pj_b, nw, nb)

    return out.reshape(B, T, C)


# ----------------------------- pure-JAX reference -----------------------------

def ref_forward(params, x, enc_out, n_head):
    def ln(x, w, b):
        m = x.mean(-1, keepdims=True)
        v = ((x - m) ** 2).mean(-1, keepdims=True)
        return (x - m) / jnp.sqrt(v + 1e-5) * w + b

    def mha(xq, xkv, pq, pk, pv, po, causal):
        B, T, C = xq.shape
        D = C // n_head
        q = xq @ pq["w"] + pq["b"]
        k = xkv @ pk["w"] + pk["b"]
        v = xkv @ pv["w"] + pv["b"]
        heads = lambda t: t.reshape(B, T, n_head, D).transpose(0, 2, 1, 3)
        q, k, v = heads(q), heads(k), heads(v)
        s = (q @ k.transpose(0, 1, 3, 2)) / jnp.sqrt(D).astype(jnp.float32)
        if causal:
            mask = jnp.tril(jnp.ones((T, T), bool))
            s = jnp.where(mask, s, -1e30)
        p = jax.nn.softmax(s, axis=-1)
        y = (p @ v).transpose(0, 2, 1, 3).reshape(B, T, C)
        return y @ po["w"] + po["b"]

    for lp in params["layers"]:
        x = ln(x, lp["ln1_w"], lp["ln1_b"])
        x = x + mha(x, x, lp["self_q"], lp["self_k"], lp["self_v"], lp["self_o"], True)
        x = ln(x, lp["ln2_w"], lp["ln2_b"])
        x = x + mha(x, enc_out, lp["cross_q"], lp["cross_k"], lp["cross_v"], lp["cross_o"], False)
        x = ln(x, lp["ln3_w"], lp["ln3_b"])
        h = jnp.maximum(x @ lp["fc"]["w"] + lp["fc"]["b"], 0.0)
        x = x + (h @ lp["proj"]["w"] + lp["proj"]["b"])
    return ln(x, params["norm_w"], params["norm_b"])


# ----------------------------- parameter init -----------------------------

def init_params(key, n_layer, C):
    def linear_p(k, fan_in, fan_out):
        kw, kb = jax.random.split(k)
        return {"w": jax.random.normal(kw, (fan_in, fan_out), jnp.float32) * 0.02,
                "b": jax.random.normal(kb, (fan_out,), jnp.float32) * 0.02}

    params = {"layers": []}
    for _ in range(n_layer):
        keys = jax.random.split(key, 11)
        key = keys[0]
        layer = {
            "ln1_w": jnp.ones((C,), jnp.float32), "ln1_b": jnp.zeros((C,), jnp.float32),
            "ln2_w": jnp.ones((C,), jnp.float32), "ln2_b": jnp.zeros((C,), jnp.float32),
            "ln3_w": jnp.ones((C,), jnp.float32), "ln3_b": jnp.zeros((C,), jnp.float32),
            "self_q": linear_p(keys[1], C, C),
            "self_k": linear_p(keys[2], C, C),
            "self_v": linear_p(keys[3], C, C),
            "self_o": linear_p(keys[4], C, C),
            "cross_q": linear_p(keys[5], C, C),
            "cross_k": linear_p(keys[6], C, C),
            "cross_v": linear_p(keys[7], C, C),
            "cross_o": linear_p(keys[8], C, C),
            "fc": linear_p(keys[9], C, 4 * C),
            "proj": linear_p(keys[10], 4 * C, C),
        }
        params["layers"].append(layer)
    params["norm_w"] = jnp.ones((C,), jnp.float32)
    params["norm_b"] = jnp.zeros((C,), jnp.float32)
    return params


# ----------------------------- main -----------------------------

if __name__ == "__main__":
    B, T, C, H, n_layer = 2, 8, 32, 4, 2   # config: n_embd=32, n_head=4, dropout=0.0, bias=True

    key = jax.random.PRNGKey(0)
    kx, kenc, kparams = jax.random.split(key, 3)
    x = jax.random.normal(kx, (B, T, C), jnp.float32)
    enc_out = jax.random.normal(kenc, (B, T, C), jnp.float32)
    params = init_params(kparams, n_layer, C)

    out = decoder_forward(params, x, enc_out, n_head=H)
    out = jax.block_until_ready(out)

    ref = jax.block_until_ready(ref_forward(params, x, enc_out, H))
    assert out.shape == (B, T, C)
    assert jnp.allclose(out, ref, atol=1e-4, rtol=1e-4), float(jnp.max(jnp.abs(out - ref)))

    print("KERNEL_OK")
</pallas_src>

<mosaic_0001>
module attributes {stable_mosaic.version = 11 : i64} {
  func.func @_decoder_kernel(%arg0: i32, %arg1: memref<8x32xf32, #tpu.memory_space<vmem>>, %arg2: memref<8x32xf32, #tpu.memory_space<vmem>>, %arg3: memref<2x3x1x32xf32, #tpu.memory_space<vmem>>, %arg4: memref<2x3x1x32xf32, #tpu.memory_space<vmem>>, %arg5: memref<2x32x96xf32, #tpu.memory_space<vmem>>, %arg6: memref<2x1x96xf32, #tpu.memory_space<vmem>>, %arg7: memref<2x32x32xf32, #tpu.memory_space<vmem>>, %arg8: memref<2x1x32xf32, #tpu.memory_space<vmem>>, %arg9: memref<2x32x32xf32, #tpu.memory_space<vmem>>, %arg10: memref<2x1x32xf32, #tpu.memory_space<vmem>>, %arg11: memref<2x32x64xf32, #tpu.memory_space<vmem>>, %arg12: memref<2x1x64xf32, #tpu.memory_space<vmem>>, %arg13: memref<2x32x32xf32, #tpu.memory_space<vmem>>, %arg14: memref<2x1x32xf32, #tpu.memory_space<vmem>>, %arg15: memref<2x32x128xf32, #tpu.memory_space<vmem>>, %arg16: memref<2x1x128xf32, #tpu.memory_space<vmem>>, %arg17: memref<2x128x32xf32, #tpu.memory_space<vmem>>, %arg18: memref<2x1x32xf32, #tpu.memory_space<vmem>>, %arg19: memref<1x32xf32, #tpu.memory_space<vmem>>, %arg20: memref<1x32xf32, #tpu.memory_space<vmem>>, %arg21: memref<8x32xf32, #tpu.memory_space<vmem>>) attributes {dimension_semantics = [#tpu.dimension_semantics<parallel>], iteration_bounds = array<i64: 2>, scalar_prefetch = 0 : i64, scratch_operands = 0 : i64, tpu.core_type = #tpu.core_type<tc>, window_params = [{transform_indices = @transform_0, window_bounds = array<i64: 8, 32>}, {transform_indices = @transform_1, window_bounds = array<i64: 8, 32>}, {pipeline_mode = #tpu.pipeline_mode<synchronous>, transform_indices = @transform_2, window_bounds = array<i64: 2, 3, 1, 32>}, {pipeline_mode = #tpu.pipeline_mode<synchronous>, transform_indices = @transform_3, window_bounds = array<i64: 2, 3, 1, 32>}, {pipeline_mode = #tpu.pipeline_mode<synchronous>, transform_indices = @transform_4, window_bounds = array<i64: 2, 32, 96>}, {pipeline_mode = #tpu.pipeline_mode<synchronous>, transform_indices = @transform_5, window_bounds = array<i64: 2, 1, 96>}, {pipeline_mode = #tpu.pipeline_mode<synchronous>, transform_indices = @transform_6, window_bounds = array<i64: 2, 32, 32>}, {pipeline_mode = #tpu.pipeline_mode<synchronous>, transform_indices = @transform_7, window_bounds = array<i64: 2, 1, 32>}, {pipeline_mode = #tpu.pipeline_mode<synchronous>, transform_indices = @transform_8, window_bounds = array<i64: 2, 32, 32>}, {pipeline_mode = #tpu.pipeline_mode<synchronous>, transform_indices = @transform_9, window_bounds = array<i64: 2, 1, 32>}, {pipeline_mode = #tpu.pipeline_mode<synchronous>, transform_indices = @transform_10, window_bounds = array<i64: 2, 32, 64>}, {pipeline_mode = #tpu.pipeline_mode<synchronous>, transform_indices = @transform_11, window_bounds = array<i64: 2, 1, 64>}, {pipeline_mode = #tpu.pipeline_mode<synchronous>, transform_indices = @transform_12, window_bounds = array<i64: 2, 32, 32>}, {pipeline_mode = #tpu.pipeline_mode<synchronous>, transform_indices = @transform_13, window_bounds = array<i64: 2, 1, 32>}, {pipeline_mode = #tpu.pipeline_mode<synchronous>, transform_indices = @transform_14, window_bounds = array<i64: 2, 32, 128>}, {pipeline_mode = #tpu.pipeline_mode<synchronous>, transform_indices = @transform_15, window_bounds = array<i64: 2, 1, 128>}, {pipeline_mode = #tpu.pipeline_mode<synchronous>, transform_indices = @transform_16, window_bounds = array<i64: 2, 128, 32>}, {pipeline_mode = #tpu.pipeline_mode<synchronous>, transform_indices = @transform_17, window_bounds = array<i64: 2, 1, 32>}, {pipeline_mode = #tpu.pipeline_mode<synchronous>, transform_indices = @transform_18, window_bounds = array<i64: 1, 32>}, {pipeline_mode = #tpu.pipeline_mode<synchronous>, transform_indices = @transform_19, window_bounds = array<i64: 1, 32>}, {transform_indices = @transform_20, window_bounds = array<i64: 8, 32>}]} {
    %c0 = arith.constant 0 : index
    %c0_0 = arith.constant 0 : index
    %0 = vector.load %arg1[%c0, %c0_0] : memref<8x32xf32, #tpu.memory_space<vmem>>, vector<8x32xf32>
    %c0_1 = arith.constant 0 : index
    %c0_2 = arith.constant 0 : index
    %1 = vector.load %arg2[%c0_1, %c0_2] : memref<8x32xf32, #tpu.memory_space<vmem>>, vector<8x32xf32>
    %2 = tpu.iota {dimensions = array<i32: 0>} : vector<8x8xi32>
    %3 = tpu.iota {dimensions = array<i32: 1>} : vector<8x8xi32>
    %4 = arith.cmpi sle, %3, %2 : vector<8x8xi32>
    %c0_3 = arith.constant 0 : index
    %c0_4 = arith.constant 0 : index
    %c0_5 = arith.constant 0 : index
    %c0_6 = arith.constant 0 : index
    %5 = vector.load %arg3[%c0_3, %c0_4, %c0_5, %c0_6] : memref<2x3x1x32xf32, #tpu.memory_space<vmem>>, vector<1x1x1x32xf32>
    %6 = vector.shape_cast %5 : vector<1x1x1x32xf32> to vector<1x32xf32>
    %c0_7 = arith.constant 0 : index
    %c0_8 = arith.constant 0 : index
    %c0_9 = arith.constant 0 : index
    %c0_10 = arith.constant 0 : index
    %7 = vector.load %arg4[%c0_7, %c0_8, %c0_9, %c0_10] : memref<2x3x1x32xf32, #tpu.memory_space<vmem>>, vector<1x1x1x32xf32>
    %8 = vector.shape_cast %7 : vector<1x1x1x32xf32> to vector<1x32xf32>
    %cst = arith.constant dense<0.000000e+00> : vector<8xf32>
    %9 = vector.multi_reduction <add>, %0, %cst [1] : vector<8x32xf32> to vector<8xf32>
    %10 = vector.shape_cast %9 : vector<8xf32> to vector<8x1xf32>
    %cst_11 = arith.constant 3.200000e+01 : f32
    %11 = vector.broadcast %cst_11 : f32 to vector<8x1xf32>
    %12 = arith.divf %10, %11 : vector<8x1xf32>
    %13 = vector.broadcast %12 : vector<8x1xf32> to vector<8x32xf32>
    %14 = arith.subf %0, %13 : vector<8x32xf32>
    %15 = arith.mulf %14, %14 : vector<8x32xf32>
    %cst_12 = arith.constant dense<0.000000e+00> : vector<8xf32>
    %16 = vector.multi_reduction <add>, %15, %cst_12 [1] : vector<8x32xf32> to vector<8xf32>
    %17 = vector.shape_cast %16 : vector<8xf32> to vector<8x1xf32>
    %cst_13 = arith.constant 3.200000e+01 : f32
    %18 = vector.broadcast %cst_13 : f32 to vector<8x1xf32>
    %19 = arith.divf %17, %18 : vector<8x1xf32>
    %20 = vector.broadcast %12 : vector<8x1xf32> to vector<8x32xf32>
    %21 = arith.subf %0, %20 : vector<8x32xf32>
    %cst_14 = arith.constant 9.99999974E-6 : f32
    %22 = vector.broadcast %cst_14 : f32 to vector<8x1xf32>
    %23 = arith.addf %19, %22 : vector<8x1xf32>
    %24 = math.rsqrt %23 : vector<8x1xf32>
    %25 = vector.broadcast %24 : vector<8x1xf32> to vector<8x32xf32>
    %26 = arith.mulf %21, %25 : vector<8x32xf32>
    %27 = vector.broadcast %6 : vector<1x32xf32> to vector<8x32xf32>
    %28 = arith.mulf %26, %27 : vector<8x32xf32>
    %29 = vector.broadcast %8 : vector<1x32xf32> to vector<8x32xf32>
    %30 = arith.addf %28, %29 : vector<8x32xf32>
    %c0_15 = arith.constant 0 : index
    %c0_16 = arith.constant 0 : index
    %c0_17 = arith.constant 0 : index
    %31 = vector.load %arg5[%c0_15, %c0_16, %c0_17] : memref<2x32x96xf32, #tpu.memory_space<vmem>>, vector<1x32x96xf32>
    %32 = vector.shape_cast %31 : vector<1x32x96xf32> to vector<32x96xf32>
    %cst_18 = arith.constant dense<0.000000e+00> : vector<8x96xf32>
    %33 = tpu.matmul %30, %32, %cst_18 {dimension_numbers = #tpu.dot_dimension_numbers<[1], [0], [0], [1], [0, 0, 1, 1], [], []>} : vector<8x32xf32>, vector<32x96xf32>, vector<8x96xf32> -> vector<8x96xf32>
    %c0_19 = arith.constant 0 : index
    %c0_20 = arith.constant 0 : index
    %c0_21 = arith.constant 0 : index
    %34 = vector.load %arg6[%c0_19, %c0_20, %c0_21] : memref<2x1x96xf32, #tpu.memory_space<vmem>>, vector<1x1x96xf32>
    %35 = vector.shape_cast %34 : vector<1x1x96xf32> to vector<1x96xf32>
    %36 = vector.broadcast %35 : vector<1x96xf32> to vector<8x96xf32>
    %37 = arith.addf %33, %36 : vector<8x96xf32>
    %38 = vector.extract_strided_slice %37 {offsets = [0, 0], sizes = [8, 32], strides = [1, 1]} : vector<8x96xf32> to vector<8x32xf32>
    %39 = vector.extract_strided_slice %37 {offsets = [0, 32], sizes = [8, 32], strides = [1, 1]} : vector<8x96xf32> to vector<8x32xf32>
    %40 = vector.extract_strided_slice %37 {offsets = [0, 64], sizes = [8, 32], strides = [1, 1]} : vector<8x96xf32> to vector<8x32xf32>
    %cst_22 = arith.constant 0.353553385 : f32
    %41 = vector.broadcast %cst_22 : f32 to vector<8x32xf32>
    %42 = arith.mulf %38, %41 : vector<8x32xf32>
    %43 = vector.extract_strided_slice %42 {offsets = [0, 0], sizes = [8, 8], strides = [1, 1]} : vector<8x32xf32> to vector<8x8xf32>
    %44 = vector.extract_strided_slice %39 {offsets = [0, 0], sizes = [8, 8], strides = [1, 1]} : vector<8x32xf32> to vector<8x8xf32>
    %45 = vector.extract_strided_slice %40 {offsets = [0, 0], sizes = [8, 8], strides = [1, 1]} : vector<8x32xf32> to vector<8x8xf32>
    %46 = tpu.transpose %44, [1, 0] : vector<8x8xf32> -> vector<8x8xf32>
    %cst_23 = arith.constant dense<0.000000e+00> : vector<8x8xf32>
    %47 = tpu.matmul %43, %46, %cst_23 {dimension_numbers = #tpu.dot_dimension_numbers<[1], [0], [0], [1], [0, 0, 1, 1], [], []>} : vector<8x8xf32>, vector<8x8xf32>, vector<8x8xf32> -> vector<8x8xf32>
    %cst_24 = arith.constant -1.000000e+30 : f32
    %48 = vector.broadcast %cst_24 : f32 to vector<8x8xf32>
    %49 = arith.select %4, %47, %48 : vector<8x8xi1>, vector<8x8xf32>
    %cst_25 = arith.constant dense<0xFF800000> : vector<8xf32>
    %50 = vector.multi_reduction <maximumf>, %49, %cst_25 [1] : vector<8x8xf32> to vector<8xf32>
    %51 = vector.shape_cast %50 : vector<8xf32> to vector<8x1xf32>
    %52 = vector.broadcast %51 : vector<8x1xf32> to vector<8x8xf32>
    %53 = arith.subf %49, %52 : vector<8x8xf32>
    %54 = math.exp %53 : vector<8x8xf32>
    %cst_26 = arith.constant dense<0.000000e+00> : vector<8xf32>
    %55 = vector.multi_reduction <add>, %54, %cst_26 [1] : vector<8x8xf32> to vector<8xf32>
    %56 = vector.shape_cast %55 : vector<8xf32> to vector<8x1xf32>
    %57 = tpu.reciprocal %56 : vector<8x1xf32> -> vector<8x1xf32>
    %58 = vector.broadcast %57 : vector<8x1xf32> to vector<8x8xf32>
    %59 = arith.mulf %54, %58 : vector<8x8xf32>
    %cst_27 = arith.constant dense<0.000000e+00> : vector<8x8xf32>
    %60 = tpu.matmul %59, %45, %cst_27 {dimension_numbers = #tpu.dot_dimension_numbers<[1], [0], [0], [1], [0, 0, 1, 1], [], []>} : vector<8x8xf32>, vector<8x8xf32>, vector<8x8xf32> -> vector<8x8xf32>
    %61 = vector.extract_strided_slice %42 {offsets = [0, 8], sizes = [8, 8], strides = [1, 1]} : vector<8x32xf32> to vector<8x8xf32>
    %62 = vector.extract_strided_slice %39 {offsets = [0, 8], sizes = [8, 8], strides = [1, 1]} : vector<8x32xf32> to vector<8x8xf32>
    %63 = vector.extract_strided_slice %40 {offsets = [0, 8], sizes = [8, 8], strides = [1, 1]} : vector<8x32xf32> to vector<8x8xf32>
    %64 = tpu.transpose %62, [1, 0] : vector<8x8xf32> -> vector<8x8xf32>
    %cst_28 = arith.constant dense<0.000000e+00> : vector<8x8xf32>
    %65 = tpu.matmul %61, %64, %cst_28 {dimension_numbers = #tpu.dot_dimension_numbers<[1], [0], [0], [1], [0, 0, 1, 1], [], []>} : vector<8x8xf32>, vector<8x8xf32>, vector<8x8xf32> -> vector<8x8xf32>
    %cst_29 = arith.constant -1.000000e+30 : f32
    %66 = vector.broadcast %cst_29 : f32 to vector<8x8xf32>
    %67 = arith.select %4, %65, %66 : vector<8x8xi1>, vector<8x8xf32>
    %cst_30 = arith.constant dense<0xFF800000> : vector<8xf32>
    %68 = vector.multi_reduction <maximumf>, %67, %cst_30 [1] : vector<8x8xf32> to vector<8xf32>
    %69 = vector.shape_cast %68 : vector<8xf32> to vector<8x1xf32>
    %70 = vector.broadcast %69 : vector<8x1xf32> to vector<8x8xf32>
    %71 = arith.subf %67, %70 : vector<8x8xf32>
    %72 = math.exp %71 : vector<8x8xf32>
    %cst_31 = arith.constant dense<0.000000e+00> : vector<8xf32>
    %73 = vector.multi_reduction <add>, %72, %cst_31 [1] : vector<8x8xf32> to vector<8xf32>
    %74 = vector.shape_cast %73 : vector<8xf32> to vector<8x1xf32>
    %75 = tpu.reciprocal %74 : vector<8x1xf32> -> vector<8x1xf32>
    %76 = vector.broadcast %75 : vector<8x1xf32> to vector<8x8xf32>
    %77 = arith.mulf %72, %76 : vector<8x8xf32>
    %cst_32 = arith.constant dense<0.000000e+00> : vector<8x8xf32>
    %78 = tpu.matmul %77, %63, %cst_32 {dimension_numbers = #tpu.dot_dimension_numbers<[1], [0], [0], [1], [0, 0, 1, 1], [], []>} : vector<8x8xf32>, vector<8x8xf32>, vector<8x8xf32> -> vector<8x8xf32>
    %79 = vector.extract_strided_slice %42 {offsets = [0, 16], sizes = [8, 8], strides = [1, 1]} : vector<8x32xf32> to vector<8x8xf32>
    %80 = vector.extract_strided_slice %39 {offsets = [0, 16], sizes = [8, 8], strides = [1, 1]} : vector<8x32xf32> to vector<8x8xf32>
    %81 = vector.extract_strided_slice %40 {offsets = [0, 16], sizes = [8, 8], strides = [1, 1]} : vector<8x32xf32> to vector<8x8xf32>
    %82 = tpu.transpose %80, [1, 0] : vector<8x8xf32> -> vector<8x8xf32>
    %cst_33 = arith.constant dense<0.000000e+00> : vector<8x8xf32>
    %83 = tpu.matmul %79, %82, %cst_33 {dimension_numbers = #tpu.dot_dimension_numbers<[1], [0], [0], [1], [0, 0, 1, 1], [], []>} : vector<8x8xf32>, vector<8x8xf32>, vector<8x8xf32> -> vector<8x8xf32>
    %cst_34 = arith.constant -1.000000e+30 : f32
    %84 = vector.broadcast %cst_34 : f32 to vector<8x8xf32>
    %85 = arith.select %4, %83, %84 : vector<8x8xi1>, vector<8x8xf32>
    %cst_35 = arith.constant dense<0xFF800000> : vector<8xf32>
    %86 = vector.multi_reduction <maximumf>, %85, %cst_35 [1] : vector<8x8xf32> to vector<8xf32>
    %87 = vector.shape_cast %86 : vector<8xf32> to vector<8x1xf32>
    %88 = vector.broadcast %87 : vector<8x1xf32> to vector<8x8xf32>
    %89 = arith.subf %85, %88 : vector<8x8xf32>
    %90 = math.exp %89 : vector<8x8xf32>
    %cst_36 = arith.constant dense<0.000000e+00> : vector<8xf32>
    %91 = vector.multi_reduction <add>, %90, %cst_36 [1] : vector<8x8xf32> to vector<8xf32>
    %92 = vector.shape_cast %91 : vector<8xf32> to vector<8x1xf32>
    %93 = tpu.reciprocal %92 : vector<8x1xf32> -> vector<8x1xf32>
    %94 = vector.broadcast %93 : vector<8x1xf32> to vector<8x8xf32>
    %95 = arith.mulf %90, %94 : vector<8x8xf32>
    %cst_37 = arith.constant dense<0.000000e+00> : vector<8x8xf32>
    %96 = tpu.matmul %95, %81, %cst_37 {dimension_numbers = #tpu.dot_dimension_numbers<[1], [0], [0], [1], [0, 0, 1, 1], [], []>} : vector<8x8xf32>, vector<8x8xf32>, vector<8x8xf32> -> vector<8x8xf32>
    %97 = vector.extract_strided_slice %42 {offsets = [0, 24], sizes = [8, 8], strides = [1, 1]} : vector<8x32xf32> to vector<8x8xf32>
    %98 = vector.extract_strided_slice %39 {offsets = [0, 24], sizes = [8, 8], strides = [1, 1]} : vector<8x32xf32> to vector<8x8xf32>
    %99 = vector.extract_strided_slice %40 {offsets = [0, 24], sizes = [8, 8], strides = [1, 1]} : vector<8x32xf32> to vector<8x8xf32>
    %100 = tpu.transpose %98, [1, 0] : vector<8x8xf32> -> vector<8x8xf32>
    %cst_38 = arith.constant dense<0.000000e+00> : vector<8x8xf32>
    %101 = tpu.matmul %97, %100, %cst_38 {dimension_numbers = #tpu.dot_dimension_numbers<[1], [0], [0], [1], [0, 0, 1, 1], [], []>} : vector<8x8xf32>, vector<8x8xf32>, vector<8x8xf32> -> vector<8x8xf32>
    %cst_39 = arith.constant -1.000000e+30 : f32
    %102 = vector.broadcast %cst_39 : f32 to vector<8x8xf32>
    %103 = arith.select %4, %101, %102 : vector<8x8xi1>, vector<8x8xf32>
    %cst_40 = arith.constant dense<0xFF800000> : vector<8xf32>
    %104 = vector.multi_reduction <maximumf>, %103, %cst_40 [1] : vector<8x8xf32> to vector<8xf32>
    %105 = vector.shape_cast %104 : vector<8xf32> to vector<8x1xf32>
    %106 = vector.broadcast %105 : vector<8x1xf32> to vector<8x8xf32>
    %107 = arith.subf %103, %106 : vector<8x8xf32>
    %108 = math.exp %107 : vector<8x8xf32>
    %cst_41 = arith.constant dense<0.000000e+00> : vector<8xf32>
    %109 = vector.multi_reduction <add>, %108, %cst_41 [1] : vector<8x8xf32> to vector<8xf32>
    %110 = vector.shape_cast %109 : vector<8xf32> to vector<8x1xf32>
    %111 = tpu.reciprocal %110 : vector<8x1xf32> -> vector<8x1xf32>
    %112 = vector.broadcast %111 : vector<8x1xf32> to vector<8x8xf32>
    %113 = arith.mulf %108, %112 : vector<8x8xf32>
    %cst_42 = arith.constant dense<0.000000e+00> : vector<8x8xf32>
    %114 = tpu.matmul %113, %99, %cst_42 {dimension_numbers = #tpu.dot_dimension_numbers<[1], [0], [0], [1], [0, 0, 1, 1], [], []>} : vector<8x8xf32>, vector<8x8xf32>, vector<8x8xf32> -> vector<8x8xf32>
    %115 = tpu.concatenate %60, %78, %96, %114 in 1 : vector<8x8xf32>, vector<8x8xf32>, vector<8x8xf32>, vector<8x8xf32> -> vector<8x32xf32>
    %c0_43 = arith.constant 0 : index
    %c0_44 = arith.constant 0 : index
    %c0_45 = arith.constant 0 : index
    %116 = vector.load %arg7[%c0_43, %c0_44, %c0_45] : memref<2x32x32xf32, #tpu.memory_space<vmem>>, vector<1x32x32xf32>
    %117 = vector.shape_cast %116 : vector<1x32x32xf32> to vector<32x32xf32>
    %cst_46 = arith.constant dense<0.000000e+00> : vector<8x32xf32>
    %118 = tpu.matmul %115, %117, %cst_46 {dimension_numbers = #tpu.dot_dimension_numbers<[1], [0], [0], [1], [0, 0, 1, 1], [], []>} : vector<8x32xf32>, vector<32x32xf32>, vector<8x32xf32> -> vector<8x32xf32>
    %119 = arith.addf %30, %118 : vector<8x32xf32>
    %c0_47 = arith.constant 0 : index
    %c0_48 = arith.constant 0 : index
    %c0_49 = arith.constant 0 : index
    %120 = vector.load %arg8[%c0_47, %c0_48, %c0_49] : memref<2x1x32xf32, #tpu.memory_space<vmem>>, vector<1x1x32xf32>
    %121 = vector.shape_cast %120 : vector<1x1x32xf32> to vector<1x32xf32>
    %122 = vector.broadcast %121 : vector<1x32xf32> to vector<8x32xf32>
    %123 = arith.addf %119, %122 : vector<8x32xf32>
    %c0_50 = arith.constant 0 : index
    %c1 = arith.constant 1 : index
    %c0_51 = arith.constant 0 : index
    %c0_52 = arith.constant 0 : index
    %124 = vector.load %arg3[%c0_50, %c1, %c0_51, %c0_52] : memref<2x3x1x32xf32, #tpu.memory_space<vmem>>, vector<1x1x1x32xf32>
    %125 = vector.shape_cast %124 : vector<1x1x1x32xf32> to vector<1x32xf32>
    %c0_53 = arith.constant 0 : index
    %c1_54 = arith.constant 1 : index
    %c0_55 = arith.constant 0 : index
    %c0_56 = arith.constant 0 : index
    %126 = vector.load %arg4[%c0_53, %c1_54, %c0_55, %c0_56] : memref<2x3x1x32xf32, #tpu.memory_space<vmem>>, vector<1x1x1x32xf32>
    %127 = vector.shape_cast %126 : vector<1x1x1x32xf32> to vector<1x32xf32>
    %cst_57 = arith.constant dense<0.000000e+00> : vector<8xf32>
    %128 = vector.multi_reduction <add>, %123, %cst_57 [1] : vector<8x32xf32> to vector<8xf32>
    %129 = vector.shape_cast %128 : vector<8xf32> to vector<8x1xf32>
    %cst_58 = arith.constant 3.200000e+01 : f32
    %130 = vector.broadcast %cst_58 : f32 to vector<8x1xf32>
    %131 = arith.divf %129, %130 : vector<8x1xf32>
    %132 = vector.broadcast %131 : vector<8x1xf32> to vector<8x32xf32>
    %133 = arith.subf %123, %132 : vector<8x32xf32>
    %134 = arith.mulf %133, %133 : vector<8x32xf32>
    %cst_59 = arith.constant dense<0.000000e+00> : vector<8xf32>
    %135 = vector.multi_reduction <add>, %134, %cst_59 [1] : vector<8x32xf32> to vector<8xf32>
    %136 = vector.shape_cast %135 : vector<8xf32> to vector<8x1xf32>
    %cst_60 = arith.constant 3.200000e+01 : f32
    %137 = vector.broadcast %cst_60 : f32 to vector<8x1xf32>
    %138 = arith.divf %136, %137 : vector<8x1xf32>
    %139 = vector.broadcast %131 : vector<8x1xf32> to vector<8x32xf32>
    %140 = arith.subf %123, %139 : vector<8x32xf32>
    %cst_61 = arith.constant 9.99999974E-6 : f32
    %141 = vector.broadcast %cst_61 : f32 to vector<8x1xf32>
    %142 = arith.addf %138, %141 : vector<8x1xf32>
    %143 = math.rsqrt %142 : vector<8x1xf32>
    %144 = vector.broadcast %143 : vector<8x1xf32> to vector<8x32xf32>
    %145 = arith.mulf %140, %144 : vector<8x32xf32>
    %146 = vector.broadcast %125 : vector<1x32xf32> to vector<8x32xf32>
    %147 = arith.mulf %145, %146 : vector<8x32xf32>
    %148 = vector.broadcast %127 : vector<1x32xf32> to vector<8x32xf32>
    %149 = arith.addf %147, %148 : vector<8x32xf32>
    %c0_62 = arith.constant 0 : index
    %c0_63 = arith.constant 0 : index
    %c0_64 = arith.constant 0 : index
    %150 = vector.load %arg9[%c0_62, %c0_63, %c0_64] : memref<2x32x32xf32, #tpu.memory_space<vmem>>, vector<1x32x32xf32>
    %151 = vector.shape_cast %150 : vector<1x32x32xf32> to vector<32x32xf32>
    %cst_65 = arith.constant dense<0.000000e+00> : vector<8x32xf32>
    %152 = tpu.matmul %149, %151, %cst_65 {dimension_numbers = #tpu.dot_dimension_numbers<[1], [0], [0], [1], [0, 0, 1, 1], [], []>} : vector<8x32xf32>, vector<32x32xf32>, vector<8x32xf32> -> vector<8x32xf32>
    %c0_66 = arith.constant 0 : index
    %c0_67 = arith.constant 0 : index
    %c0_68 = arith.constant 0 : index
    %153 = vector.load %arg10[%c0_66, %c0_67, %c0_68] : memref<2x1x32xf32, #tpu.memory_space<vmem>>, vector<1x1x32xf32>
    %154 = vector.shape_cast %153 : vector<1x1x32xf32> to vector<1x32xf32>
    %155 = vector.broadcast %154 : vector<1x32xf32> to vector<8x32xf32>
    %156 = arith.addf %152, %155 : vector<8x32xf32>
    %c0_69 = arith.constant 0 : index
    %c0_70 = arith.constant 0 : index
    %c0_71 = arith.constant 0 : index
    %157 = vector.load %arg11[%c0_69, %c0_70, %c0_71] : memref<2x32x64xf32, #tpu.memory_space<vmem>>, vector<1x32x64xf32>
    %158 = vector.shape_cast %157 : vector<1x32x64xf32> to vector<32x64xf32>
    %cst_72 = arith.constant dense<0.000000e+00> : vector<8x64xf32>
    %159 = tpu.matmul %1, %158, %cst_72 {dimension_numbers = #tpu.dot_dimension_numbers<[1], [0], [0], [1], [0, 0, 1, 1], [], []>} : vector<8x32xf32>, vector<32x64xf32>, vector<8x64xf32> -> vector<8x64xf32>
    %c0_73 = arith.constant 0 : index
    %c0_74 = arith.constant 0 : index
    %c0_75 = arith.constant 0 : index
    %160 = vector.load %arg12[%c0_73, %c0_74, %c0_75] : memref<2x1x64xf32, #tpu.memory_space<vmem>>, vector<1x1x64xf32>
    %161 = vector.shape_cast %160 : vector<1x1x64xf32> to vector<1x64xf32>
    %162 = vector.broadcast %161 : vector<1x64xf32> to vector<8x64xf32>
    %163 = arith.addf %159, %162 : vector<8x64xf32>
    %164 = vector.extract_strided_slice %163 {offsets = [0, 0], sizes = [8, 32], strides = [1, 1]} : vector<8x64xf32> to vector<8x32xf32>
    %165 = vector.extract_strided_slice %163 {offsets = [0, 32], sizes = [8, 32], strides = [1, 1]} : vector<8x64xf32> to vector<8x32xf32>
    %cst_76 = arith.constant 0.353553385 : f32
    %166 = vector.broadcast %cst_76 : f32 to vector<8x32xf32>
    %167 = arith.mulf %156, %166 : vector<8x32xf32>
    %168 = vector.extract_strided_slice %167 {offsets = [0, 0], sizes = [8, 8], strides = [1, 1]} : vector<8x32xf32> to vector<8x8xf32>
    %169 = vector.extract_strided_slice %164 {offsets = [0, 0], sizes = [8, 8], strides = [1, 1]} : vector<8x32xf32> to vector<8x8xf32>
    %170 = vector.extract_strided_slice %165 {offsets = [0, 0], sizes = [8, 8], strides = [1, 1]} : vector<8x32xf32> to vector<8x8xf32>
    %171 = tpu.transpose %169, [1, 0] : vector<8x8xf32> -> vector<8x8xf32>
    %cst_77 = arith.constant dense<0.000000e+00> : vector<8x8xf32>
    %172 = tpu.matmul %168, %171, %cst_77 {dimension_numbers = #tpu.dot_dimension_numbers<[1], [0], [0], [1], [0, 0, 1, 1], [], []>} : vector<8x8xf32>, vector<8x8xf32>, vector<8x8xf32> -> vector<8x8xf32>
    %cst_78 = arith.constant dense<0xFF800000> : vector<8xf32>
    %173 = vector.multi_reduction <maximumf>, %172, %cst_78 [1] : vector<8x8xf32> to vector<8xf32>
    %174 = vector.shape_cast %173 : vector<8xf32> to vector<8x1xf32>
    %175 = vector.broadcast %174 : vector<8x1xf32> to vector<8x8xf32>
    %176 = arith.subf %172, %175 : vector<8x8xf32>
    %177 = math.exp %176 : vector<8x8xf32>
    %cst_79 = arith.constant dense<0.000000e+00> : vector<8xf32>
    %178 = vector.multi_reduction <add>, %177, %cst_79 [1] : vector<8x8xf32> to vector<8xf32>
    %179 = vector.shape_cast %178 : vector<8xf32> to vector<8x1xf32>
    %180 = tpu.reciprocal %179 : vector<8x1xf32> -> vector<8x1xf32>
    %181 = vector.broadcast %180 : vector<8x1xf32> to vector<8x8xf32>
    %182 = arith.mulf %177, %181 : vector<8x8xf32>
    %cst_80 = arith.constant dense<0.000000e+00> : vector<8x8xf32>
    %183 = tpu.matmul %182, %170, %cst_80 {dimension_numbers = #tpu.dot_dimension_numbers<[1], [0], [0], [1], [0, 0, 1, 1], [], []>} : vector<8x8xf32>, vector<8x8xf32>, vector<8x8xf32> -> vector<8x8xf32>
    %184 = vector.extract_strided_slice %167 {offsets = [0, 8], sizes = [8, 8], strides = [1, 1]} : vector<8x32xf32> to vector<8x8xf32>
    %185 = vector.extract_strided_slice %164 {offsets = [0, 8], sizes = [8, 8], strides = [1, 1]} : vector<8x32xf32> to vector<8x8xf32>
    %186 = vector.extract_strided_slice %165 {offsets = [0, 8], sizes = [8, 8], strides = [1, 1]} : vector<8x32xf32> to vector<8x8xf32>
    %187 = tpu.transpose %185, [1, 0] : vector<8x8xf32> -> vector<8x8xf32>
    %cst_81 = arith.constant dense<0.000000e+00> : vector<8x8xf32>
    %188 = tpu.matmul %184, %187, %cst_81 {dimension_numbers = #tpu.dot_dimension_numbers<[1], [0], [0], [1], [0, 0, 1, 1], [], []>} : vector<8x8xf32>, vector<8x8xf32>, vector<8x8xf32> -> vector<8x8xf32>
    %cst_82 = arith.constant dense<0xFF800000> : vector<8xf32>
    %189 = vector.multi_reduction <maximumf>, %188, %cst_82 [1] : vector<8x8xf32> to vector<8xf32>
    %190 = vector.shape_cast %189 : vector<8xf32> to vector<8x1xf32>
    %191 = vector.broadcast %190 : vector<8x1xf32> to vector<8x8xf32>
    %192 = arith.subf %188, %191 : vector<8x8xf32>
    %193 = math.exp %192 : vector<8x8xf32>
    %cst_83 = arith.constant dense<0.000000e+00> : vector<8xf32>
    %194 = vector.multi_reduction <add>, %193, %cst_83 [1] : vector<8x8xf32> to vector<8xf32>
    %195 = vector.shape_cast %194 : vector<8xf32> to vector<8x1xf32>
    %196 = tpu.reciprocal %195 : vector<8x1xf32> -> vector<8x1xf32>
    %197 = vector.broadcast %196 : vector<8x1xf32> to vector<8x8xf32>
    %198 = arith.mulf %193, %197 : vector<8x8xf32>
    %cst_84 = arith.constant dense<0.000000e+00> : vector<8x8xf32>
    %199 = tpu.matmul %198, %186, %cst_84 {dimension_numbers = #tpu.dot_dimension_numbers<[1], [0], [0], [1], [0, 0, 1, 1], [], []>} : vector<8x8xf32>, vector<8x8xf32>, vector<8x8xf32> -> vector<8x8xf32>
    %200 = vector.extract_strided_slice %167 {offsets = [0, 16], sizes = [8, 8], strides = [1, 1]} : vector<8x32xf32> to vector<8x8xf32>
    %201 = vector.extract_strided_slice %164 {offsets = [0, 16], sizes = [8, 8], strides = [1, 1]} : vector<8x32xf32> to vector<8x8xf32>
    %202 = vector.extract_strided_slice %165 {offsets = [0, 16], sizes = [8, 8], strides = [1, 1]} : vector<8x32xf32> to vector<8x8xf32>
    %203 = tpu.transpose %201, [1, 0] : vector<8x8xf32> -> vector<8x8xf32>
    %cst_85 = arith.constant dense<0.000000e+00> : vector<8x8xf32>
    %204 = tpu.matmul %200, %203, %cst_85 {dimension_numbers = #tpu.dot_dimension_numbers<[1], [0], [0], [1], [0, 0, 1, 1], [], []>} : vector<8x8xf32>, vector<8x8xf32>, vector<8x8xf32> -> vector<8x8xf32>
    %cst_86 = arith.constant dense<0xFF800000> : vector<8xf32>
    %205 = vector.multi_reduction <maximumf>, %204, %cst_86 [1] : vector<8x8xf32> to vector<8xf32>
    %206 = vector.shape_cast %205 : vector<8xf32> to vector<8x1xf32>
    %207 = vector.broadcast %206 : vector<8x1xf32> to vector<8x8xf32>
    %208 = arith.subf %204, %207 : vector<8x8xf32>
    %209 = math.exp %208 : vector<8x8xf32>
    %cst_87 = arith.constant dense<0.000000e+00> : vector<8xf32>
    %210 = vector.multi_reduction <add>, %209, %cst_87 [1] : vector<8x8xf32> to vector<8xf32>
    %211 = vector.shape_cast %210 : vector<8xf32> to vector<8x1xf32>
    %212 = tpu.reciprocal %211 : vector<8x1xf32> -> vector<8x1xf32>
    %213 = vector.broadcast %212 : vector<8x1xf32> to vector<8x8xf32>
    %214 = arith.mulf %209, %213 : vector<8x8xf32>
    %cst_88 = arith.constant dense<0.000000e+00> : vector<8x8xf32>
    %215 = tpu.matmul %214, %202, %cst_88 {dimension_numbers = #tpu.dot_dimension_numbers<[1], [0], [0], [1], [0, 0, 1, 1], [], []>} : vector<8x8xf32>, vector<8x8xf32>, vector<8x8xf32> -> vector<8x8xf32>
    %216 = vector.extract_strided_slice %167 {offsets = [0, 24], sizes = [8, 8], strides = [1, 1]} : vector<8x32xf32> to vector<8x8xf32>
    %217 = vector.extract_strided_slice %164 {offsets = [0, 24], sizes = [8, 8], strides = [1, 1]} : vector<8x32xf32> to vector<8x8xf32>
    %218 = vector.extract_strided_slice %165 {offsets = [0, 24], sizes = [8, 8], strides = [1, 1]} : vector<8x32xf32> to vector<8x8xf32>
    %219 = tpu.transpose %217, [1, 0] : vector<8x8xf32> -> vector<8x8xf32>
    %cst_89 = arith.constant dense<0.000000e+00> : vector<8x8xf32>
    %220 = tpu.matmul %216, %219, %cst_89 {dimension_numbers = #tpu.dot_dimension_numbers<[1], [0], [0], [1], [0, 0, 1, 1], [], []>} : vector<8x8xf32>, vector<8x8xf32>, vector<8x8xf32> -> vector<8x8xf32>
    %cst_90 = arith.constant dense<0xFF800000> : vector<8xf32>
    %221 = vector.multi_reduction <maximumf>, %220, %cst_90 [1] : vector<8x8xf32> to vector<8xf32>
    %222 = vector.shape_cast %221 : vector<8xf32> to vector<8x1xf32>
    %223 = vector.broadcast %222 : vector<8x1xf32> to vector<8x8xf32>
    %224 = arith.subf %220, %223 : vector<8x8xf32>
    %225 = math.exp %224 : vector<8x8xf32>
    %cst_91 = arith.constant dense<0.000000e+00> : vector<8xf32>
    %226 = vector.multi_reduction <add>, %225, %cst_91 [1] : vector<8x8xf32> to vector<8xf32>
    %227 = vector.shape_cast %226 : vector<8xf32> to vector<8x1xf32>
    %228 = tpu.reciprocal %227 : vector<8x1xf32> -> vector<8x1xf32>
    %229 = vector.broadcast %228 : vector<8x1xf32> to vector<8x8xf32>
    %230 = arith.mulf %225, %229 : vector<8x8xf32>
    %cst_92 = arith.constant dense<0.000000e+00> : vector<8x8xf32>
    %231 = tpu.matmul %230, %218, %cst_92 {dimension_numbers = #tpu.dot_dimension_numbers<[1], [0], [0], [1], [0, 0, 1, 1], [], []>} : vector<8x8xf32>, vector<8x8xf32>, vector<8x8xf32> -> vector<8x8xf32>
    %232 = tpu.concatenate %183, %199, %215, %231 in 1 : vector<8x8xf32>, vector<8x8xf32>, vector<8x8xf32>, vector<8x8xf32> -> vector<8x32xf32>
    %c0_93 = arith.constant 0 : index
    %c0_94 = arith.constant 0 : index
    %c0_95 = arith.constant 0 : index
    %233 = vector.load %arg13[%c0_93, %c0_94, %c0_95] : memref<2x32x32xf32, #tpu.memory_space<vmem>>, vector<1x32x32xf32>
    %234 = vector.shape_cast %233 : vector<1x32x32xf32> to vector<32x32xf32>
    %cst_96 = arith.constant dense<0.000000e+00> : vector<8x32xf32>
    %235 = tpu.matmul %232, %234, %cst_96 {dimension_numbers = #tpu.dot_dimension_numbers<[1], [0], [0], [1], [0, 0, 1, 1], [], []>} : vector<8x32xf32>, vector<32x32xf32>, vector<8x32xf32> -> vector<8x32xf32>
    %236 = arith.addf %149, %235 : vector<8x32xf32>
    %c0_97 = arith.constant 0 : index
    %c0_98 = arith.constant 0 : index
    %c0_99 = arith.constant 0 : index
    %237 = vector.load %arg14[%c0_97, %c0_98, %c0_99] : memref<2x1x32xf32, #tpu.memory_space<vmem>>, vector<1x1x32xf32>
    %238 = vector.shape_cast %237 : vector<1x1x32xf32> to vector<1x32xf32>
    %239 = vector.broadcast %238 : vector<1x32xf32> to vector<8x32xf32>
    %240 = arith.addf %236, %239 : vector<8x32xf32>
    %c0_100 = arith.constant 0 : index
    %c2 = arith.constant 2 : index
    %c0_101 = arith.constant 0 : index
    %c0_102 = arith.constant 0 : index
    %241 = vector.load %arg3[%c0_100, %c2, %c0_101, %c0_102] : memref<2x3x1x32xf32, #tpu.memory_space<vmem>>, vector<1x1x1x32xf32>
    %242 = vector.shape_cast %241 : vector<1x1x1x32xf32> to vector<1x32xf32>
    %c0_103 = arith.constant 0 : index
    %c2_104 = arith.constant 2 : index
    %c0_105 = arith.constant 0 : index
    %c0_106 = arith.constant 0 : index
    %243 = vector.load %arg4[%c0_103, %c2_104, %c0_105, %c0_106] : memref<2x3x1x32xf32, #tpu.memory_space<vmem>>, vector<1x1x1x32xf32>
    %244 = vector.shape_cast %243 : vector<1x1x1x32xf32> to vector<1x32xf32>
    %cst_107 = arith.constant dense<0.000000e+00> : vector<8xf32>
    %245 = vector.multi_reduction <add>, %240, %cst_107 [1] : vector<8x32xf32> to vector<8xf32>
    %246 = vector.shape_cast %245 : vector<8xf32> to vector<8x1xf32>
    %cst_108 = arith.constant 3.200000e+01 : f32
    %247 = vector.broadcast %cst_108 : f32 to vector<8x1xf32>
    %248 = arith.divf %246, %247 : vector<8x1xf32>
    %249 = vector.broadcast %248 : vector<8x1xf32> to vector<8x32xf32>
    %250 = arith.subf %240, %249 : vector<8x32xf32>
    %251 = arith.mulf %250, %250 : vector<8x32xf32>
    %cst_109 = arith.constant dense<0.000000e+00> : vector<8xf32>
    %252 = vector.multi_reduction <add>, %251, %cst_109 [1] : vector<8x32xf32> to vector<8xf32>
    %253 = vector.shape_cast %252 : vector<8xf32> to vector<8x1xf32>
    %cst_110 = arith.constant 3.200000e+01 : f32
    %254 = vector.broadcast %cst_110 : f32 to vector<8x1xf32>
    %255 = arith.divf %253, %254 : vector<8x1xf32>
    %256 = vector.broadcast %248 : vector<8x1xf32> to vector<8x32xf32>
    %257 = arith.subf %240, %256 : vector<8x32xf32>
    %cst_111 = arith.constant 9.99999974E-6 : f32
    %258 = vector.broadcast %cst_111 : f32 to vector<8x1xf32>
    %259 = arith.addf %255, %258 : vector<8x1xf32>
    %260 = math.rsqrt %259 : vector<8x1xf32>
    %261 = vector.broadcast %260 : vector<8x1xf32> to vector<8x32xf32>
    %262 = arith.mulf %257, %261 : vector<8x32xf32>
    %263 = vector.broadcast %242 : vector<1x32xf32> to vector<8x32xf32>
    %264 = arith.mulf %262, %263 : vector<8x32xf32>
    %265 = vector.broadcast %244 : vector<1x32xf32> to vector<8x32xf32>
    %266 = arith.addf %264, %265 : vector<8x32xf32>
    %c0_112 = arith.constant 0 : index
    %c0_113 = arith.constant 0 : index
    %c0_114 = arith.constant 0 : index
    %267 = vector.load %arg15[%c0_112, %c0_113, %c0_114] : memref<2x32x128xf32, #tpu.memory_space<vmem>>, vector<1x32x128xf32>
    %268 = vector.shape_cast %267 : vector<1x32x128xf32> to vector<32x128xf32>
    %cst_115 = arith.constant dense<0.000000e+00> : vector<8x128xf32>
    %269 = tpu.matmul %266, %268, %cst_115 {dimension_numbers = #tpu.dot_dimension_numbers<[1], [0], [0], [1], [0, 0, 1, 1], [], []>} : vector<8x32xf32>, vector<32x128xf32>, vector<8x128xf32> -> vector<8x128xf32>
    %c0_116 = arith.constant 0 : index
    %c0_117 = arith.constant 0 : index
    %c0_118 = arith.constant 0 : index
    %270 = vector.load %arg16[%c0_116, %c0_117, %c0_118] : memref<2x1x128xf32, #tpu.memory_space<vmem>>, vector<1x1x128xf32>
    %271 = vector.shape_cast %270 : vector<1x1x128xf32> to vector<1x128xf32>
    %272 = vector.broadcast %271 : vector<1x128xf32> to vector<8x128xf32>
    %273 = arith.addf %269, %272 : vector<8x128xf32>
    %cst_119 = arith.constant 0.000000e+00 : f32
    %274 = vector.broadcast %cst_119 : f32 to vector<8x128xf32>
    %275 = arith.maximumf %273, %274 : vector<8x128xf32>
    %c0_120 = arith.constant 0 : index
    %c0_121 = arith.constant 0 : index
    %c0_122 = arith.constant 0 : index
    %276 = vector.load %arg17[%c0_120, %c0_121, %c0_122] : memref<2x128x32xf32, #tpu.memory_space<vmem>>, vector<1x128x32xf32>
    %277 = vector.shape_cast %276 : vector<1x128x32xf32> to vector<128x32xf32>
    %cst_123 = arith.constant dense<0.000000e+00> : vector<8x32xf32>
    %278 = tpu.matmul %275, %277, %cst_123 {dimension_numbers = #tpu.dot_dimension_numbers<[1], [0], [0], [1], [0, 0, 1, 1], [], []>} : vector<8x128xf32>, vector<128x32xf32>, vector<8x32xf32> -> vector<8x32xf32>
    %279 = arith.addf %266, %278 : vector<8x32xf32>
    %c0_124 = arith.constant 0 : index
    %c0_125 = arith.constant 0 : index
    %c0_126 = arith.constant 0 : index
    %280 = vector.load %arg18[%c0_124, %c0_125, %c0_126] : memref<2x1x32xf32, #tpu.memory_space<vmem>>, vector<1x1x32xf32>
    %281 = vector.shape_cast %280 : vector<1x1x32xf32> to vector<1x32xf32>
    %282 = vector.broadcast %281 : vector<1x32xf32> to vector<8x32xf32>
    %283 = arith.addf %279, %282 : vector<8x32xf32>
    %c1_127 = arith.constant 1 : index
    %c0_128 = arith.constant 0 : index
    %c0_129 = arith.constant 0 : index
    %c0_130 = arith.constant 0 : index
    %284 = vector.load %arg3[%c1_127, %c0_128, %c0_129, %c0_130] : memref<2x3x1x32xf32, #tpu.memory_space<vmem>>, vector<1x1x1x32xf32>
    %285 = vector.shape_cast %284 : vector<1x1x1x32xf32> to vector<1x32xf32>
    %c1_131 = arith.constant 1 : index
    %c0_132 = arith.constant 0 : index
    %c0_133 = arith.constant 0 : index
    %c0_134 = arith.constant 0 : index
    %286 = vector.load %arg4[%c1_131, %c0_132, %c0_133, %c0_134] : memref<2x3x1x32xf32, #tpu.memory_space<vmem>>, vector<1x1x1x32xf32>
    %287 = vector.shape_cast %286 : vector<1x1x1x32xf32> to vector<1x32xf32>
    %cst_135 = arith.constant dense<0.000000e+00> : vector<8xf32>
    %288 = vector.multi_reduction <add>, %283, %cst_135 [1] : vector<8x32xf32> to vector<8xf32>
    %289 = vector.shape_cast %288 : vector<8xf32> to vector<8x1xf32>
    %cst_136 = arith.constant 3.200000e+01 : f32
    %290 = vector.broadcast %cst_136 : f32 to vector<8x1xf32>
    %291 = arith.divf %289, %290 : vector<8x1xf32>
    %292 = vector.broadcast %291 : vector<8x1xf32> to vector<8x32xf32>
    %293 = arith.subf %283, %292 : vector<8x32xf32>
    %294 = arith.mulf %293, %293 : vector<8x32xf32>
    %cst_137 = arith.constant dense<0.000000e+00> : vector<8xf32>
    %295 = vector.multi_reduction <add>, %294, %cst_137 [1] : vector<8x32xf32> to vector<8xf32>
    %296 = vector.shape_cast %295 : vector<8xf32> to vector<8x1xf32>
    %cst_138 = arith.constant 3.200000e+01 : f32
    %297 = vector.broadcast %cst_138 : f32 to vector<8x1xf32>
    %298 = arith.divf %296, %297 : vector<8x1xf32>
    %299 = vector.broadcast %291 : vector<8x1xf32> to vector<8x32xf32>
    %300 = arith.subf %283, %299 : vector<8x32xf32>
    %cst_139 = arith.constant 9.99999974E-6 : f32
    %301 = vector.broadcast %cst_139 : f32 to vector<8x1xf32>
    %302 = arith.addf %298, %301 : vector<8x1xf32>
    %303 = math.rsqrt %302 : vector<8x1xf32>
    %304 = vector.broadcast %303 : vector<8x1xf32> to vector<8x32xf32>
    %305 = arith.mulf %300, %304 : vector<8x32xf32>
    %306 = vector.broadcast %285 : vector<1x32xf32> to vector<8x32xf32>
    %307 = arith.mulf %305, %306 : vector<8x32xf32>
    %308 = vector.broadcast %287 : vector<1x32xf32> to vector<8x32xf32>
    %309 = arith.addf %307, %308 : vector<8x32xf32>
    %c1_140 = arith.constant 1 : index
    %c0_141 = arith.constant 0 : index
    %c0_142 = arith.constant 0 : index
    %310 = vector.load %arg5[%c1_140, %c0_141, %c0_142] : memref<2x32x96xf32, #tpu.memory_space<vmem>>, vector<1x32x96xf32>
    %311 = vector.shape_cast %310 : vector<1x32x96xf32> to vector<32x96xf32>
    %cst_143 = arith.constant dense<0.000000e+00> : vector<8x96xf32>
    %312 = tpu.matmul %309, %311, %cst_143 {dimension_numbers = #tpu.dot_dimension_numbers<[1], [0], [0], [1], [0, 0, 1, 1], [], []>} : vector<8x32xf32>, vector<32x96xf32>, vector<8x96xf32> -> vector<8x96xf32>
    %c1_144 = arith.constant 1 : index
    %c0_145 = arith.constant 0 : index
    %c0_146 = arith.constant 0 : index
    %313 = vector.load %arg6[%c1_144, %c0_145, %c0_146] : memref<2x1x96xf32, #tpu.memory_space<vmem>>, vector<1x1x96xf32>
    %314 = vector.shape_cast %313 : vector<1x1x96xf32> to vector<1x96xf32>
    %315 = vector.broadcast %314 : vector<1x96xf32> to vector<8x96xf32>
    %316 = arith.addf %312, %315 : vector<8x96xf32>
    %317 = vector.extract_strided_slice %316 {offsets = [0, 0], sizes = [8, 32], strides = [1, 1]} : vector<8x96xf32> to vector<8x32xf32>
    %318 = vector.extract_strided_slice %316 {offsets = [0, 32], sizes = [8, 32], strides = [1, 1]} : vector<8x96xf32> to vector<8x32xf32>
    %319 = vector.extract_strided_slice %316 {offsets = [0, 64], sizes = [8, 32], strides = [1, 1]} : vector<8x96xf32> to vector<8x32xf32>
    %cst_147 = arith.constant 0.353553385 : f32
    %320 = vector.broadcast %cst_147 : f32 to vector<8x32xf32>
    %321 = arith.mulf %317, %320 : vector<8x32xf32>
    %322 = vector.extract_strided_slice %321 {offsets = [0, 0], sizes = [8, 8], strides = [1, 1]} : vector<8x32xf32> to vector<8x8xf32>
    %323 = vector.extract_strided_slice %318 {offsets = [0, 0], sizes = [8, 8], strides = [1, 1]} : vector<8x32xf32> to vector<8x8xf32>
    %324 = vector.extract_strided_slice %319 {offsets = [0, 0], sizes = [8, 8], strides = [1, 1]} : vector<8x32xf32> to vector<8x8xf32>
    %325 = tpu.transpose %323, [1, 0] : vector<8x8xf32> -> vector<8x8xf32>
    %cst_148 = arith.constant dense<0.000000e+00> : vector<8x8xf32>
    %326 = tpu.matmul %322, %325, %cst_148 {dimension_numbers = #tpu.dot_dimension_numbers<[1], [0], [0], [1], [0, 0, 1, 1], [], []>} : vector<8x8xf32>, vector<8x8xf32>, vector<8x8xf32> -> vector<8x8xf32>
    %cst_149 = arith.constant -1.000000e+30 : f32
    %327 = vector.broadcast %cst_149 : f32 to vector<8x8xf32>
    %328 = arith.select %4, %326, %327 : vector<8x8xi1>, vector<8x8xf32>
    %cst_150 = arith.constant dense<0xFF800000> : vector<8xf32>
    %329 = vector.multi_reduction <maximumf>, %328, %cst_150 [1] : vector<8x8xf32> to vector<8xf32>
    %330 = vector.shape_cast %329 : vector<8xf32> to vector<8x1xf32>
    %331 = vector.broadcast %330 : vector<8x1xf32> to vector<8x8xf32>
    %332 = arith.subf %328, %331 : vector<8x8xf32>
    %333 = math.exp %332 : vector<8x8xf32>
    %cst_151 = arith.constant dense<0.000000e+00> : vector<8xf32>
    %334 = vector.multi_reduction <add>, %333, %cst_151 [1] : vector<8x8xf32> to vector<8xf32>
    %335 = vector.shape_cast %334 : vector<8xf32> to vector<8x1xf32>
    %336 = tpu.reciprocal %335 : vector<8x1xf32> -> vector<8x1xf32>
    %337 = vector.broadcast %336 : vector<8x1xf32> to vector<8x8xf32>
    %338 = arith.mulf %333, %337 : vector<8x8xf32>
    %cst_152 = arith.constant dense<0.000000e+00> : vector<8x8xf32>
    %339 = tpu.matmul %338, %324, %cst_152 {dimension_numbers = #tpu.dot_dimension_numbers<[1], [0], [0], [1], [0, 0, 1, 1], [], []>} : vector<8x8xf32>, vector<8x8xf32>, vector<8x8xf32> -> vector<8x8xf32>
    %340 = vector.extract_strided_slice %321 {offsets = [0, 8], sizes = [8, 8], strides = [1, 1]} : vector<8x32xf32> to vector<8x8xf32>
    %341 = vector.extract_strided_slice %318 {offsets = [0, 8], sizes = [8, 8], strides = [1, 1]} : vector<8x32xf32> to vector<8x8xf32>
    %342 = vector.extract_strided_slice %319 {offsets = [0, 8], sizes = [8, 8], strides = [1, 1]} : vector<8x32xf32> to vector<8x8xf32>
    %343 = tpu.transpose %341, [1, 0] : vector<8x8xf32> -> vector<8x8xf32>
    %cst_153 = arith.constant dense<0.000000e+00> : vector<8x8xf32>
    %344 = tpu.matmul %340, %343, %cst_153 {dimension_numbers = #tpu.dot_dimension_numbers<[1], [0], [0], [1], [0, 0, 1, 1], [], []>} : vector<8x8xf32>, vector<8x8xf32>, vector<8x8xf32> -> vector<8x8xf32>
    %cst_154 = arith.constant -1.000000e+30 : f32
    %345 = vector.broadcast %cst_154 : f32 to vector<8x8xf32>
    %346 = arith.select %4, %344, %345 : vector<8x8xi1>, vector<8x8xf32>
    %cst_155 = arith.constant dense<0xFF800000> : vector<8xf32>
    %347 = vector.multi_reduction <maximumf>, %346, %cst_155 [1] : vector<8x8xf32> to vector<8xf32>
    %348 = vector.shape_cast %347 : vector<8xf32> to vector<8x1xf32>
    %349 = vector.broadcast %348 : vector<8x1xf32> to vector<8x8xf32>
    %350 = arith.subf %346, %349 : vector<8x8xf32>
    %351 = math.exp %350 : vector<8x8xf32>
    %cst_156 = arith.constant dense<0.000000e+00> : vector<8xf32>
    %352 = vector.multi_reduction <add>, %351, %cst_156 [1] : vector<8x8xf32> to vector<8xf32>
    %353 = vector.shape_cast %352 : vector<8xf32> to vector<8x1xf32>
    %354 = tpu.reciprocal %353 : vector<8x1xf32> -> vector<8x1xf32>
    %355 = vector.broadcast %354 : vector<8x1xf32> to vector<8x8xf32>
    %356 = arith.mulf %351, %355 : vector<8x8xf32>
    %cst_157 = arith.constant dense<0.000000e+00> : vector<8x8xf32>
    %357 = tpu.matmul %356, %342, %cst_157 {dimension_numbers = #tpu.dot_dimension_numbers<[1], [0], [0], [1], [0, 0, 1, 1], [], []>} : vector<8x8xf32>, vector<8x8xf32>, vector<8x8xf32> -> vector<8x8xf32>
    %358 = vector.extract_strided_slice %321 {offsets = [0, 16], sizes = [8, 8], strides = [1, 1]} : vector<8x32xf32> to vector<8x8xf32>
    %359 = vector.extract_strided_slice %318 {offsets = [0, 16], sizes = [8, 8], strides = [1, 1]} : vector<8x32xf32> to vector<8x8xf32>
    %360 = vector.extract_strided_slice %319 {offsets = [0, 16], sizes = [8, 8], strides = [1, 1]} : vector<8x32xf32> to vector<8x8xf32>
    %361 = tpu.transpose %359, [1, 0] : vector<8x8xf32> -> vector<8x8xf32>
    %cst_158 = arith.constant dense<0.000000e+00> : vector<8x8xf32>
    %362 = tpu.matmul %358, %361, %cst_158 {dimension_numbers = #tpu.dot_dimension_numbers<[1], [0], [0], [1], [0, 0, 1, 1], [], []>} : vector<8x8xf32>, vector<8x8xf32>, vector<8x8xf32> -> vector<8x8xf32>
    %cst_159 = arith.constant -1.000000e+30 : f32
    %363 = vector.broadcast %cst_159 : f32 to vector<8x8xf32>
    %364 = arith.select %4, %362, %363 : vector<8x8xi1>, vector<8x8xf32>
    %cst_160 = arith.constant dense<0xFF800000> : vector<8xf32>
    %365 = vector.multi_reduction <maximumf>, %364, %cst_160 [1] : vector<8x8xf32> to vector<8xf32>
    %366 = vector.shape_cast %365 : vector<8xf32> to vector<8x1xf32>
    %367 = vector.broadcast %366 : vector<8x1xf32> to vector<8x8xf32>
    %368 = arith.subf %364, %367 : vector<8x8xf32>
    %369 = math.exp %368 : vector<8x8xf32>
    %cst_161 = arith.constant dense<0.000000e+00> : vector<8xf32>
    %370 = vector.multi_reduction <add>, %369, %cst_161 [1] : vector<8x8xf32> to vector<8xf32>
    %371 = vector.shape_cast %370 : vector<8xf32> to vector<8x1xf32>
    %372 = tpu.reciprocal %371 : vector<8x1xf32> -> vector<8x1xf32>
    %373 = vector.broadcast %372 : vector<8x1xf32> to vector<8x8xf32>
    %374 = arith.mulf %369, %373 : vector<8x8xf32>
    %cst_162 = arith.constant dense<0.000000e+00> : vector<8x8xf32>
    %375 = tpu.matmul %374, %360, %cst_162 {dimension_numbers = #tpu.dot_dimension_numbers<[1], [0], [0], [1], [0, 0, 1, 1], [], []>} : vector<8x8xf32>, vector<8x8xf32>, vector<8x8xf32> -> vector<8x8xf32>
    %376 = vector.extract_strided_slice %321 {offsets = [0, 24], sizes = [8, 8], strides = [1, 1]} : vector<8x32xf32> to vector<8x8xf32>
    %377 = vector.extract_strided_slice %318 {offsets = [0, 24], sizes = [8, 8], strides = [1, 1]} : vector<8x32xf32> to vector<8x8xf32>
    %378 = vector.extract_strided_slice %319 {offsets = [0, 24], sizes = [8, 8], strides = [1, 1]} : vector<8x32xf32> to vector<8x8xf32>
    %379 = tpu.transpose %377, [1, 0] : vector<8x8xf32> -> vector<8x8xf32>
    %cst_163 = arith.constant dense<0.000000e+00> : vector<8x8xf32>
    %380 = tpu.matmul %376, %379, %cst_163 {dimension_numbers = #tpu.dot_dimension_numbers<[1], [0], [0], [1], [0, 0, 1, 1], [], []>} : vector<8x8xf32>, vector<8x8xf32>, vector<8x8xf32> -> vector<8x8xf32>
    %cst_164 = arith.constant -1.000000e+30 : f32
    %381 = vector.broadcast %cst_164 : f32 to vector<8x8xf32>
    %382 = arith.select %4, %380, %381 : vector<8x8xi1>, vector<8x8xf32>
    %cst_165 = arith.constant dense<0xFF800000> : vector<8xf32>
    %383 = vector.multi_reduction <maximumf>, %382, %cst_165 [1] : vector<8x8xf32> to vector<8xf32>
    %384 = vector.shape_cast %383 : vector<8xf32> to vector<8x1xf32>
    %385 = vector.broadcast %384 : vector<8x1xf32> to vector<8x8xf32>
    %386 = arith.subf %382, %385 : vector<8x8xf32>
    %387 = math.exp %386 : vector<8x8xf32>
    %cst_166 = arith.constant dense<0.000000e+00> : vector<8xf32>
    %388 = vector.multi_reduction <add>, %387, %cst_166 [1] : vector<8x8xf32> to vector<8xf32>
    %389 = vector.shape_cast %388 : vector<8xf32> to vector<8x1xf32>
    %390 = tpu.reciprocal %389 : vector<8x1xf32> -> vector<8x1xf32>
    %391 = vector.broadcast %390 : vector<8x1xf32> to vector<8x8xf32>
    %392 = arith.mulf %387, %391 : vector<8x8xf32>
    %cst_167 = arith.constant dense<0.000000e+00> : vector<8x8xf32>
    %393 = tpu.matmul %392, %378, %cst_167 {dimension_numbers = #tpu.dot_dimension_numbers<[1], [0], [0], [1], [0, 0, 1, 1], [], []>} : vector<8x8xf32>, vector<8x8xf32>, vector<8x8xf32> -> vector<8x8xf32>
    %394 = tpu.concatenate %339, %357, %375, %393 in 1 : vector<8x8xf32>, vector<8x8xf32>, vector<8x8xf32>, vector<8x8xf32> -> vector<8x32xf32>
    %c1_168 = arith.constant 1 : index
    %c0_169 = arith.constant 0 : index
    %c0_170 = arith.constant 0 : index
    %395 = vector.load %arg7[%c1_168, %c0_169, %c0_170] : memref<2x32x32xf32, #tpu.memory_space<vmem>>, vector<1x32x32xf32>
    %396 = vector.shape_cast %395 : vector<1x32x32xf32> to vector<32x32xf32>
    %cst_171 = arith.constant dense<0.000000e+00> : vector<8x32xf32>
    %397 = tpu.matmul %394, %396, %cst_171 {dimension_numbers = #tpu.dot_dimension_numbers<[1], [0], [0], [1], [0, 0, 1, 1], [], []>} : vector<8x32xf32>, vector<32x32xf32>, vector<8x32xf32> -> vector<8x32xf32>
    %398 = arith.addf %309, %397 : vector<8x32xf32>
    %c1_172 = arith.constant 1 : index
    %c0_173 = arith.constant 0 : index
    %c0_174 = arith.constant 0 : index
    %399 = vector.load %arg8[%c1_172, %c0_173, %c0_174] : memref<2x1x32xf32, #tpu.memory_space<vmem>>, vector<1x1x32xf32>
    %400 = vector.shape_cast %399 : vector<1x1x32xf32> to vector<1x32xf32>
    %401 = vector.broadcast %400 : vector<1x32xf32> to vector<8x32xf32>
    %402 = arith.addf %398, %401 : vector<8x32xf32>
    %c1_175 = arith.constant 1 : index
    %c1_176 = arith.constant 1 : index
    %c0_177 = arith.constant 0 : index
    %c0_178 = arith.constant 0 : index
    %403 = vector.load %arg3[%c1_175, %c1_176, %c0_177, %c0_178] : memref<2x3x1x32xf32, #tpu.memory_space<vmem>>, vector<1x1x1x32xf32>
    %404 = vector.shape_cast %403 : vector<1x1x1x32xf32> to vector<1x32xf32>
    %c1_179 = arith.constant 1 : index
    %c1_180 = arith.constant 1 : index
    %c0_181 = arith.constant 0 : index
    %c0_182 = arith.constant 0 : index
    %405 = vector.load %arg4[%c1_179, %c1_180, %c0_181, %c0_182] : memref<2x3x1x32xf32, #tpu.memory_space<vmem>>, vector<1x1x1x32xf32>
    %406 = vector.shape_cast %405 : vector<1x1x1x32xf32> to vector<1x32xf32>
    %cst_183 = arith.constant dense<0.000000e+00> : vector<8xf32>
    %407 = vector.multi_reduction <add>, %402, %cst_183 [1] : vector<8x32xf32> to vector<8xf32>
    %408 = vector.shape_cast %407 : vector<8xf32> to vector<8x1xf32>
    %cst_184 = arith.constant 3.200000e+01 : f32
    %409 = vector.broadcast %cst_184 : f32 to vector<8x1xf32>
    %410 = arith.divf %408, %409 : vector<8x1xf32>
    %411 = vector.broadcast %410 : vector<8x1xf32> to vector<8x32xf32>
    %412 = arith.subf %402, %411 : vector<8x32xf32>
    %413 = arith.mulf %412, %412 : vector<8x32xf32>
    %cst_185 = arith.constant dense<0.000000e+00> : vector<8xf32>
    %414 = vector.multi_reduction <add>, %413, %cst_185 [1] : vector<8x32xf32> to vector<8xf32>
    %415 = vector.shape_cast %414 : vector<8xf32> to vector<8x1xf32>
    %cst_186 = arith.constant 3.200000e+01 : f32
    %416 = vector.broadcast %cst_186 : f32 to vector<8x1xf32>
    %417 = arith.divf %415, %416 : vector<8x1xf32>
    %418 = vector.broadcast %410 : vector<8x1xf32> to vector<8x32xf32>
    %419 = arith.subf %402, %418 : vector<8x32xf32>
    %cst_187 = arith.constant 9.99999974E-6 : f32
    %420 = vector.broadcast %cst_187 : f32 to vector<8x1xf32>
    %421 = arith.addf %417, %420 : vector<8x1xf32>
    %422 = math.rsqrt %421 : vector<8x1xf32>
    %423 = vector.broadcast %422 : vector<8x1xf32> to vector<8x32xf32>
    %424 = arith.mulf %419, %423 : vector<8x32xf32>
    %425 = vector.broadcast %404 : vector<1x32xf32> to vector<8x32xf32>
    %426 = arith.mulf %424, %425 : vector<8x32xf32>
    %427 = vector.broadcast %406 : vector<1x32xf32> to vector<8x32xf32>
    %428 = arith.addf %426, %427 : vector<8x32xf32>
    %c1_188 = arith.constant 1 : index
    %c0_189 = arith.constant 0 : index
    %c0_190 = arith.constant 0 : index
    %429 = vector.load %arg9[%c1_188, %c0_189, %c0_190] : memref<2x32x32xf32, #tpu.memory_space<vmem>>, vector<1x32x32xf32>
    %430 = vector.shape_cast %429 : vector<1x32x32xf32> to vector<32x32xf32>
    %cst_191 = arith.constant dense<0.000000e+00> : vector<8x32xf32>
    %431 = tpu.matmul %428, %430, %cst_191 {dimension_numbers = #tpu.dot_dimension_numbers<[1], [0], [0], [1], [0, 0, 1, 1], [], []>} : vector<8x32xf32>, vector<32x32xf32>, vector<8x32xf32> -> vector<8x32xf32>
    %c1_192 = arith.constant 1 : index
    %c0_193 = arith.constant 0 : index
    %c0_194 = arith.constant 0 : index
    %432 = vector.load %arg10[%c1_192, %c0_193, %c0_194] : memref<2x1x32xf32, #tpu.memory_space<vmem>>, vector<1x1x32xf32>
    %433 = vector.shape_cast %432 : vector<1x1x32xf32> to vector<1x32xf32>
    %434 = vector.broadcast %433 : vector<1x32xf32> to vector<8x32xf32>
    %435 = arith.addf %431, %434 : vector<8x32xf32>
    %c1_195 = arith.constant 1 : index
    %c0_196 = arith.constant 0 : index
    %c0_197 = arith.constant 0 : index
    %436 = vector.load %arg11[%c1_195, %c0_196, %c0_197] : memref<2x32x64xf32, #tpu.memory_space<vmem>>, vector<1x32x64xf32>
    %437 = vector.shape_cast %436 : vector<1x32x64xf32> to vector<32x64xf32>
    %cst_198 = arith.constant dense<0.000000e+00> : vector<8x64xf32>
    %438 = tpu.matmul %1, %437, %cst_198 {dimension_numbers = #tpu.dot_dimension_numbers<[1], [0], [0], [1], [0, 0, 1, 1], [], []>} : vector<8x32xf32>, vector<32x64xf32>, vector<8x64xf32> -> vector<8x64xf32>
    %c1_199 = arith.constant 1 : index
    %c0_200 = arith.constant 0 : index
    %c0_201 = arith.constant 0 : index
    %439 = vector.load %arg12[%c1_199, %c0_200, %c0_201] : memref<2x1x64xf32, #tpu.memory_space<vmem>>, vector<1x1x64xf32>
    %440 = vector.shape_cast %439 : vector<1x1x64xf32> to vector<1x64xf32>
    %441 = vector.broadcast %440 : vector<1x64xf32> to vector<8x64xf32>
    %442 = arith.addf %438, %441 : vector<8x64xf32>
    %443 = vector.extract_strided_slice %442 {offsets = [0, 0], sizes = [8, 32], strides = [1, 1]} : vector<8x64xf32> to vector<8x32xf32>
    %444 = vector.extract_strided_slice %442 {offsets = [0, 32], sizes = [8, 32], strides = [1, 1]} : vector<8x64xf32> to vector<8x32xf32>
    %cst_202 = arith.constant 0.353553385 : f32
    %445 = vector.broadcast %cst_202 : f32 to vector<8x32xf32>
    %446 = arith.mulf %435, %445 : vector<8x32xf32>
    %447 = vector.extract_strided_slice %446 {offsets = [0, 0], sizes = [8, 8], strides = [1, 1]} : vector<8x32xf32> to vector<8x8xf32>
    %448 = vector.extract_strided_slice %443 {offsets = [0, 0], sizes = [8, 8], strides = [1, 1]} : vector<8x32xf32> to vector<8x8xf32>
    %449 = vector.extract_strided_slice %444 {offsets = [0, 0], sizes = [8, 8], strides = [1, 1]} : vector<8x32xf32> to vector<8x8xf32>
    %450 = tpu.transpose %448, [1, 0] : vector<8x8xf32> -> vector<8x8xf32>
    %cst_203 = arith.constant dense<0.000000e+00> : vector<8x8xf32>
    %451 = tpu.matmul %447, %450, %cst_203 {dimension_numbers = #tpu.dot_dimension_numbers<[1], [0], [0], [1], [0, 0, 1, 1], [], []>} : vector<8x8xf32>, vector<8x8xf32>, vector<8x8xf32> -> vector<8x8xf32>
    %cst_204 = arith.constant dense<0xFF800000> : vector<8xf32>
    %452 = vector.multi_reduction <maximumf>, %451, %cst_204 [1] : vector<8x8xf32> to vector<8xf32>
    %453 = vector.shape_cast %452 : vector<8xf32> to vector<8x1xf32>
    %454 = vector.broadcast %453 : vector<8x1xf32> to vector<8x8xf32>
    %455 = arith.subf %451, %454 : vector<8x8xf32>
    %456 = math.exp %455 : vector<8x8xf32>
    %cst_205 = arith.constant dense<0.000000e+00> : vector<8xf32>
    %457 = vector.multi_reduction <add>, %456, %cst_205 [1] : vector<8x8xf32> to vector<8xf32>
    %458 = vector.shape_cast %457 : vector<8xf32> to vector<8x1xf32>
    %459 = tpu.reciprocal %458 : vector<8x1xf32> -> vector<8x1xf32>
    %460 = vector.broadcast %459 : vector<8x1xf32> to vector<8x8xf32>
    %461 = arith.mulf %456, %460 : vector<8x8xf32>
    %cst_206 = arith.constant dense<0.000000e+00> : vector<8x8xf32>
    %462 = tpu.matmul %461, %449, %cst_206 {dimension_numbers = #tpu.dot_dimension_numbers<[1], [0], [0], [1], [0, 0, 1, 1], [], []>} : vector<8x8xf32>, vector<8x8xf32>, vector<8x8xf32> -> vector<8x8xf32>
    %463 = vector.extract_strided_slice %446 {offsets = [0, 8], sizes = [8, 8], strides = [1, 1]} : vector<8x32xf32> to vector<8x8xf32>
    %464 = vector.extract_strided_slice %443 {offsets = [0, 8], sizes = [8, 8], strides = [1, 1]} : vector<8x32xf32> to vector<8x8xf32>
    %465 = vector.extract_strided_slice %444 {offsets = [0, 8], sizes = [8, 8], strides = [1, 1]} : vector<8x32xf32> to vector<8x8xf32>
    %466 = tpu.transpose %464, [1, 0] : vector<8x8xf32> -> vector<8x8xf32>
    %cst_207 = arith.constant dense<0.000000e+00> : vector<8x8xf32>
    %467 = tpu.matmul %463, %466, %cst_207 {dimension_numbers = #tpu.dot_dimension_numbers<[1], [0], [0], [1], [0, 0, 1, 1], [], []>} : vector<8x8xf32>, vector<8x8xf32>, vector<8x8xf32> -> vector<8x8xf32>
    %cst_208 = arith.constant dense<0xFF800000> : vector<8xf32>
    %468 = vector.multi_reduction <maximumf>, %467, %cst_208 [1] : vector<8x8xf32> to vector<8xf32>
    %469 = vector.shape_cast %468 : vector<8xf32> to vector<8x1xf32>
    %470 = vector.broadcast %469 : vector<8x1xf32> to vector<8x8xf32>
    %471 = arith.subf %467, %470 : vector<8x8xf32>
    %472 = math.exp %471 : vector<8x8xf32>
    %cst_209 = arith.constant dense<0.000000e+00> : vector<8xf32>
    %473 = vector.multi_reduction <add>, %472, %cst_209 [1] : vector<8x8xf32> to vector<8xf32>
    %474 = vector.shape_cast %473 : vector<8xf32> to vector<8x1xf32>
    %475 = tpu.reciprocal %474 : vector<8x1xf32> -> vector<8x1xf32>
    %476 = vector.broadcast %475 : vector<8x1xf32> to vector<8x8xf32>
    %477 = arith.mulf %472, %476 : vector<8x8xf32>
    %cst_210 = arith.constant dense<0.000000e+00> : vector<8x8xf32>
    %478 = tpu.matmul %477, %465, %cst_210 {dimension_numbers = #tpu.dot_dimension_numbers<[1], [0], [0], [1], [0, 0, 1, 1], [], []>} : vector<8x8xf32>, vector<8x8xf32>, vector<8x8xf32> -> vector<8x8xf32>
    %479 = vector.extract_strided_slice %446 {offsets = [0, 16], sizes = [8, 8], strides = [1, 1]} : vector<8x32xf32> to vector<8x8xf32>
    %480 = vector.extract_strided_slice %443 {offsets = [0, 16], sizes = [8, 8], strides = [1, 1]} : vector<8x32xf32> to vector<8x8xf32>
    %481 = vector.extract_strided_slice %444 {offsets = [0, 16], sizes = [8, 8], strides = [1, 1]} : vector<8x32xf32> to vector<8x8xf32>
    %482 = tpu.transpose %480, [1, 0] : vector<8x8xf32> -> vector<8x8xf32>
    %cst_211 = arith.constant dense<0.000000e+00> : vector<8x8xf32>
    %483 = tpu.matmul %479, %482, %cst_211 {dimension_numbers = #tpu.dot_dimension_numbers<[1], [0], [0], [1], [0, 0, 1, 1], [], []>} : vector<8x8xf32>, vector<8x8xf32>, vector<8x8xf32> -> vector<8x8xf32>
    %cst_212 = arith.constant dense<0xFF800000> : vector<8xf32>
    %484 = vector.multi_reduction <maximumf>, %483, %cst_212 [1] : vector<8x8xf32> to vector<8xf32>
    %485 = vector.shape_cast %484 : vector<8xf32> to vector<8x1xf32>
    %486 = vector.broadcast %485 : vector<8x1xf32> to vector<8x8xf32>
    %487 = arith.subf %483, %486 : vector<8x8xf32>
    %488 = math.exp %487 : vector<8x8xf32>
    %cst_213 = arith.constant dense<0.000000e+00> : vector<8xf32>
    %489 = vector.multi_reduction <add>, %488, %cst_213 [1] : vector<8x8xf32> to vector<8xf32>
    %490 = vector.shape_cast %489 : vector<8xf32> to vector<8x1xf32>
    %491 = tpu.reciprocal %490 : vector<8x1xf32> -> vector<8x1xf32>
    %492 = vector.broadcast %491 : vector<8x1xf32> to vector<8x8xf32>
    %493 = arith.mulf %488, %492 : vector<8x8xf32>
    %cst_214 = arith.constant dense<0.000000e+00> : vector<8x8xf32>
    %494 = tpu.matmul %493, %481, %cst_214 {dimension_numbers = #tpu.dot_dimension_numbers<[1], [0], [0], [1], [0, 0, 1, 1], [], []>} : vector<8x8xf32>, vector<8x8xf32>, vector<8x8xf32> -> vector<8x8xf32>
    %495 = vector.extract_strided_slice %446 {offsets = [0, 24], sizes = [8, 8], strides = [1, 1]} : vector<8x32xf32> to vector<8x8xf32>
    %496 = vector.extract_strided_slice %443 {offsets = [0, 24], sizes = [8, 8], strides = [1, 1]} : vector<8x32xf32> to vector<8x8xf32>
    %497 = vector.extract_strided_slice %444 {offsets = [0, 24], sizes = [8, 8], strides = [1, 1]} : vector<8x32xf32> to vector<8x8xf32>
    %498 = tpu.transpose %496, [1, 0] : vector<8x8xf32> -> vector<8x8xf32>
    %cst_215 = arith.constant dense<0.000000e+00> : vector<8x8xf32>
    %499 = tpu.matmul %495, %498, %cst_215 {dimension_numbers = #tpu.dot_dimension_numbers<[1], [0], [0], [1], [0, 0, 1, 1], [], []>} : vector<8x8xf32>, vector<8x8xf32>, vector<8x8xf32> -> vector<8x8xf32>
    %cst_216 = arith.constant dense<0xFF800000> : vector<8xf32>
    %500 = vector.multi_reduction <maximumf>, %499, %cst_216 [1] : vector<8x8xf32> to vector<8xf32>
    %501 = vector.shape_cast %500 : vector<8xf32> to vector<8x1xf32>
    %502 = vector.broadcast %501 : vector<8x1xf32> to vector<8x8xf32>
    %503 = arith.subf %499, %502 : vector<8x8xf32>
    %504 = math.exp %503 : vector<8x8xf32>
    %cst_217 = arith.constant dense<0.000000e+00> : vector<8xf32>
    %505 = vector.multi_reduction <add>, %504, %cst_217 [1] : vector<8x8xf32> to vector<8xf32>
    %506 = vector.shape_cast %505 : vector<8xf32> to vector<8x1xf32>
    %507 = tpu.reciprocal %506 : vector<8x1xf32> -> vector<8x1xf32>
    %508 = vector.broadcast %507 : vector<8x1xf32> to vector<8x8xf32>
    %509 = arith.mulf %504, %508 : vector<8x8xf32>
    %cst_218 = arith.constant dense<0.000000e+00> : vector<8x8xf32>
    %510 = tpu.matmul %509, %497, %cst_218 {dimension_numbers = #tpu.dot_dimension_numbers<[1], [0], [0], [1], [0, 0, 1, 1], [], []>} : vector<8x8xf32>, vector<8x8xf32>, vector<8x8xf32> -> vector<8x8xf32>
    %511 = tpu.concatenate %462, %478, %494, %510 in 1 : vector<8x8xf32>, vector<8x8xf32>, vector<8x8xf32>, vector<8x8xf32> -> vector<8x32xf32>
    %c1_219 = arith.constant 1 : index
    %c0_220 = arith.constant 0 : index
    %c0_221 = arith.constant 0 : index
    %512 = vector.load %arg13[%c1_219, %c0_220, %c0_221] : memref<2x32x32xf32, #tpu.memory_space<vmem>>, vector<1x32x32xf32>
    %513 = vector.shape_cast %512 : vector<1x32x32xf32> to vector<32x32xf32>
    %cst_222 = arith.constant dense<0.000000e+00> : vector<8x32xf32>
    %514 = tpu.matmul %511, %513, %cst_222 {dimension_numbers = #tpu.dot_dimension_numbers<[1], [0], [0], [1], [0, 0, 1, 1], [], []>} : vector<8x32xf32>, vector<32x32xf32>, vector<8x32xf32> -> vector<8x32xf32>
    %515 = arith.addf %428, %514 : vector<8x32xf32>
    %c1_223 = arith.constant 1 : index
    %c0_224 = arith.constant 0 : index
    %c0_225 = arith.constant 0 : index
    %516 = vector.load %arg14[%c1_223, %c0_224, %c0_225] : memref<2x1x32xf32, #tpu.memory_space<vmem>>, vector<1x1x32xf32>
    %517 = vector.shape_cast %516 : vector<1x1x32xf32> to vector<1x32xf32>
    %518 = vector.broadcast %517 : vector<1x32xf32> to vector<8x32xf32>
    %519 = arith.addf %515, %518 : vector<8x32xf32>
    %c1_226 = arith.constant 1 : index
    %c2_227 = arith.constant 2 : index
    %c0_228 = arith.constant 0 : index
    %c0_229 = arith.constant 0 : index
    %520 = vector.load %arg3[%c1_226, %c2_227, %c0_228, %c0_229] : memref<2x3x1x32xf32, #tpu.memory_space<vmem>>, vector<1x1x1x32xf32>
    %521 = vector.shape_cast %520 : vector<1x1x1x32xf32> to vector<1x32xf32>
    %c1_230 = arith.constant 1 : index
    %c2_231 = arith.constant 2 : index
    %c0_232 = arith.constant 0 : index
    %c0_233 = arith.constant 0 : index
    %522 = vector.load %arg4[%c1_230, %c2_231, %c0_232, %c0_233] : memref<2x3x1x32xf32, #tpu.memory_space<vmem>>, vector<1x1x1x32xf32>
    %523 = vector.shape_cast %522 : vector<1x1x1x32xf32> to vector<1x32xf32>
    %cst_234 = arith.constant dense<0.000000e+00> : vector<8xf32>
    %524 = vector.multi_reduction <add>, %519, %cst_234 [1] : vector<8x32xf32> to vector<8xf32>
    %525 = vector.shape_cast %524 : vector<8xf32> to vector<8x1xf32>
    %cst_235 = arith.constant 3.200000e+01 : f32
    %526 = vector.broadcast %cst_235 : f32 to vector<8x1xf32>
    %527 = arith.divf %525, %526 : vector<8x1xf32>
    %528 = vector.broadcast %527 : vector<8x1xf32> to vector<8x32xf32>
    %529 = arith.subf %519, %528 : vector<8x32xf32>
    %530 = arith.mulf %529, %529 : vector<8x32xf32>
    %cst_236 = arith.constant dense<0.000000e+00> : vector<8xf32>
    %531 = vector.multi_reduction <add>, %530, %cst_236 [1] : vector<8x32xf32> to vector<8xf32>
    %532 = vector.shape_cast %531 : vector<8xf32> to vector<8x1xf32>
    %cst_237 = arith.constant 3.200000e+01 : f32
    %533 = vector.broadcast %cst_237 : f32 to vector<8x1xf32>
    %534 = arith.divf %532, %533 : vector<8x1xf32>
    %535 = vector.broadcast %527 : vector<8x1xf32> to vector<8x32xf32>
    %536 = arith.subf %519, %535 : vector<8x32xf32>
    %cst_238 = arith.constant 9.99999974E-6 : f32
    %537 = vector.broadcast %cst_238 : f32 to vector<8x1xf32>
    %538 = arith.addf %534, %537 : vector<8x1xf32>
    %539 = math.rsqrt %538 : vector<8x1xf32>
    %540 = vector.broadcast %539 : vector<8x1xf32> to vector<8x32xf32>
    %541 = arith.mulf %536, %540 : vector<8x32xf32>
    %542 = vector.broadcast %521 : vector<1x32xf32> to vector<8x32xf32>
    %543 = arith.mulf %541, %542 : vector<8x32xf32>
    %544 = vector.broadcast %523 : vector<1x32xf32> to vector<8x32xf32>
    %545 = arith.addf %543, %544 : vector<8x32xf32>
    %c1_239 = arith.constant 1 : index
    %c0_240 = arith.constant 0 : index
    %c0_241 = arith.constant 0 : index
    %546 = vector.load %arg15[%c1_239, %c0_240, %c0_241] : memref<2x32x128xf32, #tpu.memory_space<vmem>>, vector<1x32x128xf32>
    %547 = vector.shape_cast %546 : vector<1x32x128xf32> to vector<32x128xf32>
    %cst_242 = arith.constant dense<0.000000e+00> : vector<8x128xf32>
    %548 = tpu.matmul %545, %547, %cst_242 {dimension_numbers = #tpu.dot_dimension_numbers<[1], [0], [0], [1], [0, 0, 1, 1], [], []>} : vector<8x32xf32>, vector<32x128xf32>, vector<8x128xf32> -> vector<8x128xf32>
    %c1_243 = arith.constant 1 : index
    %c0_244 = arith.constant 0 : index
    %c0_245 = arith.constant 0 : index
    %549 = vector.load %arg16[%c1_243, %c0_244, %c0_245] : memref<2x1x128xf32, #tpu.memory_space<vmem>>, vector<1x1x128xf32>
    %550 = vector.shape_cast %549 : vector<1x1x128xf32> to vector<1x128xf32>
    %551 = vector.broadcast %550 : vector<1x128xf32> to vector<8x128xf32>
    %552 = arith.addf %548, %551 : vector<8x128xf32>
    %cst_246 = arith.constant 0.000000e+00 : f32
    %553 = vector.broadcast %cst_246 : f32 to vector<8x128xf32>
    %554 = arith.maximumf %552, %553 : vector<8x128xf32>
    %c1_247 = arith.constant 1 : index
    %c0_248 = arith.constant 0 : index
    %c0_249 = arith.constant 0 : index
    %555 = vector.load %arg17[%c1_247, %c0_248, %c0_249] : memref<2x128x32xf32, #tpu.memory_space<vmem>>, vector<1x128x32xf32>
    %556 = vector.shape_cast %555 : vector<1x128x32xf32> to vector<128x32xf32>
    %cst_250 = arith.constant dense<0.000000e+00> : vector<8x32xf32>
    %557 = tpu.matmul %554, %556, %cst_250 {dimension_numbers = #tpu.dot_dimension_numbers<[1], [0], [0], [1], [0, 0, 1, 1], [], []>} : vector<8x128xf32>, vector<128x32xf32>, vector<8x32xf32> -> vector<8x32xf32>
    %558 = arith.addf %545, %557 : vector<8x32xf32>
    %c1_251 = arith.constant 1 : index
    %c0_252 = arith.constant 0 : index
    %c0_253 = arith.constant 0 : index
    %559 = vector.load %arg18[%c1_251, %c0_252, %c0_253] : memref<2x1x32xf32, #tpu.memory_space<vmem>>, vector<1x1x32xf32>
    %560 = vector.shape_cast %559 : vector<1x1x32xf32> to vector<1x32xf32>
    %561 = vector.broadcast %560 : vector<1x32xf32> to vector<8x32xf32>
    %562 = arith.addf %558, %561 : vector<8x32xf32>
    %c0_254 = arith.constant 0 : index
    %c0_255 = arith.constant 0 : index
    %563 = vector.load %arg19[%c0_254, %c0_255] : memref<1x32xf32, #tpu.memory_space<vmem>>, vector<1x32xf32>
    %c0_256 = arith.constant 0 : index
    %c0_257 = arith.constant 0 : index
    %564 = vector.load %arg20[%c0_256, %c0_257] : memref<1x32xf32, #tpu.memory_space<vmem>>, vector<1x32xf32>
    %cst_258 = arith.constant dense<0.000000e+00> : vector<8xf32>
    %565 = vector.multi_reduction <add>, %562, %cst_258 [1] : vector<8x32xf32> to vector<8xf32>
    %566 = vector.shape_cast %565 : vector<8xf32> to vector<8x1xf32>
    %cst_259 = arith.constant 3.200000e+01 : f32
    %567 = vector.broadcast %cst_259 : f32 to vector<8x1xf32>
    %568 = arith.divf %566, %567 : vector<8x1xf32>
    %569 = vector.broadcast %568 : vector<8x1xf32> to vector<8x32xf32>
    %570 = arith.subf %562, %569 : vector<8x32xf32>
    %571 = arith.mulf %570, %570 : vector<8x32xf32>
    %cst_260 = arith.constant dense<0.000000e+00> : vector<8xf32>
    %572 = vector.multi_reduction <add>, %571, %cst_260 [1] : vector<8x32xf32> to vector<8xf32>
    %573 = vector.shape_cast %572 : vector<8xf32> to vector<8x1xf32>
    %cst_261 = arith.constant 3.200000e+01 : f32
    %574 = vector.broadcast %cst_261 : f32 to vector<8x1xf32>
    %575 = arith.divf %573, %574 : vector<8x1xf32>
    %576 = vector.broadcast %568 : vector<8x1xf32> to vector<8x32xf32>
    %577 = arith.subf %562, %576 : vector<8x32xf32>
    %cst_262 = arith.constant 9.99999974E-6 : f32
    %578 = vector.broadcast %cst_262 : f32 to vector<8x1xf32>
    %579 = arith.addf %575, %578 : vector<8x1xf32>
    %580 = math.rsqrt %579 : vector<8x1xf32>
    %581 = vector.broadcast %580 : vector<8x1xf32> to vector<8x32xf32>
    %582 = arith.mulf %577, %581 : vector<8x32xf32>
    %583 = vector.broadcast %563 : vector<1x32xf32> to vector<8x32xf32>
    %584 = arith.mulf %582, %583 : vector<8x32xf32>
    %585 = vector.broadcast %564 : vector<1x32xf32> to vector<8x32xf32>
    %586 = arith.addf %584, %585 : vector<8x32xf32>
    %c0_263 = arith.constant 0 : index
    %c0_264 = arith.constant 0 : index
    %587 = vector.load %arg21[%c0_263, %c0_264] : memref<8x32xf32, #tpu.memory_space<vmem>>, vector<8x32xf32>
    tpu.vector_store %arg21[%c0_263, %c0_264], %586 {strides = array<i32>} : memref<8x32xf32, #tpu.memory_space<vmem>>, vector<8x32xf32>,
    return
  }
  func.func @transform_0(%arg0: i32) -> (i32, i32) {
    %c0_i32 = arith.constant 0 : i32
    %c0_i32_0 = arith.constant 0 : i32
    return %arg0, %c0_i32 : i32, i32
  }
  func.func @transform_1(%arg0: i32) -> (i32, i32) {
    %c0_i32 = arith.constant 0 : i32
    %c0_i32_0 = arith.constant 0 : i32
    return %arg0, %c0_i32 : i32, i32
  }
  func.func @transform_2(%arg0: i32) -> (i32, i32, i32, i32) {
    %c0_i32 = arith.constant 0 : i32
    %c0_i32_0 = arith.constant 0 : i32
    %c0_i32_1 = arith.constant 0 : i32
    %c0_i32_2 = arith.constant 0 : i32
    %c0_i32_3 = arith.constant 0 : i32
    return %c0_i32, %c0_i32_0, %c0_i32_1, %c0_i32_2 : i32, i32, i32, i32
  }
  func.func @transform_3(%arg0: i32) -> (i32, i32, i32, i32) {
    %c0_i32 = arith.constant 0 : i32
    %c0_i32_0 = arith.constant 0 : i32
    %c0_i32_1 = arith.constant 0 : i32
    %c0_i32_2 = arith.constant 0 : i32
    %c0_i32_3 = arith.constant 0 : i32
    return %c0_i32, %c0_i32_0, %c0_i32_1, %c0_i32_2 : i32, i32, i32, i32
  }
  func.func @transform_4(%arg0: i32) -> (i32, i32, i32) {
    %c0_i32 = arith.constant 0 : i32
    %c0_i32_0 = arith.constant 0 : i32
    %c0_i32_1 = arith.constant 0 : i32
    %c0_i32_2 = arith.constant 0 : i32
    return %c0_i32, %c0_i32_0, %c0_i32_1 : i32, i32, i32
  }
  func.func @transform_5(%arg0: i32) -> (i32, i32, i32) {
    %c0_i32 = arith.constant 0 : i32
    %c0_i32_0 = arith.constant 0 : i32
    %c0_i32_1 = arith.constant 0 : i32
    %c0_i32_2 = arith.constant 0 : i32
    return %c0_i32, %c0_i32_0, %c0_i32_1 : i32, i32, i32
  }
  func.func @transform_6(%arg0: i32) -> (i32, i32, i32) {
    %c0_i32 = arith.constant 0 : i32
    %c0_i32_0 = arith.constant 0 : i32
    %c0_i32_1 = arith.constant 0 : i32
    %c0_i32_2 = arith.constant 0 : i32
    return %c0_i32, %c0_i32_0, %c0_i32_1 : i32, i32, i32
  }
  func.func @transform_7(%arg0: i32) -> (i32, i32, i32) {
    %c0_i32 = arith.constant 0 : i32
    %c0_i32_0 = arith.constant 0 : i32
    %c0_i32_1 = arith.constant 0 : i32
    %c0_i32_2 = arith.constant 0 : i32
    return %c0_i32, %c0_i32_0, %c0_i32_1 : i32, i32, i32
  }
  func.func @transform_8(%arg0: i32) -> (i32, i32, i32) {
    %c0_i32 = arith.constant 0 : i32
    %c0_i32_0 = arith.constant 0 : i32
    %c0_i32_1 = arith.constant 0 : i32
    %c0_i32_2 = arith.constant 0 : i32
    return %c0_i32, %c0_i32_0, %c0_i32_1 : i32, i32, i32
  }
  func.func @transform_9(%arg0: i32) -> (i32, i32, i32) {
    %c0_i32 = arith.constant 0 : i32
    %c0_i32_0 = arith.constant 0 : i32
    %c0_i32_1 = arith.constant 0 : i32
    %c0_i32_2 = arith.constant 0 : i32
    return %c0_i32, %c0_i32_0, %c0_i32_1 : i32, i32, i32
  }
  func.func @transform_10(%arg0: i32) -> (i32, i32, i32) {
    %c0_i32 = arith.constant 0 : i32
    %c0_i32_0 = arith.constant 0 : i32
    %c0_i32_1 = arith.constant 0 : i32
    %c0_i32_2 = arith.constant 0 : i32
    return %c0_i32, %c0_i32_0, %c0_i32_1 : i32, i32, i32
  }
  func.func @transform_11(%arg0: i32) -> (i32, i32, i32) {
    %c0_i32 = arith.constant 0 : i32
    %c0_i32_0 = arith.constant 0 : i32
    %c0_i32_1 = arith.constant 0 : i32
    %c0_i32_2 = arith.constant 0 : i32
    return %c0_i32, %c0_i32_0, %c0_i32_1 : i32, i32, i32
  }
  func.func @transform_12(%arg0: i32) -> (i32, i32, i32) {
    %c0_i32 = arith.constant 0 : i32
    %c0_i32_0 = arith.constant 0 : i32
    %c0_i32_1 = arith.constant 0 : i32
    %c0_i32_2 = arith.constant 0 : i32
    return %c0_i32, %c0_i32_0, %c0_i32_1 : i32, i32, i32
  }
  func.func @transform_13(%arg0: i32) -> (i32, i32, i32) {
    %c0_i32 = arith.constant 0 : i32
    %c0_i32_0 = arith.constant 0 : i32
    %c0_i32_1 = arith.constant 0 : i32
    %c0_i32_2 = arith.constant 0 : i32
    return %c0_i32, %c0_i32_0, %c0_i32_1 : i32, i32, i32
  }
  func.func @transform_14(%arg0: i32) -> (i32, i32, i32) {
    %c0_i32 = arith.constant 0 : i32
    %c0_i32_0 = arith.constant 0 : i32
    %c0_i32_1 = arith.constant 0 : i32
    %c0_i32_2 = arith.constant 0 : i32
    return %c0_i32, %c0_i32_0, %c0_i32_1 : i32, i32, i32
  }
  func.func @transform_15(%arg0: i32) -> (i32, i32, i32) {
    %c0_i32 = arith.constant 0 : i32
    %c0_i32_0 = arith.constant 0 : i32
    %c0_i32_1 = arith.constant 0 : i32
    %c0_i32_2 = arith.constant 0 : i32
    return %c0_i32, %c0_i32_0, %c0_i32_1 : i32, i32, i32
  }
  func.func @transform_16(%arg0: i32) -> (i32, i32, i32) {
    %c0_i32 = arith.constant 0 : i32
    %c0_i32_0 = arith.constant 0 : i32
    %c0_i32_1 = arith.constant 0 : i32
    %c0_i32_2 = arith.constant 0 : i32
    return %c0_i32, %c0_i32_0, %c0_i32_1 : i32, i32, i32
  }
  func.func @transform_17(%arg0: i32) -> (i32, i32, i32) {
    %c0_i32 = arith.constant 0 : i32
    %c0_i32_0 = arith.constant 0 : i32
    %c0_i32_1 = arith.constant 0 : i32
    %c0_i32_2 = arith.constant 0 : i32
    return %c0_i32, %c0_i32_0, %c0_i32_1 : i32, i32, i32
  }
  func.func @transform_18(%arg0: i32) -> (i32, i32) {
    %c0_i32 = arith.constant 0 : i32
    %c0_i32_0 = arith.constant 0 : i32
    %c0_i32_1 = arith.constant 0 : i32
    return %c0_i32, %c0_i32_0 : i32, i32
  }
  func.func @transform_19(%arg0: i32) -> (i32, i32) {
    %c0_i32 = arith.constant 0 : i32
    %c0_i32_0 = arith.constant 0 : i32
    %c0_i32_1 = arith.constant 0 : i32
    return %c0_i32, %c0_i32_0 : i32, i32
  }
  func.func @transform_20(%arg0: i32) -> (i32, i32) {
    %c0_i32 = arith.constant 0 : i32
    %c0_i32_0 = arith.constant 0 : i32
    return %arg0, %c0_i32 : i32, i32
  }
}

</mosaic_0001>

<bundles_post_ra>
// kernel: decoder_forward.1
= control target key start
LH: loop header
LB: loop body
LE: loop exit
PB: predicated region body
PF: predicated region fallthrough
CT: control target
= control target key end

     0   :  { %s6853_s0 = inlined_call_operand.vmem [shape: f32[16,32], index: 0, kind: input, shape index: {}]   ;;  %s6854_s1 = inlined_call_operand.vmem [shape: f32[16,32], index: 1, kind: input, shape index: {}]   ;;  %s6855_s2 = inlined_call_operand.vmem [shape: f32[2,3,1,32], index: 2, kind: input, shape index: {}]   ;;  %s6856_s3 = inlined_call_operand.vmem [shape: f32[2,3,1,32], index: 3, kind: input, shape index: {}]   ;;  %s6857_s4 = inlined_call_operand.vmem [shape: f32[2,32,96], index: 4, kind: input, shape index: {}]   ;;  %s6858_s5 = inlined_call_operand.vmem [shape: f32[2,1,96], index: 5, kind: input, shape index: {}]   ;;  %s6859_s6 = inlined_call_operand.vmem [shape: f32[2,32,32], index: 6, kind: input, shape index: {}]   ;;  %s6860_s7 = inlined_call_operand.vmem [shape: f32[2,1,32], index: 7, kind: input, shape index: {}]   ;;  %s6861_s8 = inlined_call_operand.vmem [shape: f32[2,32,32], index: 8, kind: input, shape index: {}]   ;;  %s6862_s9 = inlined_call_operand.vmem [shape: f32[2,1,32], index: 9, kind: input, shape index: {}]   ;;  %s6863_s10 = inlined_call_operand.vmem [shape: f32[2,32,64], index: 10, kind: input, shape index: {}]   ;;  %s6864_s11 = inlined_call_operand.vmem [shape: f32[2,1,64], index: 11, kind: input, shape index: {}]   ;;  %s6865_s12 = inlined_call_operand.vmem [shape: f32[2,32,32], index: 12, kind: input, shape index: {}]   ;;  %s6866_s13 = inlined_call_operand.vmem [shape: f32[2,1,32], index: 13, kind: input, shape index: {}]   ;;  %s6867_s14 = inlined_call_operand.vmem [shape: f32[2,32,128], index: 14, kind: input, shape index: {}]   ;;  %s6868_s15 = inlined_call_operand.vmem [shape: f32[2,1,128], index: 15, kind: input, shape index: {}]   ;;  %s6869_s16 = inlined_call_operand.vmem [shape: f32[2,128,32], index: 16, kind: input, shape index: {}]   ;;  %s6870_s17 = inlined_call_operand.vmem [shape: f32[2,1,32], index: 17, kind: input, shape index: {}]   ;;  %s6871_s18 = inlined_call_operand.vmem [shape: f32[1,32], index: 18, kind: input, shape index: {}]   ;;  %s6872_s19 = inlined_call_operand.vmem [shape: f32[1,32], index: 19, kind: input, shape index: {}]   ;;  %s6873_s20 = inlined_call_operand.hbm [shape: f32[16,32], index: 20, kind: output, shape index: {}]  }
   0x1   :  { %6914 = sst [smem:[#allocation14_spill]] %s6853_s0 }
   0x2   :  { %6915 = sst [smem:[#allocation15_spill]] %s6854_s1 }
   0x3   :  { %6916 = sst [smem:[#allocation16_spill]] %s6855_s2 }
   0x4   :  { %6917 = sst [smem:[#allocation17_spill]] %s6856_s3 }
   0x5   :  { %6918 = sst [smem:[#allocation18_spill]] %s6857_s4 }
   0x6   :  { %6919 = sst [smem:[#allocation19_spill]] %s6862_s9 }
   0x7   :  { %6920 = sst [smem:[#allocation20_spill]] %s6864_s11 }
   0x8   :  { %6921 = sst [smem:[#allocation21_spill]] %s6865_s12 }
   0x9   :  { %6922 = sst [smem:[#allocation22_spill]] %s6866_s13 }
   0xa   :  { %6923 = sst [smem:[#allocation23_spill]] %s6871_s18 }
   0xb   :  { %6924 = sst [smem:[#allocation24_spill]] %s6872_s19 }
   0xc   :  { %6925 = sst [smem:[#allocation25_spill]] %s6873_s20 }
   0xd   :  { %25 = vsyncpa [#allocation3], 0 }
   0xe   :  { %27 = vsyncpa [#allocation3 + $0x1], 0  ;;  %s5997_s1 = smov 0   ;;  %s5999_s22 = smov 0  }
   0xf   :  { %s6001_s23 = smov 0   ;;  %s6003_s24 = smov 0  }
  0x10 LB: > { %6926 = sst [smem:[#allocation5_spill]] %s5860_s1  ;;  %s6018_s2 = sadd.s32 4294967295, %s5872_s24   ;;  %s5872_s24 = sphi %s6003_s24, %s6976_s24   ;;  %s5868_s23 = sphi %s6001_s23, %s6979_s23   ;;  %s5864_s22 = sphi %s5999_s22, %s6978_s22   ;;  %s5860_s1 = sphi %s5997_s1, %s6977_s1  }
  0x11   : > { %6927 = sst [smem:[#allocation6_spill]] %s5864_s22  ;;  %s4880_s25 = sadd.s32 4294967294, %s5872_s24  }
  0x12   : > { %6928 = sst [smem:[#allocation7_spill]] %s5868_s23  ;;  %s6022_s3 = sadd.s32 1, %s5872_s24  }
  0x13   : > { %6929 = sst [smem:[#allocation8_spill]] %s5872_s24  ;;  %s470_s26 = sadd.s32 1, %s5868_s23 }
  0x14   : > { %6930 = sst [smem:[#allocation9_spill]] %s6018_s2  ;;  %s467_s27 = ssub.s32 %s5872_s24, %s6022_s3 }
  0x15   : > { %6931 = sst [smem:[#allocation10_spill]] %s6022_s3  ;;  %p480_p0 = scmp.ne.s32.totalorder %s5868_s23, %s5864_s22 }
  0x16   : > { %p468_p1 = scmp.eq.s32.totalorder %s467_s27, 0  ;;  %p481_p2 = scmp.eq.s32.totalorder %s6018_s2, 1 }
  0x17   : > { %p486_p3 = scmp.ne.s32.totalorder %s5864_s22, %s5860_s1  ;;  %p487_p4 = scmp.eq.s32.totalorder %s4880_s25, 1 }
  0x18   : > { %s6033_s28 = scalar_select %p468_p1, %s5868_s23, %s470_s26  }
  0x19   : > { %p6035_p5 = por %p481_p2, %p480_p0  ;;  %p6039_p6 = por %p487_p4, %p486_p3 }
  0x1a   : > { %6932 = sst [smem:[#allocation11_spill]] %s6033_s28  ;;  %p4883_p7 = scmp.ge.s32.totalorder %s5872_s24, 1 }
  0x1b   : > { %s6933_s4 = scalar_select %p6035_p5, 1, 0 }
  0x1c   : > { %s6935_s29 = scalar_select %p6039_p6, 1, 0 }
  0x1d   : > { %6934 = sst [smem:[#allocation12_spill]] %s6933_s4  ;;  %p573_p8 = scmp.lt.s32.totalorder %s5872_s24, 3 }
  0x1e   : > { %6936 = sst [smem:[#allocation13_spill]] %s6935_s29 }
  0x1f   : > { %p574_p9 = pnand %p4883_p7, %p573_p8 }
  0x20   : > { %p634_p10 = scmp.lt.s32.totalorder (!%p574_p9), %s6018_s2, 1  ;;  %vm651_vm0 = vcmask (!%p574_p9), 261120   ;;  %s6937_s26 = sld [smem:[#allocation14_spill]] (!%p574_p9)  ;;  %v5874_v10 = vmov (!%p574_p9), 0.0|0.0   ;;  %vm5875_vm1 = vmmov (!%p574_p9), 0   ;;  %v5876_v13 = vmov (!%p574_p9), 0.0  }
  0x21   : > { %577 = sbr.rel (%p574_p9) target bundleno = 9824 (0x2660), region = 100  ;;  %s6938_s3 = sld [smem:[#allocation18_spill]] (!%p574_p9)  ;;  %5556 = vmatprep.subr.bf16.mxu1 (!%p574_p9), %v5874_v10  ;;  %5202 = vmatprep.mubr.msk.f32.mxu1 (!%p574_p9), %vm5875_vm1, %v5876_v13  ;;  %v4889_v24 = vld [vmem:[%s6858_s5] ss:$0 sm:$0xff] (!%p574_p9)  ;;  %vm768_vm2 = vcmask (!%p574_p9), 64512   ;;  %v644_v36 = vlaneseq (!%p574_p9)  ;;  %vm1443_vm4 = vcmask (!%p574_p9), 130048  }
  0x22   : > { %5215 = vmatprep.subr.mxu0 (!%p574_p9), %v5876_v13  ;;  %5217 = vmatprep.mubr.msk.f32.mxu0 (!%p574_p9), %vm5875_vm1, %v5876_v13  ;;  %s6939_s28 = sld [smem:[#allocation16_spill]] (!%p574_p9)  ;;  %s6940_s25 = sld [smem:[#allocation17_spill]] (!%p574_p9)  ;;  %vm1445_vm5 = vcmask (!%p574_p9), 195584  }
  0x23   : > { %s6882_s1 = smov (!%p574_p9), 96   ;;  %s6898_s23 = smov (!%p574_p9), 120   ;;  %v645_v37 = vshrl.u32 (!%p574_p9), %v644_v36, 7  ;;  %v647_v38 = vand.u32 (!%p574_p9), 127, %v644_v36  ;;  %v1449_v36 = vld [vmem:[%s6859_s6 + $0x10] sm:$0xff] (!%p574_p9) }
  0x24   : > { %s6889_s29 = smov (!%p574_p9), 88   ;;  %s6887_s21 = smov (!%p574_p9), 80  }
  0x25   : > { %vm6126_vm3 = vcmp.le.s32.totalorder (!%p574_p9), %v647_v38, %v645_v37  ;;  %v1450_v37 = vld [vmem:[%s6859_s6 + $0x18] sm:$0xff] (!%p574_p9)  ;;  %s6945_s11 = sld [smem:[#allocation20_spill]] (!%p574_p9)  ;;  %s6947_s9 = sld [smem:[#allocation19_spill]] (!%p574_p9) }
  0x26   : > { %v5566_v38 = vpack.c.bf16 (!%p574_p9), %v1450_v37, %v1449_v36  ;;  %s6952_s18 = smov (!%p574_p9), 80   ;;  %s6953_s19 = smov (!%p574_p9), 72  }
  0x27   : > { %v680_v7 = vld [vmem:[%s6938_s3] sm:$0xff] (!%p574_p9)  ;;  %v681_v8 = vld [vmem:[%s6938_s3 + $0x8] sm:$0xff] (!%p574_p9)  ;;  %v682_v9 = vld [vmem:[%s6938_s3 + $0x10] sm:$0xff] (!%p574_p9)  ;;  %s6954_s12 = sld [smem:[#allocation21_spill]] (!%p574_p9)  ;;  %s6956_s4 = smov (!%p574_p9), 16  }
  0x28   : > { %s6047_s30 = scalar_select %p634_p10, %s6018_s2, 1  ;;  %v5557_v11 = vpack.c.bf16 %v681_v8, %v680_v7  ;;  %v683_v12 = vld [vmem:[%s6938_s3 + $0x18] sm:$0xff]  ;;  %v4887_v19 = vld [vmem:[%s6939_s28] ss:$0 sm:$0xff] }
  0x29   : > { %v5560_v14 = vpack.c.bf16 %v683_v12, %v682_v9  ;;  %v4888_v21 = vld [vmem:[%s6940_s25] ss:$0 sm:$0xff]  ;;  %s6958_s13 = sld [smem:[#allocation22_spill]]  ;;  %s6960_s24 = smov 56  }
  0x2a   : > { %s6900_s0 = sshll.u32 %s6047_s30, 3  ;;  %5558 = vmatpush3.bf16.msra.mxu1 %v5557_v11  ;;  %s6943_s20 = sshll.u32 %s6047_s30, 3 }
  0x2b   : > { %s637_s27 = scalar_lea.vmem %s6937_s26, %s6900_s0  ;;  %5559 = vmatprep.subr.bf16.mxu1 %v5874_v10  ;;  %s6884_s26 = smov 72  }
  0x2c   : > { %v642_v0 = vld [vmem:[%s637_s27] sm:$0xff]  ;;  %s6896_s27 = smov 112   ;;  %s6950_s30 = smov 88  }
  0x2d   : > { %v652_v1 = vsel %vm651_vm0, %v642_v0, 0.0  ;;  %s6951_s0 = smov 96  }
  0x2e   : > { %653 = vadd.xlane.f32.xlu0 %v652_v1  ;;  %5561 = vmatpush3.bf16.msra.mxu1 %v5560_v14 }
  0x2f   : > { %5205 = vmatprep.subr.mxu1 %v5876_v13 }
  0xbb   : > { %v654_v2 = vpop.xlane.xlu0 %653 }
  0xbc   : > { %v656_v3 = vmul.f32 0.03125, %v654_v2 }
  0xbe   : > { %v657_v4 = vsub.f32 %v642_v0, %v656_v3 }
  0xc0   : > { %v658_v5 = vmul.f32 %v657_v4, %v657_v4 }
  0xc2   : > { %v659_v6 = vsel %vm651_vm0, %v658_v5, 0.0 }
  0xc3   : > { %660 = vadd.xlane.f32.xlu0 %v659_v6 }
 0x150   : > { %v661_v15 = vpop.xlane.xlu0 %660 }
 0x151   : > { %v662_v16 = vmul.f32 0.03125, %v661_v15 }
 0x153   : > { %v663_v17 = vadd.f32 1e-05, %v662_v16 }
 0x155   : > { %5732 = vrsqrt.f32 %v663_v17 }
 0x15f   : > { %v5733_v18 = vpop.eup %5732 }
 0x160   : > { %v665_v20 = vmul.f32 %v5733_v18, %v657_v4 }
 0x162   : > { %v672_v22 = vmul.f32 %v4887_v19, %v665_v20 }
 0x164   : > { %v6083_v23 = vadd.f32 %v4888_v21, %v672_v22 }
 0x166   : > { %5203 = vmatmul.mubr.msk.f32.vlgmr.msra.gmra.mrb[0].mxu1 %vm651_vm0, %v6083_v23 }
 0x167   : > { %5207 = vmatprep.mubr.msk.f32.mxu1 %vm5875_vm1, %v5876_v13 }
 0x239   : > { %v760_v25 = vpop.f32.mrb[0].mxu1 }
 0x23a   : > { %v6092_v26 = vadd.f32 %v4889_v24, %v760_v25  ;;  %v5204_v27 = vpop.f32.mrb[1].mxu1 }
 0x23c   : > { %766 = vrot.lane.b32.xlu1 %v6092_v26, %s6882_s1  ;;  %v764_v28 = vmul.f32 0.35355338, %v6092_v26  ;;  %s6894_s1 = smov 104  }
 0x23e   : > { %932 = vrot.lane.b32.xlu0 %v764_v28, %s6898_s23  ;;  %s6902_s23 = smov 24  }
 0x240   : > { %934 = vrot.lane.b32.xlu1 %v6092_v26, %s6889_s29  ;;  %s6893_s29 = smov 56  }
 0x244   : > { %1100 = vrot.lane.b32.xlu1 %v6092_v26, %s6887_s21  ;;  %s6892_s21 = smov 40  }
 0x248   : > { %1266 = vrot.lane.b32.xlu1 %v6092_v26, %s6884_s26  ;;  %s6886_s26 = smov 64  }
 0x24c   : > { %1098 = vrot.lane.b32.xlu1 %v764_v28, %s6896_s27  ;;  %s6946_s27 = smov 120  }
 0x250   : > { %1264 = vrot.lane.b32.xlu1 %v764_v28, %s6894_s1  ;;  %s6906_s1 = smov 8  }
 0x2ae   : > { %v767_v29 = vpop.permute.xlu1 %766 }
 0x2af   : > { %5206 = vmatpush3.xpose.msk.msra.mxu1 %vm768_vm2, %v767_v29 }
 0x2b0   : > { %5210 = vmatprep.subr.mxu1 %v5876_v13  ;;  %v933_v31 = vpop.permute.xlu0 %932 }
 0x2b2   : > { %v935_v30 = vpop.permute.xlu1 %934  ;;  %5208 = vmatmul.mubr.msk.f32.vlgmr.msra.gmra.mrb[2].mxu1 %vm768_vm2, %v764_v28 }
 0x2b3   : > { %5216 = vmatpush3.xpose.msk.msra.mxu0 %vm768_vm2, %v935_v30  ;;  %5212 = vmatprep.mubr.msk.f32.mxu1 %vm5875_vm1, %v5876_v13 }
 0x2b4   : > { %5225 = vmatprep.subr.mxu0 %v5876_v13 }
 0x2b6   : > { %v1101_v32 = vpop.permute.xlu1 %1100  ;;  %5218 = vmatmul.mubr.msk.f32.vlgmr.msra.gmra.mrb[0].mxu0 %vm768_vm2, %v933_v31  ;;  %v1447_v31 = vld [vmem:[%s6859_s6] sm:$0xff] }
 0x2b7   : > { %5226 = vmatpush3.xpose.msk.msra.mxu0 %vm768_vm2, %v1101_v32  ;;  %5227 = vmatprep.mubr.msk.f32.mxu0 %vm5875_vm1, %v5876_v13  ;;  %v1448_v32 = vld [vmem:[%s6859_s6 + $0x8] sm:$0xff] }
 0x2b8   : > { %5235 = vmatprep.subr.mxu0 %v5876_v13 }
 0x2ba   : > { %v1267_v33 = vpop.permute.xlu1 %1266 }
 0x2be   : > { %v1099_v34 = vpop.permute.xlu1 %1098 }
 0x2bf   : > { %5228 = vmatmul.mubr.msk.f32.vlgmr.msra.gmra.mrb[2].mxu0 %vm768_vm2, %v1099_v34 }
 0x2c0   : > { %5236 = vmatpush3.xpose.msk.msra.mxu0 %vm768_vm2, %v1267_v33  ;;  %5237 = vmatprep.mubr.msk.f32.mxu0 %vm5875_vm1, %v5876_v13  ;;  %v5563_v33 = vpack.c.bf16 %v1448_v32, %v1447_v31 }
 0x2c1   : > { %5574 = vmatprep.subr.bf16.mxu0 %v5874_v10 }
 0x2c2   : > { %v1265_v35 = vpop.permute.xlu1 %1264 }
 0x2c3   : > { %5238 = vmatmul.mubr.msk.f32.vlgmr.msra.gmra.mrb[4].mxu0 %vm768_vm2, %v1265_v35 }
 0x2c4   : > { %5275 = vmatprep.mubr.msk.f32.mxu0 %vm5875_vm1, %v5876_v13 }
 0x385   : > { %v840_v40 = vpop.f32.mrb[2].mxu1 }
 0x386   : > { %v844_v41 = vsel %vm6126_vm3, %v840_v40, -1e+30  ;;  %v5209_v42 = vpop.f32.mrb[3].mxu1 }
 0x387   : > { %v845_v43 = vsel %vm768_vm2, %v844_v41, -inf }
 0x388   : > { %846 = vmax.xlane.f32.xlu1 %v845_v43 }
 0x389   : > { %v1006_v44 = vpop.f32.mrb[0].mxu0 }
 0x38a   : > { %v1010_v45 = vsel %vm6126_vm3, %v1006_v44, -1e+30  ;;  %v5219_v46 = vpop.f32.mrb[1].mxu0 }
 0x38b   : > { %v1011_v47 = vsel %vm768_vm2, %v1010_v45, -inf }
 0x38c   : > { %1012 = vmax.xlane.f32.xlu0 %v1011_v47 }
 0x392   : > { %v1172_v48 = vpop.f32.mrb[2].mxu0 }
 0x393   : > { %v1176_v49 = vsel %vm6126_vm3, %v1172_v48, -1e+30  ;;  %v5229_v50 = vpop.f32.mrb[3].mxu0 }
 0x394   : > { %v1177_v51 = vsel %vm768_vm2, %v1176_v49, -inf }
 0x395   : > { %1178 = vmax.xlane.f32.xlu1 %v1177_v51 }
 0x396   : > { %v1338_v52 = vpop.f32.mrb[4].mxu0 }
 0x397   : > { %v1342_v53 = vsel %vm6126_vm3, %v1338_v52, -1e+30  ;;  %v5239_v54 = vpop.f32.mrb[5].mxu0 }
 0x398   : > { %v1343_v55 = vsel %vm768_vm2, %v1342_v53, -inf }
 0x399   : > { %1344 = vmax.xlane.f32.xlu0 %v1343_v55 }
 0x3a6   : > { %856 = vrot.lane.b32.xlu1 %v6092_v26, %s6886_s26  ;;  %s6891_s26 = smov 48  }
 0x415   : > { %v847_v56 = vpop.xlane.xlu1 %846 }
 0x416   : > { %v848_v57 = vsub.f32 %v844_v41, %v847_v56 }
 0x418   : > { %v849_v58 = vmul.f32 1.442695, %v848_v57 }
 0x419   : > { %v1013_v59 = vpop.xlane.xlu0 %1012 }
 0x41a   : > { %5734 = vpow2.f32 %v849_v58  ;;  %v1014_v60 = vsub.f32 %v1010_v45, %v1013_v59 }
 0x41c   : > { %v1015_v61 = vmul.f32 1.442695, %v1014_v60 }
 0x41e   : > { %5736 = vpow2.f32 %v1015_v61 }
 0x422   : > { %v1179_v62 = vpop.xlane.xlu1 %1178 }
 0x423   : > { %v1180_v63 = vsub.f32 %v1176_v49, %v1179_v62 }
 0x424   : > { %v5735_v0 = vpop.eup %5734 }
 0x425   : > { %v1181_v1 = vmul.f32 1.442695, %v1180_v63  ;;  %v851_v2 = vsel %vm768_vm2, %v5735_v0, 0.0  ;;  %v1648_v63 = vld [vmem:[%s6863_s10] sm:$0xff] }
 0x426   : > { %v1345_v3 = vpop.xlane.xlu0 %1344  ;;  %852 = vadd.xlane.f32.xlu1 %v851_v2  ;;  %v857_v4 = vpop.permute.xlu1 %856  ;;  %v1565_v2 = vld [vmem:[%s6861_s8 + $0x8] sm:$0xff] }
 0x427   : > { %5738 = vpow2.f32 %v1181_v1  ;;  %v1346_v5 = vsub.f32 %v1342_v53, %v1345_v3  ;;  %5211 = vmatpush3.msra.mxu1 %v857_v4  ;;  %v4904_v53 = vld [vmem:[%s6860_s7] ss:$0 sm:$0xff]  ;;  %v1650_v4 = vld [vmem:[%s6863_s10 + $0x10] sm:$0xff] }
 0x428   : > { %v5737_v6 = vpop.eup %5736  ;;  %5220 = vmatprep.subr.mxu1 %v5876_v13  ;;  %v1564_v1 = vld [vmem:[%s6861_s8] sm:$0xff] }
 0x429   : > { %v1347_v7 = vmul.f32 1.442695, %v1346_v5  ;;  %v1017_v8 = vsel %vm768_vm2, %v5737_v6, 0.0  ;;  %v5569_v3 = vpack.c.bf16 %v1565_v2, %v1564_v1  ;;  %v1651_v5 = vld [vmem:[%s6863_s10 + $0x18] sm:$0xff] }
 0x42a   : > { %1018 = vadd.xlane.f32.xlu0 %v1017_v8  ;;  %v1567_v8 = vld [vmem:[%s6861_s8 + $0x18] sm:$0xff] }
 0x42b   : > { %5740 = vpow2.f32 %v1347_v7  ;;  %v1566_v7 = vld [vmem:[%s6861_s8 + $0x10] sm:$0xff] }
 0x431   : > { %v5739_v9 = vpop.eup %5738 }
 0x432   : > { %v1183_v11 = vsel %vm768_vm2, %v5739_v9, 0.0 }
 0x433   : > { %1184 = vadd.xlane.f32.xlu1 %v1183_v11 }
 0x435   : > { %v5741_v12 = vpop.eup %5740 }
 0x436   : > { %v1349_v14 = vsel %vm768_vm2, %v5741_v12, 0.0 }
 0x437   : > { %1350 = vadd.xlane.f32.xlu0 %v1349_v14 }
 0x444   : > { %1188 = vrot.lane.b32.xlu1 %v6092_v26, %s6891_s26 }
 0x448   : > { %1354 = vrot.lane.b32.xlu1 %v6092_v26, %s6892_s21  ;;  %s6944_s21 = sld [smem:[#allocation15_spill]] }
 0x44d   : > { %1022 = vrot.lane.b32.xlu0 %v6092_v26, %s6893_s29  ;;  %s6904_s29 = smov 16  }
 0x44e   : > { %s641_s26 = scalar_lea.vmem %s6944_s21, %s6943_s20  ;;  %s6955_s20 = smov 8  }
 0x44f   : > { %v6230_v11 = vld [vmem:[%s641_s26] sm:$0xff]  ;;  %s6957_s21 = smov 24   ;;  %s6959_s26 = smov 64  }
 0x4b3   : > { %v853_v15 = vpop.xlane.xlu1 %852 }
 0x4b4   : > { %5742 = vrcp.f32 %v853_v15 }
 0x4b7   : > { %v1019_v16 = vpop.xlane.xlu0 %1018 }
 0x4b8   : > { %5744 = vrcp.f32 %v1019_v16 }
 0x4be   : > { %v5743_v17 = vpop.eup %5742 }
 0x4bf   : > { %v855_v18 = vmul.f32 %v5743_v17, %v5735_v0  ;;  %v4907_v17 = vld [vmem:[%s6939_s28 + $0x1] ss:$0 sm:$0xff] }
 0x4c0   : > { %v1185_v19 = vpop.xlane.xlu1 %1184 }
 0x4c1   : > { %5746 = vrcp.f32 %v1185_v19  ;;  %5213 = vmatmul.mubr.msk.f32.vlgmr.msra.gmra.mrb[4].mxu1 %vm768_vm2, %v855_v18  ;;  %v4908_v19 = vld [vmem:[%s6940_s25 + $0x1] ss:$0 sm:$0xff] }
 0x4c2   : > { %5222 = vmatprep.mubr.msk.f32.mxu1 %vm5875_vm1, %v5876_v13  ;;  %v5745_v21 = vpop.eup %5744 }
 0x4c3   : > { %v1021_v22 = vmul.f32 %v5745_v21, %v5737_v6  ;;  %v5578_v6 = vpack.c.bf16 %v1651_v5, %v1650_v4 }
 0x4c4   : > { %v1351_v20 = vpop.xlane.xlu0 %1350  ;;  %v1189_v24 = vpop.permute.xlu1 %1188 }
 0x4c5   : > { %5748 = vrcp.f32 %v1351_v20 }
 0x4c8   : > { %v1023_v25 = vpop.permute.xlu0 %1022  ;;  %v1355_v28 = vpop.permute.xlu1 %1354 }
 0x4c9   : > { %5221 = vmatpush3.msra.mxu1 %v1023_v25 }
 0x4ca   : > { %5223 = vmatmul.mubr.msk.f32.vlgmr.msra.gmra.mrb[6].mxu1 %vm768_vm2, %v1021_v22  ;;  %5230 = vmatprep.subr.mxu1 %v5876_v13  ;;  %v4911_v22 = vld [vmem:[%s6945_s11] ss:$0 sm:$0xff]  ;;  %s6962_s11 = smov 48  }
 0x4cb   : > { %v5747_v26 = vpop.eup %5746  ;;  %5231 = vmatpush3.msra.mxu1 %v1189_v24  ;;  %5232 = vmatprep.mubr.msk.f32.mxu1 %vm5875_vm1, %v5876_v13 }
 0x4cc   : > { %v1187_v27 = vmul.f32 %v5747_v26, %v5739_v9  ;;  %5240 = vmatprep.subr.mxu1 %v5876_v13  ;;  %v5572_v9 = vpack.c.bf16 %v1567_v8, %v1566_v7 }
 0x4ce   : > { %5233 = vmatmul.mubr.msk.f32.vlgmr.msra.gmra.mrb[8].mxu1 %vm768_vm2, %v1187_v27 }
 0x4cf   : > { %v5749_v29 = vpop.eup %5748  ;;  %5241 = vmatpush3.msra.mxu1 %v1355_v28  ;;  %5242 = vmatprep.mubr.msk.f32.mxu1 %vm5875_vm1, %v5876_v13  ;;  %v4909_v28 = vld [vmem:[%s6947_s9] ss:$0 sm:$0xff]  ;;  %s6966_s9 = sld [smem:[#allocation22_spill]] }
 0x4d0   : > { %v1353_v30 = vmul.f32 %v5749_v29, %v5741_v12  ;;  %5562 = vmatprep.subr.bf16.mxu1 %v5874_v10 }
 0x4d2   : > { %5243 = vmatmul.mubr.msk.f32.vlgmr.msra.gmra.mrb[10].mxu1 %vm768_vm2, %v1353_v30 }
 0x4d3   : > { %5253 = vmatprep.mubr.msk.f32.mxu1 %vm5875_vm1, %v5876_v13  ;;  %5564 = vmatpush3.bf16.msra.mxu1 %v5563_v33 }
 0x4d4   : > { %5565 = vmatprep.subr.bf16.mxu1 %v5874_v10 }
 0x4d7   : > { %5567 = vmatpush3.bf16.msra.mxu1 %v5566_v38 }
 0x4d8   : > { %5568 = vmatprep.subr.bf16.mxu1 %v5874_v10 }
 0x594   : > { %v928_v34 = vpop.f32.mrb[4].mxu1 }
 0x595   : > { %v5214_v35 = vpop.f32.mrb[5].mxu1 }
 0x59d   : > { %v1094_v40 = vpop.f32.mrb[6].mxu1 }
 0x59e   : > { %1431 = vrot.lane.b32.xlu0 %v1094_v40, %s6906_s1  ;;  %v5224_v41 = vpop.f32.mrb[7].mxu1  ;;  %s6948_s1 = smov 112  }
 0x5a1   : > { %v1260_v42 = vpop.f32.mrb[8].mxu1 }
 0x5a2   : > { %1435 = vrot.lane.b32.xlu1 %v1260_v42, %s6904_s29  ;;  %v5234_v43 = vpop.f32.mrb[9].mxu1  ;;  %s6949_s29 = smov 104  }
 0x5a5   : > { %v1426_v44 = vpop.f32.mrb[10].mxu1 }
 0x5a6   : > { %1439 = vrot.lane.b32.xlu0 %v1426_v44, %s6902_s23  ;;  %v5244_v45 = vpop.f32.mrb[11].mxu1  ;;  %s6961_s23 = smov 40  }
 0x610   : > { %v1432_v46 = vpop.permute.xlu0 %1431 }
 0x611   : > { %v1442_v48 = vsel %vm768_vm2, %v928_v34, %v1432_v46 }
 0x614   : > { %v1436_v47 = vpop.permute.xlu1 %1435 }
 0x615   : > { %v1444_v49 = vsel %vm1443_vm4, %v1442_v48, %v1436_v47 }
 0x618   : > { %v1440_v50 = vpop.permute.xlu0 %1439 }
 0x619   : > { %v1446_v51 = vsel %vm1445_vm5, %v1444_v49, %v1440_v50 }
 0x61a   : > { %5254 = vmatmul.mubr.msk.f32.vlgmr.msra.gmra.mrb[12].mxu1 %vm651_vm0, %v1446_v51 }
 0x61b   : > { %5264 = vmatprep.mubr.msk.f32.mxu1 %vm5875_vm1, %v5876_v13  ;;  %5570 = vmatpush3.bf16.msra.mxu1 %v5569_v3 }
 0x61c   : > { %5571 = vmatprep.subr.bf16.mxu1 %v5874_v10 }
 0x61f   : > { %5573 = vmatpush3.bf16.msra.mxu1 %v5572_v9 }
 0x620   : > { %5278 = vmatprep.subr.mxu1 %v5876_v13 }
 0x6ed   : > { %v1520_v52 = vpop.f32.mrb[12].mxu1 }
 0x6ee   : > { %v1524_v54 = vadd.f32 %v1520_v52, %v6083_v23  ;;  %v5255_v55 = vpop.f32.mrb[13].mxu1  ;;  %v1649_v23 = vld [vmem:[%s6863_s10 + $0x8] sm:$0xff] }
 0x6ef   : > { %v5575_v0 = vpack.c.bf16 %v1649_v23, %v1648_v63 }
 0x6f0   : > { %v1532_v56 = vadd.f32 %v4904_v53, %v1524_v54 }
 0x6f1   : > { %5576 = vmatpush3.bf16.msra.mxu0 %v5575_v0 }
 0x6f2   : > { %v1537_v57 = vsel %vm651_vm0, %v1532_v56, 0.0  ;;  %5577 = vmatprep.subr.bf16.mxu0 %v5874_v10 }
 0x6f3   : > { %1538 = vadd.xlane.f32.xlu1 %v1537_v57 }
 0x6f5   : > { %5579 = vmatpush3.bf16.msra.mxu0 %v5578_v6 }
 0x6f6   : > { %5288 = vmatprep.subr.mxu0 %v5876_v13 }
 0x6f8   : > { %5276 = vmatmul.mubr.msk.f32.vlgmr.msra.gmra.mrb[6].mxu0 %vm651_vm0, %v6230_v11 }
 0x6f9   : > { %5290 = vmatprep.mubr.msk.f32.mxu0 %vm5875_vm1, %v5876_v13 }
 0x780   : > { %v1539_v58 = vpop.xlane.xlu1 %1538 }
 0x781   : > { %v1540_v59 = vmul.f32 0.03125, %v1539_v58 }
 0x783   : > { %v1541_v60 = vsub.f32 %v1532_v56, %v1540_v59 }
 0x785   : > { %v1542_v61 = vmul.f32 %v1541_v60, %v1541_v60 }
 0x787   : > { %v1543_v62 = vsel %vm651_vm0, %v1542_v61, 0.0 }
 0x788   : > { %1544 = vadd.xlane.f32.xlu0 %v1543_v62 }
 0x7cb   : > { %v1728_v24 = vpop.f32.mrb[6].mxu0 }
 0x7cc   : > { %v6253_v25 = vadd.f32 %v4911_v22, %v1728_v24  ;;  %v5277_v26 = vpop.f32.mrb[7].mxu0 }
 0x7ce   : > { %1898 = vrot.lane.b32.xlu0 %v6253_v25, %s6946_s27 }
 0x815   : > { %v1545_v12 = vpop.xlane.xlu0 %1544 }
 0x816   : > { %v1546_v14 = vmul.f32 0.03125, %v1545_v12 }
 0x818   : > { %v1547_v15 = vadd.f32 1e-05, %v1546_v14 }
 0x81a   : > { %5750 = vrsqrt.f32 %v1547_v15 }
 0x824   : > { %v5751_v16 = vpop.eup %5750 }
 0x825   : > { %v1549_v18 = vmul.f32 %v5751_v16, %v1541_v60 }
 0x827   : > { %v1556_v20 = vmul.f32 %v4907_v17, %v1549_v18 }
 0x829   : > { %v6244_v21 = vadd.f32 %v4908_v19, %v1556_v20 }
 0x82b   : > { %5265 = vmatmul.mubr.msk.f32.vlgmr.msra.gmra.mrb[14].mxu1 %vm651_vm0, %v6244_v21 }
 0x82c   : > { %5280 = vmatprep.mubr.msk.f32.mxu1 %vm5875_vm1, %v5876_v13  ;;  %5279 = vmatpush3.xpose.msk.msra.mxu1 %vm768_vm2, %v6253_v25 }
 0x82d   : > { %5283 = vmatprep.subr.mxu1 %v5876_v13 }
 0x840   : > { %v1899_v27 = vpop.permute.xlu0 %1898 }
 0x841   : > { %5289 = vmatpush3.xpose.msk.msra.mxu0 %vm768_vm2, %v1899_v27 }
 0x842   : > { %5298 = vmatprep.subr.mxu0 %v5876_v13 }
 0x8fe   : > { %v1644_v29 = vpop.f32.mrb[14].mxu1 }
 0x8ff   : > { %v1645_v30 = vadd.f32 %v4909_v28, %v1644_v29  ;;  %v5266_v31 = vpop.f32.mrb[15].mxu1  ;;  %v2406_v29 = vld [vmem:[%s6954_s12] sm:$0xff] }
 0x901   : > { %v1732_v32 = vmul.f32 0.35355338, %v1645_v30  ;;  %v2407_v30 = vld [vmem:[%s6954_s12 + $0x8] sm:$0xff] }
 0x902   : > { %v5581_v31 = vpack.c.bf16 %v2407_v30, %v2406_v29  ;;  %v4929_v29 = vld [vmem:[%s6939_s28 + $0x2] ss:$0 sm:$0xff] }
 0x903   : > { %2061 = vrot.lane.b32.xlu0 %v1732_v32, %s6948_s1  ;;  %1896 = vrot.lane.b32.xlu1 %v1732_v32, %s6946_s27 }
 0x904   : > { %5281 = vmatmul.mubr.msk.f32.vlgmr.msra.gmra.mrb[16].mxu1 %vm768_vm2, %v1732_v32 }
 0x905   : > { %5285 = vmatprep.mubr.msk.f32.mxu1 %vm5875_vm1, %v5876_v13 }
 0x907   : > { %2226 = vrot.lane.b32.xlu0 %v1732_v32, %s6949_s29  ;;  %2063 = vrot.lane.b32.xlu1 %v6253_v25, %s6948_s1  ;;  %v2408_v32 = vld [vmem:[%s6954_s12 + $0x10] sm:$0xff] }
 0x90b   : > { %2228 = vrot.lane.b32.xlu1 %v6253_v25, %s6949_s29 }
 0x975   : > { %v1897_v33 = vpop.permute.xlu1 %1896  ;;  %v2062_v35 = vpop.permute.xlu0 %2061 }
 0x976   : > { %5291 = vmatmul.mubr.msk.f32.vlgmr.msra.gmra.mrb[8].mxu0 %vm768_vm2, %v1897_v33  ;;  %v2409_v33 = vld [vmem:[%s6954_s12 + $0x18] sm:$0xff]  ;;  %s6971_s12 = sld [smem:[#allocation24_spill]] }
 0x977   : > { %5300 = vmatprep.mubr.msk.f32.mxu0 %vm5875_vm1, %v5876_v13 }
 0x979   : > { %v2064_v34 = vpop.permute.xlu1 %2063  ;;  %v2227_v37 = vpop.permute.xlu0 %2226 }
 0x97a   : > { %5299 = vmatpush3.xpose.msk.msra.mxu0 %vm768_vm2, %v2064_v34  ;;  %v5584_v34 = vpack.c.bf16 %v2409_v33, %v2408_v32 }
 0x97b   : > { %5308 = vmatprep.subr.mxu0 %v5876_v13 }
 0x97d   : > { %5301 = vmatmul.mubr.msk.f32.vlgmr.msra.gmra.mrb[10].mxu0 %vm768_vm2, %v2062_v35  ;;  %v2229_v36 = vpop.permute.xlu1 %2228 }
 0x97e   : > { %5309 = vmatpush3.xpose.msk.msra.mxu0 %vm768_vm2, %v2229_v36  ;;  %5310 = vmatprep.mubr.msk.f32.mxu0 %vm5875_vm1, %v5876_v13 }
 0x97f   : > { %5580 = vmatprep.subr.bf16.mxu0 %v5874_v10 }
 0x981   : > { %5311 = vmatmul.mubr.msk.f32.vlgmr.msra.gmra.mrb[12].mxu0 %vm768_vm2, %v2227_v37 }
 0x982   : > { %5326 = vmatprep.mubr.msk.f32.mxu0 %vm5875_vm1, %v5876_v13  ;;  %5582 = vmatpush3.bf16.msra.mxu0 %v5581_v31  ;;  %v4930_v31 = vld [vmem:[%s6940_s25 + $0x2] ss:$0 sm:$0xff] }
 0x983   : > { %5583 = vmatprep.subr.bf16.mxu0 %v5874_v10 }
 0x986   : > { %5585 = vmatpush3.bf16.msra.mxu0 %v5584_v34  ;;  %v2622_v34 = vld [vmem:[%s6869_s16 + $0x70] sm:$0xff] }
 0x987   : > { %5592 = vmatprep.subr.bf16.mxu0 %v5874_v10 }
 0x9d7   : > { %v1805_v38 = vpop.f32.mrb[16].mxu1 }
 0x9d8   : > { %v5282_v40 = vpop.f32.mrb[17].mxu1  ;;  %v1809_v41 = vsel %vm768_vm2, %v1805_v38, -inf }
 0x9d9   : > { %1810 = vmax.xlane.f32.xlu1 %v1809_v41 }
 0xa49   : > { %v1970_v42 = vpop.f32.mrb[8].mxu0 }
 0xa4a   : > { %v5292_v43 = vpop.f32.mrb[9].mxu0  ;;  %v1974_v44 = vsel %vm768_vm2, %v1970_v42, -inf }
 0xa4b   : > { %1975 = vmax.xlane.f32.xlu0 %v1974_v44 }
 0xa50   : > { %v2135_v45 = vpop.f32.mrb[10].mxu0 }
 0xa51   : > { %v5302_v46 = vpop.f32.mrb[11].mxu0  ;;  %v2139_v47 = vsel %vm768_vm2, %v2135_v45, -inf }
 0xa52   : > { %2140 = vmax.xlane.f32.xlu0 %v2139_v47 }
 0xa54   : > { %v2300_v48 = vpop.f32.mrb[12].mxu0 }
 0xa55   : > { %v5312_v49 = vpop.f32.mrb[13].mxu0  ;;  %v2304_v50 = vsel %vm768_vm2, %v2300_v48, -inf }
 0xa56   : > { %2305 = vmax.xlane.f32.xlu1 %v2304_v50  ;;  %v4926_v49 = vld [vmem:[%s6958_s13] ss:$0 sm:$0xff] }
 0xa66   : > { %v1811_v51 = vpop.xlane.xlu1 %1810 }
 0xa67   : > { %v1812_v52 = vsub.f32 %v1805_v38, %v1811_v51  ;;  %1985 = vrot.lane.b32.xlu1 %v6253_v25, %s6950_s30 }
 0xa69   : > { %v1813_v53 = vmul.f32 1.442695, %v1812_v52 }
 0xa6b   : > { %5752 = vpow2.f32 %v1813_v53 }
 0xa75   : > { %v5753_v54 = vpop.eup %5752 }
 0xa76   : > { %v1815_v55 = vsel %vm768_vm2, %v5753_v54, 0.0 }
 0xa77   : > { %1816 = vadd.xlane.f32.xlu0 %v1815_v55 }
 0xa8d   : > { %1820 = vrot.lane.b32.xlu0 %v6253_v25, %s6951_s0 }
 0xad8   : > { %v1976_v56 = vpop.xlane.xlu0 %1975 }
 0xad9   : > { %v1977_v57 = vsub.f32 %v1970_v42, %v1976_v56 }
 0xadb   : > { %v1978_v58 = vmul.f32 1.442695, %v1977_v57 }
 0xadd   : > { %5754 = vpow2.f32 %v1978_v58 }
 0xadf   : > { %v2141_v59 = vpop.xlane.xlu0 %2140 }
 0xae0   : > { %v2142_v60 = vsub.f32 %v2135_v45, %v2141_v59  ;;  %v2523_v59 = vld [vmem:[%s6867_s14] sm:$0xff] }
 0xae2   : > { %v2143_v61 = vmul.f32 1.442695, %v2142_v60 }
 0xae3   : > { %v2306_v62 = vpop.xlane.xlu1 %2305 }
 0xae4   : > { %5756 = vpow2.f32 %v2143_v61  ;;  %v2307_v63 = vsub.f32 %v2300_v48, %v2306_v62  ;;  %v2525_v61 = vld [vmem:[%s6867_s14 + $0x10] sm:$0xff]  ;;  %v2526_v62 = vld [vmem:[%s6867_s14 + $0x18] sm:$0xff] }
 0xae6   : > { %v2308_v23 = vmul.f32 1.442695, %v2307_v63  ;;  %v5590_v63 = vpack.c.bf16 %v2526_v62, %v2525_v61 }
 0xae7   : > { %v5755_v0 = vpop.eup %5754  ;;  %v1986_v12 = vpop.permute.xlu1 %1985 }
 0xae8   : > { %5758 = vpow2.f32 %v2308_v23  ;;  %v1980_v1 = vsel %vm768_vm2, %v5755_v0, 0.0  ;;  %v2608_v23 = vld [vmem:[%s6869_s16] sm:$0xff] }
 0xae9   : > { %1981 = vadd.xlane.f32.xlu1 %v1980_v1  ;;  %v2610_v1 = vld [vmem:[%s6869_s16 + $0x10] sm:$0xff] }
 0xaee   : > { %v5757_v2 = vpop.eup %5756 }
 0xaef   : > { %v2145_v3 = vsel %vm768_vm2, %v5757_v2, 0.0 }
 0xaf0   : > { %2146 = vadd.xlane.f32.xlu0 %v2145_v3  ;;  %v2611_v3 = vld [vmem:[%s6869_s16 + $0x18] sm:$0xff] }
 0xaf2   : > { %v5759_v4 = vpop.eup %5758 }
 0xaf3   : > { %v2310_v5 = vsel %vm768_vm2, %v5759_v4, 0.0 }
 0xaf4   : > { %2311 = vadd.xlane.f32.xlu1 %v2310_v5  ;;  %v2612_v5 = vld [vmem:[%s6869_s16 + $0x20] sm:$0xff] }
 0xb04   : > { %v1817_v6 = vpop.xlane.xlu0 %1816 }
 0xb05   : > { %5760 = vrcp.f32 %v1817_v6  ;;  %2150 = vrot.lane.b32.xlu1 %v6253_v25, %s6952_s18  ;;  %v2613_v6 = vld [vmem:[%s6869_s16 + $0x28] sm:$0xff] }
 0xb06   : > { %2315 = vrot.lane.b32.xlu0 %v6253_v25, %s6953_s19 }
 0xb08   : > { %v1821_v7 = vpop.permute.xlu0 %1820 }
 0xb09   : > { %5284 = vmatpush3.msra.mxu1 %v1821_v7  ;;  %v5599_v7 = vpack.c.bf16 %v2613_v6, %v2612_v5 }
 0xb0a   : > { %5293 = vmatprep.subr.mxu1 %v5876_v13 }
 0xb0f   : > { %v5761_v8 = vpop.eup %5760 }
 0xb10   : > { %v1819_v9 = vmul.f32 %v5761_v8, %v5753_v54  ;;  %v2614_v8 = vld [vmem:[%s6869_s16 + $0x30] sm:$0xff] }
 0xb12   : > { %5286 = vmatmul.mubr.msk.f32.vlgmr.msra.gmra.mrb[18].mxu1 %vm768_vm2, %v1819_v9  ;;  %v2615_v9 = vld [vmem:[%s6869_s16 + $0x38] sm:$0xff] }
 0xb13   : > { %5294 = vmatpush3.msra.mxu1 %v1986_v12  ;;  %5295 = vmatprep.mubr.msk.f32.mxu1 %vm5875_vm1, %v5876_v13  ;;  %v5602_v12 = vpack.c.bf16 %v2615_v9, %v2614_v8 }
 0xb14   : > { %5303 = vmatprep.subr.mxu1 %v5876_v13 }
 0xb76   : > { %v1982_v14 = vpop.xlane.xlu1 %1981 }
 0xb77   : > { %5762 = vrcp.f32 %v1982_v14  ;;  %v2616_v14 = vld [vmem:[%s6869_s16 + $0x40] sm:$0xff] }
 0xb7d   : > { %v2147_v15 = vpop.xlane.xlu0 %2146 }
 0xb7e   : > { %5764 = vrcp.f32 %v2147_v15  ;;  %v2617_v15 = vld [vmem:[%s6869_s16 + $0x48] sm:$0xff] }
 0xb81   : > { %v5763_v16 = vpop.eup %5762  ;;  %v2312_v17 = vpop.xlane.xlu1 %2311 }
 0xb82   : > { %v1984_v18 = vmul.f32 %v5763_v16, %v5755_v0  ;;  %5766 = vrcp.f32 %v2312_v17  ;;  %v2316_v24 = vpop.permute.xlu0 %2315  ;;  %v2609_v0 = vld [vmem:[%s6869_s16 + $0x8] sm:$0xff]  ;;  %v5605_v16 = vpack.c.bf16 %v2617_v15, %v2616_v14  ;;  %v2618_v17 = vld [vmem:[%s6869_s16 + $0x50] sm:$0xff] }
 0xb84   : > { %5296 = vmatmul.mubr.msk.f32.vlgmr.msra.gmra.mrb[20].mxu1 %vm768_vm2, %v1984_v18  ;;  %v2619_v18 = vld [vmem:[%s6869_s16 + $0x58] sm:$0xff] }
 0xb85   : > { %v2151_v19 = vpop.permute.xlu1 %2150  ;;  %5305 = vmatprep.mubr.msk.f32.mxu1 %vm5875_vm1, %v5876_v13 }
 0xb86   : > { %5304 = vmatpush3.msra.mxu1 %v2151_v19  ;;  %v5608_v19 = vpack.c.bf16 %v2619_v18, %v2618_v17 }
 0xb87   : > { %5313 = vmatprep.subr.mxu1 %v5876_v13 }
 0xb88   : > { %v5765_v20 = vpop.eup %5764 }
 0xb89   : > { %v2149_v22 = vmul.f32 %v5765_v20, %v5757_v2  ;;  %v5593_v2 = vpack.c.bf16 %v2609_v0, %v2608_v23  ;;  %v2620_v20 = vld [vmem:[%s6869_s16 + $0x60] sm:$0xff] }
 0xb8a   : > { %v4937_v0 = vld [vmem:[%s6940_s25 + $0x3] ss:$0 sm:$0xff] }
 0xb8b   : > { %5306 = vmatmul.mubr.msk.f32.vlgmr.msra.gmra.mrb[22].mxu1 %vm768_vm2, %v2149_v22  ;;  %v2621_v22 = vld [vmem:[%s6869_s16 + $0x68] sm:$0xff] }
 0xb8c   : > { %v5767_v25 = vpop.eup %5766  ;;  %5314 = vmatpush3.msra.mxu1 %v2316_v24  ;;  %5315 = vmatprep.mubr.msk.f32.mxu1 %vm5875_vm1, %v5876_v13  ;;  %v5611_v24 = vpack.c.bf16 %v2621_v22, %v2620_v20 }
 0xb8d   : > { %v2314_v26 = vmul.f32 %v5767_v25, %v5759_v4  ;;  %5586 = vmatprep.subr.bf16.mxu1 %v5874_v10  ;;  %v5596_v4 = vpack.c.bf16 %v2611_v3, %v2610_v1  ;;  %v4943_v3 = vld [vmem:[%s6858_s5 + $0x1] ss:$0 sm:$0xff] }
 0xb8f   : > { %5316 = vmatmul.mubr.msk.f32.vlgmr.msra.gmra.mrb[24].mxu1 %vm768_vm2, %v2314_v26 }
 0xb90   : > { %5337 = vmatprep.mubr.msk.f32.mxu1 %vm5875_vm1, %v5876_v13 }
 0xbe5   : > { %v1892_v27 = vpop.f32.mrb[18].mxu1 }
 0xbe6   : > { %v5287_v28 = vpop.f32.mrb[19].mxu1 }
 0xc57   : > { %v2057_v35 = vpop.f32.mrb[20].mxu1 }
 0xc58   : > { %2392 = vrot.lane.b32.xlu1 %v2057_v35, %s6955_s20  ;;  %v5297_v36 = vpop.f32.mrb[21].mxu1  ;;  %v2623_v35 = vld [vmem:[%s6869_s16 + $0x78] sm:$0xff] }
 0xc59   : > { %v5614_v36 = vpack.c.bf16 %v2623_v35, %v2622_v34 }
 0xc5e   : > { %v2222_v37 = vpop.f32.mrb[22].mxu1 }
 0xc5f   : > { %2396 = vrot.lane.b32.xlu0 %v2222_v37, %s6956_s4  ;;  %v5307_v38 = vpop.f32.mrb[23].mxu1  ;;  %v4931_v37 = vld [vmem:[%s6868_s15] ss:$0 sm:$0xff] }
 0xc62   : > { %v2387_v40 = vpop.f32.mrb[24].mxu1 }
 0xc63   : > { %2400 = vrot.lane.b32.xlu1 %v2387_v40, %s6957_s21  ;;  %v5317_v41 = vpop.f32.mrb[25].mxu1 }
 0xcca   : > { %v2393_v42 = vpop.permute.xlu1 %2392 }
 0xccb   : > { %v2403_v44 = vsel %vm768_vm2, %v1892_v27, %v2393_v42 }
 0xcd1   : > { %v2397_v43 = vpop.permute.xlu0 %2396 }
 0xcd2   : > { %v2404_v45 = vsel %vm1443_vm4, %v2403_v44, %v2397_v43  ;;  %v4933_v44 = vld [vmem:[%s6870_s17] ss:$0 sm:$0xff] }
 0xcd5   : > { %v2401_v46 = vpop.permute.xlu1 %2400 }
 0xcd6   : > { %v2405_v47 = vsel %vm1445_vm5, %v2404_v45, %v2401_v46 }
 0xcd7   : > { %5327 = vmatmul.mubr.msk.f32.vlgmr.msra.gmra.mrb[14].mxu0 %vm651_vm0, %v2405_v47 }
 0xcd8   : > { %5372 = vmatprep.mubr.msk.f32.mxu0 %vm5875_vm1, %v5876_v13  ;;  %5594 = vmatpush3.bf16.msra.mxu0 %v5593_v2 }
 0xcd9   : > { %5595 = vmatprep.subr.bf16.mxu0 %v5874_v10 }
 0xcdc   : > { %5597 = vmatpush3.bf16.msra.mxu0 %v5596_v4 }
 0xcdd   : > { %5598 = vmatprep.subr.bf16.mxu0 %v5874_v10 }
 0xce0   : > { %5600 = vmatpush3.bf16.msra.mxu0 %v5599_v7 }
 0xce1   : > { %5601 = vmatprep.subr.bf16.mxu0 %v5874_v10 }
 0xce4   : > { %5603 = vmatpush3.bf16.msra.mxu0 %v5602_v12 }
 0xce5   : > { %5604 = vmatprep.subr.bf16.mxu0 %v5874_v10 }
 0xce8   : > { %5606 = vmatpush3.bf16.msra.mxu0 %v5605_v16 }
 0xce9   : > { %5607 = vmatprep.subr.bf16.mxu0 %v5874_v10 }
 0xcec   : > { %5609 = vmatpush3.bf16.msra.mxu0 %v5608_v19 }
 0xced   : > { %5610 = vmatprep.subr.bf16.mxu0 %v5874_v10 }
 0xcf0   : > { %5612 = vmatpush3.bf16.msra.mxu0 %v5611_v24 }
 0xcf1   : > { %5613 = vmatprep.subr.bf16.mxu0 %v5874_v10 }
 0xcf4   : > { %5615 = vmatpush3.bf16.msra.mxu0 %v5614_v36 }
 0xcf5   : > { %5416 = vmatprep.subr.mxu0 %v5876_v13 }
 0xdaa   : > { %v2479_v48 = vpop.f32.mrb[14].mxu0 }
 0xdab   : > { %v2483_v50 = vadd.f32 %v2479_v48, %v6244_v21  ;;  %v5328_v51 = vpop.f32.mrb[15].mxu0  ;;  %v2524_v21 = vld [vmem:[%s6867_s14 + $0x8] sm:$0xff] }
 0xdac   : > { %v5587_v60 = vpack.c.bf16 %v2524_v21, %v2523_v59 }
 0xdad   : > { %v2491_v52 = vadd.f32 %v4926_v49, %v2483_v50 }
 0xdae   : > { %5588 = vmatpush3.bf16.msra.mxu1 %v5587_v60 }
 0xdaf   : > { %v2496_v53 = vsel %vm651_vm0, %v2491_v52, 0.0  ;;  %5589 = vmatprep.subr.bf16.mxu1 %v5874_v10 }
 0xdb0   : > { %2497 = vadd.xlane.f32.xlu0 %v2496_v53 }
 0xdb2   : > { %5591 = vmatpush3.bf16.msra.mxu1 %v5590_v63  ;;  %v4936_v63 = vld [vmem:[%s6939_s28 + $0x3] ss:$0 sm:$0xff] }
 0xdb3   : > { %5616 = vmatprep.subr.bf16.mxu1 %v5874_v10 }
 0xe3d   : > { %v2498_v54 = vpop.xlane.xlu0 %2497 }
 0xe3e   : > { %v2499_v55 = vmul.f32 0.03125, %v2498_v54  ;;  %v4938_v54 = vld [vmem:[%s6938_s3 + $0x20] sm:$0xff] }
 0xe40   : > { %v2500_v56 = vsub.f32 %v2491_v52, %v2499_v55  ;;  %v4939_v55 = vld [vmem:[%s6938_s3 + $0x28] sm:$0xff] }
 0xe42   : > { %v2501_v57 = vmul.f32 %v2500_v56, %v2500_v56 }
 0xe44   : > { %v2502_v58 = vsel %vm651_vm0, %v2501_v57, 0.0  ;;  %v4940_v57 = vld [vmem:[%s6938_s3 + $0x30] sm:$0xff] }
 0xe45   : > { %2503 = vadd.xlane.f32.xlu1 %v2502_v58  ;;  %v4941_v58 = vld [vmem:[%s6938_s3 + $0x38] sm:$0xff] }
 0xe46   : > { %v5620_v59 = vpack.c.bf16 %v4941_v58, %v4940_v57 }
 0xed2   : > { %v2504_v25 = vpop.xlane.xlu1 %2503 }
 0xed3   : > { %v2505_v26 = vmul.f32 0.03125, %v2504_v25 }
 0xed5   : > { %v2506_v27 = vadd.f32 1e-05, %v2505_v26 }
 0xed7   : > { %5768 = vrsqrt.f32 %v2506_v27 }
 0xee1   : > { %v5769_v28 = vpop.eup %5768 }
 0xee2   : > { %v2508_v30 = vmul.f32 %v5769_v28, %v2500_v56  ;;  %v5617_v56 = vpack.c.bf16 %v4939_v55, %v4938_v54 }
 0xee4   : > { %v2515_v32 = vmul.f32 %v4929_v29, %v2508_v30 }
 0xee6   : > { %v2522_v33 = vadd.f32 %v4930_v31, %v2515_v32 }
 0xee8   : > { %5338 = vmatmul.mubr.msk.f32.vlgmr.msra.gmra.mrb[26].mxu1 %vm651_vm0, %v2522_v33 }
 0xee9   : > { %5383 = vmatprep.mubr.msk.f32.mxu1 %vm5875_vm1, %v5876_v13  ;;  %5618 = vmatpush3.bf16.msra.mxu1 %v5617_v56 }
 0xeea   : > { %5619 = vmatprep.subr.bf16.mxu1 %v5874_v10 }
 0xeed   : > { %5621 = vmatpush3.bf16.msra.mxu1 %v5620_v59 }
 0xeee   : > { %5386 = vmatprep.subr.mxu1 %v5876_v13 }
 0xfbb   : > { %v2603_v38 = vpop.f32.mrb[26].mxu1 }
 0xfbc   : > { %v2604_v40 = vadd.f32 %v4931_v37, %v2603_v38  ;;  %v5339_v41 = vpop.f32.mrb[27].mxu1 }
 0xfbe   : > { %v2607_v42 = vmax.f32 %v2604_v40, 0.0 }
 0xfc0   : > { %5373 = vmatmul.mubr.f32.vlgmr.msra.gmra.mrb[16].mxu0 %v2607_v42 }
 0xfc1   : > { %5418 = vmatprep.mubr.msk.f32.mxu0 %vm5875_vm1, %v5876_v13 }
0x1093   : > { %v2690_v43 = vpop.f32.mrb[16].mxu0 }
0x1094   : > { %v2694_v45 = vadd.f32 %v2690_v43, %v2522_v33  ;;  %v5374_v46 = vpop.f32.mrb[17].mxu0 }
0x1096   : > { %v2702_v47 = vadd.f32 %v4933_v44, %v2694_v45 }
0x1098   : > { %v2707_v48 = vsel %vm651_vm0, %v2702_v47, 0.0 }
0x1099   : > { %2708 = vadd.xlane.f32.xlu0 %v2707_v48 }
0x1126   : > { %v2709_v49 = vpop.xlane.xlu0 %2708 }
0x1127   : > { %v2710_v50 = vmul.f32 0.03125, %v2709_v49 }
0x1129   : > { %v2711_v51 = vsub.f32 %v2702_v47, %v2710_v50 }
0x112b   : > { %v2712_v52 = vmul.f32 %v2711_v51, %v2711_v51 }
0x112d   : > { %v2713_v53 = vsel %vm651_vm0, %v2712_v52, 0.0 }
0x112e   : > { %2714 = vadd.xlane.f32.xlu0 %v2713_v53 }
0x11bb   : > { %v2715_v21 = vpop.xlane.xlu0 %2714 }
0x11bc   : > { %v2716_v60 = vmul.f32 0.03125, %v2715_v21 }
0x11be   : > { %v2717_v61 = vadd.f32 1e-05, %v2716_v60 }
0x11c0   : > { %5770 = vrsqrt.f32 %v2717_v61 }
0x11ca   : > { %v5771_v62 = vpop.eup %5770 }
0x11cb   : > { %v2719_v23 = vmul.f32 %v5771_v62, %v2711_v51 }
0x11cd   : > { %v2726_v1 = vmul.f32 %v4936_v63, %v2719_v23 }
0x11cf   : > { %v6458_v2 = vadd.f32 %v4937_v0, %v2726_v1 }
0x11d1   : > { %5384 = vmatmul.mubr.msk.f32.vlgmr.msra.gmra.mrb[28].mxu1 %vm651_vm0, %v6458_v2 }
0x11d2   : > { %5388 = vmatprep.mubr.msk.f32.mxu1 %vm5875_vm1, %v5876_v13 }
0x12a4   : > { %v2816_v4 = vpop.f32.mrb[28].mxu1 }
0x12a5   : > { %v6467_v5 = vadd.f32 %v4943_v3, %v2816_v4  ;;  %v5385_v6 = vpop.f32.mrb[29].mxu1 }
0x12a7   : > { %2822 = vrot.lane.b32.xlu1 %v6467_v5, %s6951_s0  ;;  %v2820_v7 = vmul.f32 0.35355338, %v6467_v5 }
0x12ab   : > { %2989 = vrot.lane.b32.xlu1 %v6467_v5, %s6950_s30 }
0x12af   : > { %2987 = vrot.lane.b32.xlu1 %v2820_v7, %s6946_s27 }
0x1319   : > { %v2823_v8 = vpop.permute.xlu1 %2822 }
0x131a   : > { %5387 = vmatpush3.xpose.msk.msra.mxu1 %vm768_vm2, %v2823_v8 }
0x131b   : > { %5391 = vmatprep.subr.mxu1 %v5876_v13 }
0x131d   : > { %5389 = vmatmul.mubr.msk.f32.vlgmr.msra.gmra.mrb[30].mxu1 %vm768_vm2, %v2820_v7  ;;  %v2990_v26 = vpop.permute.xlu1 %2989 }
0x131e   : > { %5393 = vmatprep.mubr.msk.f32.mxu1 %vm5875_vm1, %v5876_v13 }
0x1321   : > { %v2988_v28 = vpop.permute.xlu1 %2987 }
0x13f0   : > { %v2895_v9 = vpop.f32.mrb[30].mxu1 }
0x13f1   : > { %v2899_v12 = vsel %vm6126_vm3, %v2895_v9, -1e+30  ;;  %v5390_v14 = vpop.f32.mrb[31].mxu1 }
0x13f2   : > { %v2900_v15 = vsel %vm768_vm2, %v2899_v12, -inf }
0x13f3   : > { %2901 = vmax.xlane.f32.xlu0 %v2900_v15  ;;  %v4958_v15 = vld [vmem:[%s6859_s6 + $0x28] sm:$0xff] }
0x1480   : > { %v2902_v16 = vpop.xlane.xlu0 %2901 }
0x1481   : > { %v2903_v17 = vsub.f32 %v2899_v12, %v2902_v16 }
0x1483   : > { %v2904_v18 = vmul.f32 1.442695, %v2903_v17  ;;  %v4959_v17 = vld [vmem:[%s6859_s6 + $0x30] sm:$0xff] }
0x1485   : > { %5772 = vpow2.f32 %v2904_v18  ;;  %v4960_v18 = vld [vmem:[%s6859_s6 + $0x38] sm:$0xff] }
0x148f   : > { %v5773_v19 = vpop.eup %5772 }
0x1490   : > { %v2906_v20 = vsel %vm768_vm2, %v5773_v19, 0.0 }
0x1491   : > { %2907 = vadd.xlane.f32.xlu0 %v2906_v20 }
0x14a7   : > { %2911 = vrot.lane.b32.xlu0 %v6467_v5, %s6959_s26  ;;  %s6963_s26 = sld [smem:[#allocation20_spill]] }
0x151e   : > { %v2908_v22 = vpop.xlane.xlu0 %2907 }
0x151f   : > { %5774 = vrcp.f32 %v2908_v22 }
0x1522   : > { %v2912_v24 = vpop.permute.xlu0 %2911 }
0x1523   : > { %5392 = vmatpush3.msra.mxu1 %v2912_v24 }
0x1524   : > { %5396 = vmatprep.subr.mxu1 %v5876_v13 }
0x1529   : > { %v5775_v25 = vpop.eup %5774 }
0x152a   : > { %v2910_v27 = vmul.f32 %v5775_v25, %v5773_v19  ;;  %v5626_v19 = vpack.c.bf16 %v4960_v18, %v4959_v17 }
0x152c   : > { %5394 = vmatmul.mubr.msk.f32.vlgmr.msra.gmra.mrb[32].mxu1 %vm768_vm2, %v2910_v27 }
0x152d   : > { %5397 = vmatpush3.xpose.msk.msra.mxu1 %vm768_vm2, %v2990_v26  ;;  %5398 = vmatprep.mubr.msk.f32.mxu1 %vm5875_vm1, %v5876_v13 }
0x152e   : > { %5401 = vmatprep.subr.mxu1 %v5876_v13 }
0x1530   : > { %5399 = vmatmul.mubr.msk.f32.vlgmr.msra.gmra.mrb[34].mxu1 %vm768_vm2, %v2988_v28 }
0x1531   : > { %5403 = vmatprep.mubr.msk.f32.mxu1 %vm5875_vm1, %v5876_v13 }
0x15ff   : > { %v6495_v29 = vpop.f32.mrb[32].mxu1 }
0x1600   : > { %v5395_v30 = vpop.f32.mrb[33].mxu1 }
0x1603   : > { %v3061_v31 = vpop.f32.mrb[34].mxu1 }
0x1604   : > { %v3065_v32 = vsel %vm6126_vm3, %v3061_v31, -1e+30  ;;  %v5400_v33 = vpop.f32.mrb[35].mxu1 }
0x1605   : > { %v3066_v34 = vsel %vm768_vm2, %v3065_v32, -inf }
0x1606   : > { %3067 = vmax.xlane.f32.xlu1 %v3066_v34  ;;  %v4963_v34 = vld [vmem:[%s6860_s7 + $0x1] ss:$0 sm:$0xff] }
0x1617   : > { %3077 = vrot.lane.b32.xlu1 %v6467_v5, %s6960_s24 }
0x161b   : > { %3153 = vrot.lane.b32.xlu1 %v2820_v7, %s6948_s1 }
0x161f   : > { %3321 = vrot.lane.b32.xlu1 %v6467_v5, %s6953_s19 }
0x1693   : > { %v3068_v35 = vpop.xlane.xlu1 %3067 }
0x1694   : > { %v3069_v36 = vsub.f32 %v3065_v32, %v3068_v35 }
0x1696   : > { %v3070_v37 = vmul.f32 1.442695, %v3069_v36 }
0x1697   : > { %v3078_v38 = vpop.permute.xlu1 %3077 }
0x1698   : > { %5776 = vpow2.f32 %v3070_v37  ;;  %5402 = vmatpush3.msra.mxu1 %v3078_v38 }
0x1699   : > { %5406 = vmatprep.subr.mxu1 %v5876_v13 }
0x169b   : > { %v3154_v40 = vpop.permute.xlu1 %3153 }
0x169f   : > { %v3322_v41 = vpop.permute.xlu1 %3321 }
0x16a0   : > { %5417 = vmatpush3.xpose.msk.msra.mxu0 %vm768_vm2, %v3322_v41 }
0x16a1   : > { %5622 = vmatprep.subr.bf16.mxu0 %v5874_v10 }
0x16a2   : > { %v5777_v42 = vpop.eup %5776 }
0x16a3   : > { %v3072_v43 = vsel %vm768_vm2, %v5777_v42, 0.0 }
0x16a4   : > { %3073 = vadd.xlane.f32.xlu0 %v3072_v43 }
0x16ba   : > { %3155 = vrot.lane.b32.xlu0 %v6467_v5, %s6952_s18 }
0x16be   : > { %3319 = vrot.lane.b32.xlu0 %v2820_v7, %s6949_s29 }
0x1731   : > { %v3074_v44 = vpop.xlane.xlu0 %3073 }
0x1732   : > { %5778 = vrcp.f32 %v3074_v44  ;;  %v4975_v44 = vld [vmem:[%s6863_s10 + $0x20] sm:$0xff] }
0x1735   : > { %v3156_v45 = vpop.permute.xlu0 %3155 }
0x1739   : > { %v3320_v46 = vpop.permute.xlu0 %3319 }
0x173a   : > { %5419 = vmatmul.mubr.msk.f32.vlgmr.msra.gmra.mrb[18].mxu0 %vm768_vm2, %v3320_v46  ;;  %v4977_v46 = vld [vmem:[%s6863_s10 + $0x30] sm:$0xff] }
0x173b   : > { %5434 = vmatprep.mubr.msk.f32.mxu0 %vm5875_vm1, %v5876_v13 }
0x173c   : > { %v5779_v47 = vpop.eup %5778 }
0x173d   : > { %v3076_v48 = vmul.f32 %v5779_v47, %v5777_v42  ;;  %v4978_v47 = vld [vmem:[%s6863_s10 + $0x38] sm:$0xff] }
0x173f   : > { %5404 = vmatmul.mubr.msk.f32.vlgmr.msra.gmra.mrb[36].mxu1 %vm768_vm2, %v3076_v48  ;;  %v5638_v48 = vpack.c.bf16 %v4978_v47, %v4977_v46 }
0x1740   : > { %5407 = vmatpush3.xpose.msk.msra.mxu1 %vm768_vm2, %v3156_v45  ;;  %5408 = vmatprep.mubr.msk.f32.mxu1 %vm5875_vm1, %v5876_v13 }
0x1741   : > { %5411 = vmatprep.subr.mxu1 %v5876_v13 }
0x1743   : > { %5409 = vmatmul.mubr.msk.f32.vlgmr.msra.gmra.mrb[38].mxu1 %vm768_vm2, %v3154_v40 }
0x1744   : > { %5413 = vmatprep.mubr.msk.f32.mxu1 %vm5875_vm1, %v5876_v13 }
0x180d   : > { %v3393_v49 = vpop.f32.mrb[18].mxu0 }
0x180e   : > { %v3397_v50 = vsel %vm6126_vm3, %v3393_v49, -1e+30  ;;  %v5420_v51 = vpop.f32.mrb[19].mxu0  ;;  %v4968_v49 = vld [vmem:[%s6861_s8 + $0x20] sm:$0xff] }
0x180f   : > { %v3398_v52 = vsel %vm768_vm2, %v3397_v50, -inf }
0x1810   : > { %3399 = vmax.xlane.f32.xlu0 %v3398_v52  ;;  %v4970_v52 = vld [vmem:[%s6861_s8 + $0x30] sm:$0xff] }
0x1812   : > { %v3149_v53 = vpop.f32.mrb[36].mxu1 }
0x1813   : > { %v5405_v54 = vpop.f32.mrb[37].mxu1 }
0x1816   : > { %v3227_v55 = vpop.f32.mrb[38].mxu1 }
0x1817   : > { %v3231_v56 = vsel %vm6126_vm3, %v3227_v55, -1e+30  ;;  %v5410_v57 = vpop.f32.mrb[39].mxu1 }
0x1818   : > { %v3232_v58 = vsel %vm768_vm2, %v3231_v56, -inf }
0x1819   : > { %3233 = vmax.xlane.f32.xlu1 %v3232_v58  ;;  %v4966_v58 = vld [vmem:[%s6939_s28 + $0x4] ss:$0 sm:$0xff] }
0x189d   : > { %v3400_v59 = vpop.xlane.xlu0 %3399 }
0x189e   : > { %v3401_v21 = vsub.f32 %v3397_v50, %v3400_v59  ;;  %v4969_v50 = vld [vmem:[%s6861_s8 + $0x28] sm:$0xff] }
0x189f   : > { %v5629_v51 = vpack.c.bf16 %v4969_v50, %v4968_v49 }
0x18a0   : > { %v3402_v60 = vmul.f32 1.442695, %v3401_v21  ;;  %v4967_v21 = vld [vmem:[%s6940_s25 + $0x4] ss:$0 sm:$0xff] }
0x18a2   : > { %5780 = vpow2.f32 %v3402_v60 }
0x18a6   : > { %v3234_v61 = vpop.xlane.xlu1 %3233 }
0x18a7   : > { %v3235_v62 = vsub.f32 %v3231_v56, %v3234_v61 }
0x18a9   : > { %v3236_v63 = vmul.f32 1.442695, %v3235_v62  ;;  %v4980_v62 = vld [vmem:[%s6963_s26 + $0x1] ss:$0 sm:$0xff] }
0x18ab   : > { %5782 = vpow2.f32 %v3236_v63 }
0x18ac   : > { %v5781_v23 = vpop.eup %5780 }
0x18ad   : > { %v3404_v0 = vsel %vm768_vm2, %v5781_v23, 0.0 }
0x18ae   : > { %3405 = vadd.xlane.f32.xlu1 %v3404_v0 }
0x18b5   : > { %v5783_v1 = vpop.eup %5782 }
0x18b6   : > { %v3238_v39 = vsel %vm768_vm2, %v5783_v1, 0.0 }
0x18b7   : > { %3239 = vadd.xlane.f32.xlu0 %v3238_v39 }
0x18bf   : > { %3409 = vrot.lane.b32.xlu1 %v6467_v5, %s6961_s23 }
0x18c3   : > { %3486 = vrot.lane.b32.xlu1 %v3149_v53, %s6955_s20  ;;  %v4971_v53 = vld [vmem:[%s6861_s8 + $0x38] sm:$0xff] }
0x18c4   : > { %v5632_v54 = vpack.c.bf16 %v4971_v53, %v4970_v52 }
0x18cd   : > { %3243 = vrot.lane.b32.xlu0 %v6467_v5, %s6962_s11  ;;  %v4957_v5 = vld [vmem:[%s6859_s6 + $0x20] sm:$0xff]  ;;  %s6964_s11 = sld [smem:[#allocation19_spill]] }
0x18ce   : > { %v5623_v16 = vpack.c.bf16 %v4958_v15, %v4957_v5 }
0x18d0   : > { %5624 = vmatpush3.bf16.msra.mxu0 %v5623_v16 }
0x18d1   : > { %5625 = vmatprep.subr.bf16.mxu0 %v5874_v10 }
0x18d3   : > { %v4973_v39 = vld [vmem:[%s6964_s11 + $0x1] ss:$0 sm:$0xff] }
0x18d4   : > { %5627 = vmatpush3.bf16.msra.mxu0 %v5626_v19 }
0x18d5   : > { %5634 = vmatprep.subr.bf16.mxu0 %v5874_v10 }
0x193b   : > { %v3406_v3 = vpop.xlane.xlu1 %3405 }
0x193f   : > { %v3410_v12 = vpop.permute.xlu1 %3409 }
0x1943   : > { %v3487_v26 = vpop.permute.xlu1 %3486 }
0x1944   : > { %v3240_v4 = vpop.xlane.xlu0 %3239  ;;  %v3497_v28 = vsel %vm768_vm2, %v6495_v29, %v3487_v26 }
0x1945   : > { %5784 = vrcp.f32 %v3240_v4 }
0x1946   : > { %5786 = vrcp.f32 %v3406_v3 }
0x1948   : > { %v3244_v6 = vpop.permute.xlu0 %3243 }
0x1949   : > { %5412 = vmatpush3.msra.mxu1 %v3244_v6 }
0x194a   : > { %5421 = vmatprep.subr.mxu1 %v5876_v13 }
0x194f   : > { %v5785_v7 = vpop.eup %5784 }
0x1950   : > { %v3242_v8 = vmul.f32 %v5785_v7, %v5783_v1  ;;  %v5787_v9 = vpop.eup %5786 }
0x1951   : > { %v3408_v14 = vmul.f32 %v5787_v9, %v5781_v23 }
0x1952   : > { %5414 = vmatmul.mubr.msk.f32.vlgmr.msra.gmra.mrb[40].mxu1 %vm768_vm2, %v3242_v8 }
0x1953   : > { %5422 = vmatpush3.msra.mxu1 %v3410_v12  ;;  %5423 = vmatprep.mubr.msk.f32.mxu1 %vm5875_vm1, %v5876_v13 }
0x1954   : > { %5628 = vmatprep.subr.bf16.mxu1 %v5874_v10 }
0x1956   : > { %5424 = vmatmul.mubr.msk.f32.vlgmr.msra.gmra.mrb[42].mxu1 %vm768_vm2, %v3408_v14 }
0x1957   : > { %5445 = vmatprep.mubr.msk.f32.mxu1 %vm5875_vm1, %v5876_v13  ;;  %5630 = vmatpush3.bf16.msra.mxu1 %v5629_v51 }
0x1958   : > { %5631 = vmatprep.subr.bf16.mxu1 %v5874_v10 }
0x195b   : > { %5633 = vmatpush3.bf16.msra.mxu1 %v5632_v54 }
0x195c   : > { %5459 = vmatprep.subr.mxu1 %v5876_v13 }
0x1a25   : > { %v3315_v20 = vpop.f32.mrb[40].mxu1 }
0x1a26   : > { %3490 = vrot.lane.b32.xlu0 %v3315_v20, %s6956_s4  ;;  %v5415_v22 = vpop.f32.mrb[41].mxu1 }
0x1a29   : > { %v3481_v24 = vpop.f32.mrb[42].mxu1 }
0x1a2a   : > { %3494 = vrot.lane.b32.xlu1 %v3481_v24, %s6957_s21  ;;  %v5425_v25 = vpop.f32.mrb[43].mxu1 }
0x1a98   : > { %v3491_v27 = vpop.permute.xlu0 %3490 }
0x1a99   : > { %v3498_v30 = vsel %vm1443_vm4, %v3497_v28, %v3491_v27 }
0x1a9c   : > { %v3495_v31 = vpop.permute.xlu1 %3494 }
0x1a9d   : > { %v3499_v32 = vsel %vm1445_vm5, %v3498_v30, %v3495_v31 }
0x1a9e   : > { %5435 = vmatmul.mubr.msk.f32.vlgmr.msra.gmra.mrb[20].mxu0 %vm651_vm0, %v3499_v32 }
0x1a9f   : > { %5456 = vmatprep.mubr.msk.f32.mxu0 %vm5875_vm1, %v5876_v13 }
0x1b71   : > { %v3574_v33 = vpop.f32.mrb[20].mxu0 }
0x1b72   : > { %v3578_v35 = vadd.f32 %v3574_v33, %v6458_v2  ;;  %v5436_v36 = vpop.f32.mrb[21].mxu0  ;;  %v4976_v2 = vld [vmem:[%s6863_s10 + $0x28] sm:$0xff] }
0x1b73   : > { %v5635_v45 = vpack.c.bf16 %v4976_v2, %v4975_v44 }
0x1b74   : > { %v3587_v37 = vadd.f32 %v4963_v34, %v3578_v35 }
0x1b75   : > { %5636 = vmatpush3.bf16.msra.mxu0 %v5635_v45 }
0x1b76   : > { %v3592_v29 = vsel %vm651_vm0, %v3587_v37, 0.0  ;;  %5637 = vmatprep.subr.bf16.mxu0 %v5874_v10 }
0x1b77   : > { %3593 = vadd.xlane.f32.xlu0 %v3592_v29 }
0x1b79   : > { %5639 = vmatpush3.bf16.msra.mxu0 %v5638_v48 }
0x1b7a   : > { %5469 = vmatprep.subr.mxu0 %v5876_v13 }
0x1b7c   : > { %5457 = vmatmul.mubr.msk.f32.vlgmr.msra.gmra.mrb[22].mxu0 %vm651_vm0, %v6230_v11 }
0x1b7d   : > { %5471 = vmatprep.mubr.msk.f32.mxu0 %vm5875_vm1, %v5876_v13 }
0x1c04   : > { %v3594_v38 = vpop.xlane.xlu0 %3593 }
0x1c05   : > { %v3595_v40 = vmul.f32 0.03125, %v3594_v38 }
0x1c07   : > { %v3596_v41 = vsub.f32 %v3587_v37, %v3595_v40 }
0x1c09   : > { %v3597_v42 = vmul.f32 %v3596_v41, %v3596_v41 }
0x1c0b   : > { %v3598_v43 = vsel %vm651_vm0, %v3597_v42, 0.0 }
0x1c0c   : > { %3599 = vadd.xlane.f32.xlu1 %v3598_v43 }
0x1c4f   : > { %v3784_v63 = vpop.f32.mrb[22].mxu0 }
0x1c50   : > { %v6620_v23 = vadd.f32 %v4980_v62, %v3784_v63  ;;  %v5458_v0 = vpop.f32.mrb[23].mxu0 }
0x1c52   : > { %3954 = vrot.lane.b32.xlu0 %v6620_v23, %s6946_s27 }
0x1c56   : > { %4119 = vrot.lane.b32.xlu0 %v6620_v23, %s6948_s1 }
0x1c5a   : > { %4284 = vrot.lane.b32.xlu0 %v6620_v23, %s6949_s29 }
0x1c99   : > { %v3600_v11 = vpop.xlane.xlu1 %3599 }
0x1c9a   : > { %v3601_v55 = vmul.f32 0.03125, %v3600_v11 }
0x1c9c   : > { %v3602_v56 = vadd.f32 1e-05, %v3601_v55 }
0x1c9e   : > { %5788 = vrsqrt.f32 %v3602_v56 }
0x1ca8   : > { %v5789_v57 = vpop.eup %5788 }
0x1ca9   : > { %v3604_v59 = vmul.f32 %v5789_v57, %v3596_v41 }
0x1cab   : > { %v3611_v60 = vmul.f32 %v4966_v58, %v3604_v59 }
0x1cad   : > { %v6611_v61 = vadd.f32 %v4967_v21, %v3611_v60 }
0x1caf   : > { %5446 = vmatmul.mubr.msk.f32.vlgmr.msra.gmra.mrb[44].mxu1 %vm651_vm0, %v6611_v61 }
0x1cb0   : > { %5461 = vmatprep.mubr.msk.f32.mxu1 %vm5875_vm1, %v5876_v13  ;;  %5460 = vmatpush3.xpose.msk.msra.mxu1 %vm768_vm2, %v6620_v23 }
0x1cb1   : > { %5464 = vmatprep.subr.mxu1 %v5876_v13 }
0x1cc4   : > { %v3955_v1 = vpop.permute.xlu0 %3954 }
0x1cc5   : > { %5470 = vmatpush3.xpose.msk.msra.mxu0 %vm768_vm2, %v3955_v1 }
0x1cc6   : > { %5479 = vmatprep.subr.mxu0 %v5876_v13 }
0x1cc8   : > { %v4120_v8 = vpop.permute.xlu0 %4119 }
0x1ccc   : > { %v4285_v14 = vpop.permute.xlu0 %4284 }
0x1d82   : > { %v3701_v3 = vpop.f32.mrb[44].mxu1 }
0x1d83   : > { %v3702_v4 = vadd.f32 %v4973_v39, %v3701_v3  ;;  %v5447_v6 = vpop.f32.mrb[45].mxu1 }
0x1d85   : > { %v3788_v7 = vmul.f32 0.35355338, %v3702_v4 }
0x1d87   : > { %3952 = vrot.lane.b32.xlu1 %v3788_v7, %s6946_s27  ;;  %5462 = vmatmul.mubr.msk.f32.vlgmr.msra.gmra.mrb[46].mxu1 %vm768_vm2, %v3788_v7  ;;  %s6972_s27 = sld [smem:[#allocation25_spill]] }
0x1d88   : > { %5466 = vmatprep.mubr.msk.f32.mxu1 %vm5875_vm1, %v5876_v13 }
0x1d8b   : > { %4117 = vrot.lane.b32.xlu1 %v3788_v7, %s6948_s1 }
0x1d8f   : > { %4282 = vrot.lane.b32.xlu1 %v3788_v7, %s6949_s29  ;;  %s6965_s29 = sld [smem:[#allocation21_spill]] }
0x1d95   : > { %v4994_v1 = vld [vmem:[%s6965_s29 + $0x20] sm:$0xff]  ;;  %v4995_v39 = vld [vmem:[%s6965_s29 + $0x28] sm:$0xff]  ;;  %v4996_v4 = vld [vmem:[%s6965_s29 + $0x30] sm:$0xff] }
0x1d96   : > { %v5641_v3 = vpack.c.bf16 %v4995_v39, %v4994_v1  ;;  %v4997_v6 = vld [vmem:[%s6965_s29 + $0x38] sm:$0xff] }
0x1d97   : > { %v5644_v7 = vpack.c.bf16 %v4997_v6, %v4996_v4  ;;  %v5010_v6 = vld [vmem:[%s6868_s15 + $0x1] ss:$0 sm:$0xff] }
0x1df9   : > { %v3953_v9 = vpop.permute.xlu1 %3952 }
0x1dfa   : > { %5472 = vmatmul.mubr.msk.f32.vlgmr.msra.gmra.mrb[24].mxu0 %vm768_vm2, %v3953_v9 }
0x1dfb   : > { %5480 = vmatpush3.xpose.msk.msra.mxu0 %vm768_vm2, %v4120_v8  ;;  %5481 = vmatprep.mubr.msk.f32.mxu0 %vm5875_vm1, %v5876_v13 }
0x1dfc   : > { %5489 = vmatprep.subr.mxu0 %v5876_v13 }
0x1dfd   : > { %v4118_v12 = vpop.permute.xlu1 %4117 }
0x1dfe   : > { %5482 = vmatmul.mubr.msk.f32.vlgmr.msra.gmra.mrb[26].mxu0 %vm768_vm2, %v4118_v12 }
0x1dff   : > { %5490 = vmatpush3.xpose.msk.msra.mxu0 %vm768_vm2, %v4285_v14  ;;  %5491 = vmatprep.mubr.msk.f32.mxu0 %vm5875_vm1, %v5876_v13 }
0x1e00   : > { %5640 = vmatprep.subr.bf16.mxu0 %v5874_v10 }
0x1e01   : > { %v4283_v5 = vpop.permute.xlu1 %4282 }
0x1e02   : > { %5492 = vmatmul.mubr.msk.f32.vlgmr.msra.gmra.mrb[28].mxu0 %vm768_vm2, %v4283_v5 }
0x1e03   : > { %5507 = vmatprep.mubr.msk.f32.mxu0 %vm5875_vm1, %v5876_v13  ;;  %5642 = vmatpush3.bf16.msra.mxu0 %v5641_v3  ;;  %v5027_v3 = vld [vmem:[%s6869_s16 + $0xf8] sm:$0xff] }
0x1e04   : > { %5643 = vmatprep.subr.bf16.mxu0 %v5874_v10 }
0x1e07   : > { %5645 = vmatpush3.bf16.msra.mxu0 %v5644_v7 }
0x1e08   : > { %5652 = vmatprep.subr.bf16.mxu0 %v5874_v10 }
0x1e5a   : > { %v3861_v15 = vpop.f32.mrb[46].mxu1 }
0x1e5b   : > { %v5463_v16 = vpop.f32.mrb[47].mxu1  ;;  %v3865_v17 = vsel %vm768_vm2, %v3861_v15, -inf }
0x1e5c   : > { %3866 = vmax.xlane.f32.xlu0 %v3865_v17 }
0x1ecd   : > { %v4026_v18 = vpop.f32.mrb[24].mxu0 }
0x1ece   : > { %v5473_v19 = vpop.f32.mrb[25].mxu0  ;;  %v4030_v20 = vsel %vm768_vm2, %v4026_v18, -inf }
0x1ecf   : > { %4031 = vmax.xlane.f32.xlu1 %v4030_v20 }
0x1ed1   : > { %v4191_v22 = vpop.f32.mrb[26].mxu0 }
0x1ed2   : > { %v5483_v24 = vpop.f32.mrb[27].mxu0  ;;  %v4195_v25 = vsel %vm768_vm2, %v4191_v22, -inf }
0x1ed3   : > { %4196 = vmax.xlane.f32.xlu0 %v4195_v25  ;;  %v5000_v25 = vld [vmem:[%s6966_s9 + $0x1] ss:$0 sm:$0xff] }
0x1ed5   : > { %v4356_v26 = vpop.f32.mrb[28].mxu0 }
0x1ed6   : > { %v5493_v27 = vpop.f32.mrb[29].mxu0  ;;  %v4360_v28 = vsel %vm768_vm2, %v4356_v26, -inf }
0x1ed7   : > { %4361 = vmax.xlane.f32.xlu0 %v4360_v28 }
0x1ee0   : > { %3876 = vrot.lane.b32.xlu1 %v6620_v23, %s6951_s0  ;;  %s6968_s0 = sld [smem:[#allocation9_spill]] }
0x1ee6   : > { %s5033_s2 = sshll.u32 %s6968_s0, 7  ;;  %s5891_s0 = smov [#allocation2]  }
0x1ee7   : > { %s6810_s1 = scalar_lea.hbm %s6972_s27, %s5033_s2 }
0x1ee9   : > { %v3867_v30 = vpop.xlane.xlu0 %3866 }
0x1eea   : > { %v3868_v31 = vsub.f32 %v3861_v15, %v3867_v30 }
0x1eec   : > { %v3869_v32 = vmul.f32 1.442695, %v3868_v31 }
0x1eee   : > { %5790 = vpow2.f32 %v3869_v32 }
0x1ef8   : > { %v5791_v33 = vpop.eup %5790 }
0x1ef9   : > { %v3871_v34 = vsel %vm768_vm2, %v5791_v33, 0.0 }
0x1f04   : > { %3872 = vadd.xlane.f32.xlu1 %v3871_v34 }
0x1f5c   : > { %v4032_v35 = vpop.xlane.xlu1 %4031 }
0x1f5d   : > { %v4033_v36 = vsub.f32 %v4026_v18, %v4032_v35 }
0x1f5f   : > { %v4034_v37 = vmul.f32 1.442695, %v4033_v36 }
0x1f60   : > { %v3877_v29 = vpop.permute.xlu1 %3876  ;;  %v4197_v38 = vpop.xlane.xlu0 %4196 }
0x1f61   : > { %5792 = vpow2.f32 %v4034_v37  ;;  %v4198_v40 = vsub.f32 %v4191_v22, %v4197_v38  ;;  %5465 = vmatpush3.msra.mxu1 %v3877_v29  ;;  %v5007_v37 = vld [vmem:[%s6867_s14 + $0x30] sm:$0xff]  ;;  %v5008_v29 = vld [vmem:[%s6867_s14 + $0x38] sm:$0xff] }
0x1f62   : > { %5474 = vmatprep.subr.mxu1 %v5876_v13  ;;  %v5650_v38 = vpack.c.bf16 %v5008_v29, %v5007_v37 }
0x1f63   : > { %v4199_v41 = vmul.f32 1.442695, %v4198_v40  ;;  %v5012_v40 = vld [vmem:[%s6869_s16 + $0x80] sm:$0xff] }
0x1f64   : > { %v4362_v42 = vpop.xlane.xlu0 %4361 }
0x1f65   : > { %5794 = vpow2.f32 %v4199_v41  ;;  %v4363_v43 = vsub.f32 %v4356_v26, %v4362_v42  ;;  %v5013_v41 = vld [vmem:[%s6869_s16 + $0x88] sm:$0xff]  ;;  %v5014_v42 = vld [vmem:[%s6869_s16 + $0x90] sm:$0xff] }
0x1f67   : > { %v4364_v44 = vmul.f32 1.442695, %v4363_v43  ;;  %v5653_v43 = vpack.c.bf16 %v5013_v41, %v5012_v40 }
0x1f69   : > { %5796 = vpow2.f32 %v4364_v44  ;;  %v5015_v44 = vld [vmem:[%s6869_s16 + $0x98] sm:$0xff] }
0x1f6b   : > { %v5793_v2 = vpop.eup %5792 }
0x1f6c   : > { %v4036_v45 = vsel %vm768_vm2, %v5793_v2, 0.0 }
0x1f6d   : > { %4037 = vadd.xlane.f32.xlu0 %v4036_v45  ;;  %v5016_v45 = vld [vmem:[%s6869_s16 + $0xa0] sm:$0xff] }
0x1f6f   : > { %v5795_v46 = vpop.eup %5794 }
0x1f70   : > { %v4201_v47 = vsel %vm768_vm2, %v5795_v46, 0.0 }
0x1f71   : > { %4202 = vadd.xlane.f32.xlu1 %v4201_v47 }
0x1f73   : > { %v5797_v48 = vpop.eup %5796 }
0x1f74   : > { %v4366_v49 = vsel %vm768_vm2, %v5797_v48, 0.0 }
0x1f75   : > { %4367 = vadd.xlane.f32.xlu0 %v4366_v49  ;;  %v5019_v49 = vld [vmem:[%s6869_s16 + $0xb8] sm:$0xff] }
0x1f82   : > { %4206 = vrot.lane.b32.xlu1 %v6620_v23, %s6952_s18 }
0x1f86   : > { %4371 = vrot.lane.b32.xlu1 %v6620_v23, %s6953_s19 }
0x1f8b   : > { %4041 = vrot.lane.b32.xlu0 %v6620_v23, %s6950_s30  ;;  %s6967_s30 = sld [smem:[#allocation6_spill]] }
0x1f91   : > { %v3873_v50 = vpop.xlane.xlu1 %3872  ;;  %s631_s18 = sand.u32 1, %s6967_s30  }
0x1f92   : > { %5798 = vrcp.f32 %v3873_v50  ;;  %s4884_s19 = sshll.u32 %s631_s18, 3  ;;  %s4796_s29 = scalar_lea.sflag [#allocation3], %s631_s18 }
0x1f93   : > { %s633_s26 = scalar_lea.vmem [#allocation2], %s4884_s19  ;;  %s5814_s19 = sshll.u32 %s5891_s0, 4  ;;  %s5815_s19 = int_to_ptr.vmem [resolvable:$false] %s5814_s19 }
0x1f94   : > { %s4809_s24 = sshll.u32 %s633_s26, 4  ;;  %s5816_s13 = scalar_lea.vmem %s5815_s19, 256  ;;  %s6812_s24 = int_to_ptr.vmem [resolvable:$true] %s4809_s24 }
0x1f95   : > { %s5810_s30 = scalar_lea.vmem %s6812_s24, 128  ;;  %p5817_p0 = scmp.lt.s32.totalorder %s6812_s24, %s5815_s19 }
0x1f96   : > { %p5811_p11 = scmp.ne.s32.totalorder %s6812_s24, %s5810_s30  ;;  %p5818_p1 = scmp.lt.s32.totalorder %s5816_s13, %s5810_s30 }
0x1f98   : > { %p5812_p12 = pnand %p5811_p11, %p6035_p5  ;;  %p5819_p2 = por %p5818_p1, %p5817_p0 }
0x1f9a   : > { %p5813_p13 = pneg %p5812_p12 }
0x1f9c   : > { %v5799_v51 = vpop.eup %5798  ;;  %p5820_p3 = pnand %p5819_p2, %p5813_p13 }
0x1f9d   : > { %v3875_v52 = vmul.f32 %v5799_v51, %v5791_v33  ;;  %v5020_v51 = vld [vmem:[%s6869_s16 + $0xc0] sm:$0xff] }
0x1f9f   : > { %5467 = vmatmul.mubr.msk.f32.vlgmr.msra.gmra.mrb[48].mxu1 %vm768_vm2, %v3875_v52  ;;  %v5021_v52 = vld [vmem:[%s6869_s16 + $0xc8] sm:$0xff] }
0x1fa0   : > { %5476 = vmatprep.mubr.msk.f32.mxu1 %vm5875_vm1, %v5876_v13 }
0x1ffa   : > { %v4038_v53 = vpop.xlane.xlu0 %4037 }
0x1ffb   : > { %5800 = vrcp.f32 %v4038_v53  ;;  %v5665_v53 = vpack.c.bf16 %v5021_v52, %v5020_v51 }
0x1ffe   : > { %v4203_v54 = vpop.xlane.xlu1 %4202 }
0x1fff   : > { %5802 = vrcp.f32 %v4203_v54  ;;  %v5022_v54 = vld [vmem:[%s6869_s16 + $0xd0] sm:$0xff] }
0x2002   : > { %v4368_v11 = vpop.xlane.xlu0 %4367  ;;  %v4207_v57 = vpop.permute.xlu1 %4206 }
0x2003   : > { %5804 = vrcp.f32 %v4368_v11  ;;  %v5023_v11 = vld [vmem:[%s6869_s16 + $0xd8] sm:$0xff] }
0x2005   : > { %v5801_v55 = vpop.eup %5800 }
0x2006   : > { %v4040_v56 = vmul.f32 %v5801_v55, %v5793_v2  ;;  %v4042_v58 = vpop.permute.xlu0 %4041  ;;  %v4372_v60 = vpop.permute.xlu1 %4371  ;;  %v5656_v2 = vpack.c.bf16 %v5015_v44, %v5014_v42  ;;  %v5668_v55 = vpack.c.bf16 %v5023_v11, %v5022_v54 }
0x2007   : > { %5475 = vmatpush3.msra.mxu1 %v4042_v58 }
0x2008   : > { %5477 = vmatmul.mubr.msk.f32.vlgmr.msra.gmra.mrb[50].mxu1 %vm768_vm2, %v4040_v56  ;;  %5484 = vmatprep.subr.mxu1 %v5876_v13  ;;  %v5024_v56 = vld [vmem:[%s6869_s16 + $0xe0] sm:$0xff] }
0x2009   : > { %v5803_v59 = vpop.eup %5802  ;;  %5485 = vmatpush3.msra.mxu1 %v4207_v57  ;;  %5486 = vmatprep.mubr.msk.f32.mxu1 %vm5875_vm1, %v5876_v13  ;;  %v5025_v57 = vld [vmem:[%s6869_s16 + $0xe8] sm:$0xff] }
0x200a   : > { %v4205_v21 = vmul.f32 %v5803_v59, %v5795_v46  ;;  %5494 = vmatprep.subr.mxu1 %v5876_v13  ;;  %v5017_v46 = vld [vmem:[%s6869_s16 + $0xa8] sm:$0xff]  ;;  %v5671_v58 = vpack.c.bf16 %v5025_v57, %v5024_v56 }
0x200b   : > { %v5659_v47 = vpack.c.bf16 %v5017_v46, %v5016_v45 }
0x200c   : > { %5487 = vmatmul.mubr.msk.f32.vlgmr.msra.gmra.mrb[52].mxu1 %vm768_vm2, %v4205_v21 }
0x200d   : > { %v5805_v62 = vpop.eup %5804  ;;  %5495 = vmatpush3.msra.mxu1 %v4372_v60  ;;  %5496 = vmatprep.mubr.msk.f32.mxu1 %vm5875_vm1, %v5876_v13 }
0x200e   : > { %v4370_v63 = vmul.f32 %v5805_v62, %v5797_v48  ;;  %5646 = vmatprep.subr.bf16.mxu1 %v5874_v10  ;;  %v5018_v48 = vld [vmem:[%s6869_s16 + $0xb0] sm:$0xff] }
0x200f   : > { %v5662_v50 = vpack.c.bf16 %v5019_v49, %v5018_v48 }
0x2010   : > { %5497 = vmatmul.mubr.msk.f32.vlgmr.msra.gmra.mrb[54].mxu1 %vm768_vm2, %v4370_v63  ;;  %v5003_v63 = vld [vmem:[%s6939_s28 + $0x5] ss:$0 sm:$0xff] }
0x2011   : > { %5518 = vmatprep.mubr.msk.f32.mxu1 %vm5875_vm1, %v5876_v13 }
0x2072   : > { %v3948_v23 = vpop.f32.mrb[48].mxu1 }
0x2073   : > { %v5468_v0 = vpop.f32.mrb[49].mxu1 }
0x2074   : > { %v5004_v0 = vld [vmem:[%s6940_s25 + $0x5] ss:$0 sm:$0xff] }
0x20db   : > { %v4113_v8 = vpop.f32.mrb[50].mxu1 }
0x20dc   : > { %4448 = vrot.lane.b32.xlu0 %v4113_v8, %s6955_s20  ;;  %v5478_v9 = vpop.f32.mrb[51].mxu1 }
0x20df   : > { %v4278_v12 = vpop.f32.mrb[52].mxu1 }
0x20e0   : > { %4452 = vrot.lane.b32.xlu1 %v4278_v12, %s6956_s4  ;;  %v5488_v14 = vpop.f32.mrb[53].mxu1  ;;  %s6970_s4 = sld [smem:[#allocation23_spill]] }
0x20e3   : > { %v4443_v5 = vpop.f32.mrb[54].mxu1 }
0x20e4   : > { %4456 = vrot.lane.b32.xlu0 %v4443_v5, %s6957_s21  ;;  %v5498_v15 = vpop.f32.mrb[55].mxu1  ;;  %v5029_v5 = vld [vmem:[%s6870_s17 + $0x1] ss:$0 sm:$0xff] }
0x214e   : > { %v4449_v16 = vpop.permute.xlu0 %4448 }
0x214f   : > { %v4459_v18 = vsel %vm768_vm2, %v3948_v23, %v4449_v16 }
0x2152   : > { %v4453_v17 = vpop.permute.xlu1 %4452 }
0x2153   : > { %v4460_v19 = vsel %vm1443_vm4, %v4459_v18, %v4453_v17 }
0x2156   : > { %v4457_v20 = vpop.permute.xlu0 %4456 }
0x2157   : > { %v4461_v22 = vsel %vm1445_vm5, %v4460_v19, %v4457_v20 }
0x2158   : > { %5508 = vmatmul.mubr.msk.f32.vlgmr.msra.gmra.mrb[30].mxu0 %vm651_vm0, %v4461_v22 }
0x2159   : > { %5553 = vmatprep.mubr.msk.f32.mxu0 %vm5875_vm1, %v5876_v13  ;;  %v5005_v13 = vld [vmem:[%s6867_s14 + $0x20] sm:$0xff]  ;;  %5654 = vmatpush3.bf16.msra.mxu0 %v5653_v43 }
0x215a   : > { %5655 = vmatprep.subr.bf16.mxu0 %v5874_v10 }
0x215d   : > { %5657 = vmatpush3.bf16.msra.mxu0 %v5656_v2 }
0x215e   : > { %5658 = vmatprep.subr.bf16.mxu0 %v5874_v10 }
0x2161   : > { %5660 = vmatpush3.bf16.msra.mxu0 %v5659_v47 }
0x2162   : > { %5661 = vmatprep.subr.bf16.mxu0 %v5874_v10 }
0x2165   : > { %5663 = vmatpush3.bf16.msra.mxu0 %v5662_v50 }
0x2166   : > { %5664 = vmatprep.subr.bf16.mxu0 %v5874_v10 }
0x2169   : > { %5666 = vmatpush3.bf16.msra.mxu0 %v5665_v53 }
0x216a   : > { %5667 = vmatprep.subr.bf16.mxu0 %v5874_v10 }
0x216d   : > { %5669 = vmatpush3.bf16.msra.mxu0 %v5668_v55 }
0x216e   : > { %5670 = vmatprep.subr.bf16.mxu0 %v5874_v10 }
0x2171   : > { %5672 = vmatpush3.bf16.msra.mxu0 %v5671_v58 }
0x2172   : > { %5673 = vmatprep.subr.bf16.mxu0 %v5874_v10 }
0x222b   : > { %v4536_v24 = vpop.f32.mrb[30].mxu0 }
0x222c   : > { %v4540_v26 = vadd.f32 %v4536_v24, %v6611_v61  ;;  %v5509_v27 = vpop.f32.mrb[31].mxu0  ;;  %v5006_v61 = vld [vmem:[%s6867_s14 + $0x28] sm:$0xff] }
0x222d   : > { %v5647_v36 = vpack.c.bf16 %v5006_v61, %v5005_v13 }
0x222e   : > { %v4549_v28 = vadd.f32 %v5000_v25, %v4540_v26 }
0x222f   : > { %5648 = vmatpush3.bf16.msra.mxu1 %v5647_v36 }
0x2230   : > { %v4554_v30 = vsel %vm651_vm0, %v4549_v28, 0.0  ;;  %5649 = vmatprep.subr.bf16.mxu1 %v5874_v10  ;;  %v5026_v10 = vld [vmem:[%s6869_s16 + $0xf0] sm:$0xff] }
0x2231   : > { %4555 = vadd.xlane.f32.xlu1 %v4554_v30  ;;  %v5674_v4 = vpack.c.bf16 %v5027_v3, %v5026_v10 }
0x2233   : > { %5651 = vmatpush3.bf16.msra.mxu1 %v5650_v38  ;;  %5675 = vmatpush3.bf16.msra.mxu0 %v5674_v4 }
0x22be   : > { %v4556_v31 = vpop.xlane.xlu1 %4555 }
0x22bf   : > { %v4557_v32 = vmul.f32 0.03125, %v4556_v31  ;;  %v5030_v31 = vld [vmem:[%s6970_s4] ss:$0 sm:$0xff] }
0x22c1   : > { %v4558_v33 = vsub.f32 %v4549_v28, %v4557_v32 }
0x22c3   : > { %v4559_v34 = vmul.f32 %v4558_v33, %v4558_v33 }
0x22c5   : > { %v4560_v35 = vsel %vm651_vm0, %v4559_v34, 0.0 }
0x22c6   : > { %4561 = vadd.xlane.f32.xlu0 %v4560_v35 }
0x2353   : > { %v4562_v59 = vpop.xlane.xlu0 %4561 }
0x2354   : > { %v4563_v21 = vmul.f32 0.03125, %v4562_v59 }
0x2356   : > { %v4564_v60 = vadd.f32 1e-05, %v4563_v21 }
0x2358   : > { %5806 = vrsqrt.f32 %v4564_v60 }
0x2362   : > { %v5807_v62 = vpop.eup %5806 }
0x2363   : > { %v4566_v23 = vmul.f32 %v5807_v62, %v4558_v33  ;;  %v5031_v33 = vld [vmem:[%s6971_s12] ss:$0 sm:$0xff] }
0x2365   : > { %v4573_v1 = vmul.f32 %v5003_v63, %v4566_v23 }
0x2367   : > { %v4580_v39 = vadd.f32 %v5004_v0, %v4573_v1 }
0x2369   : > { %5519 = vmatmul.mubr.msk.f32.vlgmr.msra.gmra.mrb[56].mxu1 %vm651_vm0, %v4580_v39 }
0x243c   : > { %v4663_v7 = vpop.f32.mrb[56].mxu1 }
0x243d   : > { %v4664_v8 = vadd.f32 %v5010_v6, %v4663_v7  ;;  %v5520_v9 = vpop.f32.mrb[57].mxu1 }
0x243f   : > { %v4667_v12 = vmax.f32 %v4664_v8, 0.0 }
0x2441   : > { %5554 = vmatmul.mubr.f32.vlgmr.msra.gmra.mrb[32].mxu0 %v4667_v12 }
0x2514   : > { %v4751_v14 = vpop.f32.mrb[32].mxu0 }
0x2515   : > { %v4755_v15 = vadd.f32 %v4751_v14, %v4580_v39  ;;  %v5555_v16 = vpop.f32.mrb[33].mxu0 }
0x2517   : > { %v4764_v17 = vadd.f32 %v5029_v5, %v4755_v15 }
0x2519   : > { %v4767_v18 = vsel %vm651_vm0, %v4764_v17, 0.0 }
0x251a   : > { %4768 = vadd.xlane.f32.xlu0 %v4767_v18 }
0x25a7   : > { %v4769_v19 = vpop.xlane.xlu0 %4768 }
0x25a8   : > { %v4770_v20 = vmul.f32 0.03125, %v4769_v19 }
0x25aa   : > { %v4771_v22 = vsub.f32 %v4764_v17, %v4770_v20 }
0x25ac   : > { %v4772_v24 = vmul.f32 %v4771_v22, %v4771_v22 }
0x25ae   : > { %v4773_v25 = vsel %vm651_vm0, %v4772_v24, 0.0 }
0x25af   : > { %4774 = vadd.xlane.f32.xlu1 %v4773_v25 }
0x263c   : > { %v4775_v26 = vpop.xlane.xlu1 %4774 }
0x263d   : > { %v4776_v27 = vmul.f32 0.03125, %v4775_v26 }
0x263f   : > { %v4777_v28 = vadd.f32 1e-05, %v4776_v27 }
0x2641   : > { %5808 = vrsqrt.f32 %v4777_v28 }
0x264b   : > { %v5809_v30 = vpop.eup %5808 }
0x264c   : > { %v4779_v32 = vmul.f32 %v5809_v30, %v4771_v22 }
0x264e   : > { %v4786_v34 = vmul.f32 %v5030_v31, %v4779_v32 }
0x2650   : > { %v4793_v35 = vadd.f32 %v5031_v33, %v4786_v34 }
0x2652   : > { %4794 = vst.msk [vmem:[%s633_s26] sm:$0xff] %vm651_vm0, %v4793_v35 }
0x2653   : > { %5823 = shalt.err (!%p5820_p3)
}
0x2654   : > { %s5824_s18 = scalar_lea.hbm %s6810_s1, 128  ;;  %s5828_s9 = scalar_lea.hbm %s6972_s27, 256 }
0x2655   : > { %p5825_p4 = scmp.ne.s32.totalorder %s6810_s1, %s5824_s18  ;;  %p5829_p9 = scmp.lt.u32.totalorder %s6810_s1, %s6972_s27 }
0x2656   : > { %p5830_p10 = scmp.lt.u32.totalorder %s5828_s9, %s5824_s18  ;;  %p5832_p12 = scmp.lt.u32.totalorder %s5824_s18, %s6810_s1 }
0x2657   : > { %p5826_p7 = pnand %p5825_p4, %p6035_p5 }
0x2658   : > { %p5831_p11 = por %p5830_p10, %p5829_p9 }
0x2659   : > { %p5827_p8 = pneg %p5826_p7 }
0x265a   : > { %p5833_p13 = por %p5832_p12, %p5831_p11 }
0x265c   : > { %p5834_p0 = pnand %p5833_p13, %p5827_p8 }
0x265e   : > { %5837 = shalt.err (!%p5834_p0)
}
0x265f   : > { %5676 = dma.vmem_to_hbm [thread:$0]  (%p6035_p5), %s6812_s24, 128, %s6810_s1, %s4796_s29  }
0x2660 PF: > { %s6973_s2 = sld [smem:[#allocation8_spill]]  ;;  %s6974_s26 = sld [smem:[#allocation5_spill]] }
0x2666   : > { %p5682_p1 = scmp.ge.s32.totalorder %s6973_s2, 2  ;;  %s4821_s11 = sand.u32 1, %s6974_s26  }
0x2667   : > { %s4822_s30 = scalar_lea.sflag [#allocation3], %s4821_s11 }
0x2668   : > { %p5679_p2 = pnand %p5682_p1, %p6039_p6 }
0x266a   : > { %5855 = dma.done.wait (!%p5679_p2), %s4822_s30, 128  }
0x266b   : > { %5857 = vsyncadd (!%p5679_p2), %s4822_s30, 4294967168  ;;  %s6976_s24 = sld [smem:[#allocation10_spill]]  ;;  %s6977_s1 = sld [smem:[#allocation6_spill]] }
0x266c   : > { %s6978_s22 = sld [smem:[#allocation7_spill]]  ;;  %s6979_s23 = sld [smem:[#allocation11_spill]] }
0x2671   : > { %p30_p3 = scmp.ge.s32.totalorder %s6976_s24, 4  }
0x2673   :  { %32 = sbr.rel (!%p30_p3) target bundleno = 16 (0x10), region = 162 }
0x267a   :  { %4827 = vsyncpa [#allocation3], 1 }
0x267b   :  { %4829 = vsyncpa [#allocation3 + $0x1], 1 }

</bundles_post_ra>
